<compile_context>
chip_gen: v6e
topology: v6e:2x2x1
jax: 0.10.0
libtpu: 0.0.40
codegen_flags: <defaults>
</compile_context>

<pallas_src>
import jax
import jax.numpy as jnp
from jax.experimental import pallas as pl
from jax.experimental.pallas import tpu as pltpu


_LANES = 128                       # lane-dense output-channel padding
_TM_MAX = 512                      # M tile; safe for v7x 64 MiB VMEM
                                   # (on v6e with large images 1024 is better)
_VMEM_LIMIT = 48 * 1024 * 1024     # explicit scoped-VMEM budget (v7x-safe)
_BN_EPS = 1e-5


def _round_up(x, m):
    return ((x + m - 1) // m) * m


# ----------------------------------------------------------------------------
# Pallas kernels
# ----------------------------------------------------------------------------
def _matmul_stats_kernel(x_ref, w_ref, y_ref, stats_ref):
    """Y = X @ W (bf16 MXU, f32 acc) + per-tile partial BatchNorm statistics.

    Writes the Y tile (bf16) and an (8, N) stats block: row 0 = sum(Y, axis=0),
    row 1 = sum(Y*Y, axis=0), rows 2..7 = 0.  Zero-padded M rows / channel
    lanes contribute zero, so the wrapper-side reduction over tiles (divided by
    the real M) is exact.
    """
    y = jnp.dot(x_ref[...], w_ref[...], preferred_element_type=jnp.float32)
    y_ref[...] = y.astype(y_ref.dtype)
    s = jnp.sum(y, axis=0, keepdims=True)
    sq = jnp.sum(y * y, axis=0, keepdims=True)
    row = jax.lax.broadcasted_iota(jnp.int32, stats_ref.shape, 0)
    stats_ref[...] = jnp.where(row == 0, s, jnp.where(row == 1, sq, 0.0))


def _bn_apply_kernel(relu: bool, has_residual: bool):
    """out = Y*scale + bias [+ residual] [ReLU]; math in f32, store bf16."""
    def kernel(*refs):
        if has_residual:
            y_ref, s_ref, b_ref, r_ref, o_ref = refs
        else:
            y_ref, s_ref, b_ref, o_ref = refs
        out = y_ref[...].astype(jnp.float32) * s_ref[...] + b_ref[...]
        if has_residual:
            out = out + r_ref[...].astype(jnp.float32)
        if relu:
            out = jnp.maximum(out, 0.0)
        o_ref[...] = out.astype(o_ref.dtype)
    return kernel


def _pool_fc_sigmoid_kernel(x_ref, w_ref, b_ref, o_ref):
    """AdaptiveAvgPool2d((1,1)) + Linear + Sigmoid, fused (tiny epilogue)."""
    pooled = jnp.mean(x_ref[...].astype(jnp.float32), axis=1)        # (B, C)
    y = jnp.dot(pooled, w_ref[...], preferred_element_type=jnp.float32)
    y = y + b_ref[...]
    o_ref[...] = (1.0 / (1.0 + jnp.exp(-y))).astype(o_ref.dtype)


# ----------------------------------------------------------------------------
# Glue: im2col + pallas_call wrappers
# ----------------------------------------------------------------------------
def _im2col(x, kh, kw, stride, pad):
    """x: (B, H, W, C) NHWC -> (B*Ho*Wo, kh*kw*C), K ordered tap-major then C."""
    B, H, W, C = x.shape
    xp = jnp.pad(x, ((0, 0), (pad, pad), (pad, pad), (0, 0)))
    Ho = (H + 2 * pad - kh) // stride + 1
    Wo = (W + 2 * pad - kw) // stride + 1
    patches = []
    for i in range(kh):
        for j in range(kw):
            patches.append(
                xp[:, i:i + stride * (Ho - 1) + 1:stride,
                      j:j + stride * (Wo - 1) + 1:stride, :])
    cols = jnp.stack(patches, axis=3)                  # (B, Ho, Wo, kh*kw, C)
    return cols.reshape(B * Ho * Wo, kh * kw * C), Ho, Wo


def _matmul_stats(cols, wmat):
    """cols: (M, K) bf16, wmat: (K, N_total) bf16 with N_total % 128 == 0.

    Returns (y_pad (M_pad, N_total) bf16, ssum (N_total,), ssq (N_total,), tiling).
    """
    M, K = cols.shape
    N_total = wmat.shape[1]
    TM = min(_TM_MAX, _round_up(M, 8))
    M_pad = _round_up(M, TM)
    n_tiles = M_pad // TM
    Kp = _round_up(K, 8)
    cols_p = jnp.pad(cols, ((0, M_pad - M), (0, Kp - K)))
    w_p = jnp.pad(wmat, ((0, Kp - K), (0, 0)))

    flops = 2 * M_pad * Kp * N_total
    bytes_accessed = (M_pad * Kp * 2 + Kp * N_total * 2
                      + M_pad * N_total * 2 + n_tiles * 8 * N_total * 4)

    y_pad, stats = pl.pallas_call(
        _matmul_stats_kernel,
        out_shape=[jax.ShapeDtypeStruct((M_pad, N_total), jnp.bfloat16),
                   jax.ShapeDtypeStruct((n_tiles * 8, N_total), jnp.float32)],
        grid_spec=pltpu.PrefetchScalarGridSpec(
            num_scalar_prefetch=0,
            grid=(n_tiles,),
            in_specs=[pl.BlockSpec((TM, Kp), lambda i: (i, 0)),        # X tile
                      pl.BlockSpec((Kp, N_total), lambda i: (0, 0))],  # W resident
            out_specs=[pl.BlockSpec((TM, N_total), lambda i: (i, 0)),  # Y tile
                       pl.BlockSpec((8, N_total), lambda i: (i, 0))]), # stats
        compiler_params=pltpu.CompilerParams(
            dimension_semantics=("parallel",),   # per-tile stats -> megacore OK
            vmem_limit_bytes=_VMEM_LIMIT),
        cost_estimate=pl.CostEstimate(flops=flops, transcendentals=0,
                                      bytes_accessed=bytes_accessed),
    )(cols_p, w_p)

    st = stats.reshape(n_tiles, 8, N_total)
    ssum = jnp.sum(st[:, 0, :], axis=0)
    ssq = jnp.sum(st[:, 1, :], axis=0)
    tiling = dict(m=M, tm=TM, m_pad=M_pad, n_tiles=n_tiles)
    return y_pad, ssum, ssq, tiling


def _bn_fold(ssum, ssq, m_real, gamma, beta, n_seg, col_off):
    """Fold train-mode BatchNorm into a per-channel affine (scale, bias)."""
    s = ssum[col_off:col_off + n_seg]
    sq = ssq[col_off:col_off + n_seg]
    inv_m = 1.0 / float(m_real)
    mean = s * inv_m
    var = jnp.maximum(sq * inv_m - mean * mean, 0.0)
    g = jnp.pad(gamma, (0, n_seg - gamma.shape[0])).astype(jnp.float32)
    b = jnp.pad(beta, (0, n_seg - beta.shape[0])).astype(jnp.float32)
    scale = g * jax.lax.rsqrt(var + _BN_EPS)
    bias = b - mean * scale
    return scale.reshape(1, n_seg), bias.reshape(1, n_seg)


def _bn_apply(y_pad, col_block, n_seg, scale, bias, tiling, *, relu,
              residual=None):
    """BN affine (+residual)(+ReLU) over the Y column segment `col_block`."""
    tm, m_pad, n_tiles = tiling["tm"], tiling["m_pad"], tiling["n_tiles"]
    args = [y_pad, scale, bias]
    in_specs = [pl.BlockSpec((tm, n_seg), lambda i, cb=col_block: (i, cb)),
                pl.BlockSpec((1, n_seg), lambda i: (0, 0)),
                pl.BlockSpec((1, n_seg), lambda i: (0, 0))]
    if residual is not None:
        assert residual.shape == (m_pad, n_seg), (residual.shape, m_pad, n_seg)
        args.append(residual)
        in_specs.append(pl.BlockSpec((tm, n_seg), lambda i: (i, 0)))
    bytes_accessed = (2 * m_pad * n_seg * 2 + 2 * n_seg * 4
                      + (m_pad * n_seg * 2 if residual is not None else 0))
    return pl.pallas_call(
        _bn_apply_kernel(relu, residual is not None),
        out_shape=jax.ShapeDtypeStruct((m_pad, n_seg), jnp.bfloat16),
        grid_spec=pltpu.PrefetchScalarGridSpec(
            num_scalar_prefetch=0,
            grid=(n_tiles,),
            in_specs=in_specs,
            out_specs=pl.BlockSpec((tm, n_seg), lambda i: (i, 0))),
        compiler_params=pltpu.CompilerParams(
            dimension_semantics=("parallel",),
            vmem_limit_bytes=_VMEM_LIMIT),
        cost_estimate=pl.CostEstimate(flops=4 * m_pad * n_seg, transcendentals=0,
                                      bytes_accessed=bytes_accessed),
    )(*args)


def _conv_weight_matrix(w, n_seg):
    """(Cout, Cin, kh, kw) OIHW conv weight -> (kh*kw*Cin, n_seg) matmul RHS."""
    Cout, Cin, kh, kw = w.shape
    wm = jnp.transpose(w, (2, 3, 1, 0)).reshape(kh * kw * Cin, Cout)
    return jnp.pad(wm, ((0, 0), (0, n_seg - Cout)))


def conv_bn(x_nhwc, w, gamma, beta, *, stride, padding, relu, residual_pad=None):
    """Conv2d(bias=False) + BatchNorm2d(train) [+ residual] [+ ReLU].

    Returns (out_pad (M_pad, n_seg) bf16, (B, Ho, Wo, Cout)).  `residual_pad`
    must already be in the padded (M_pad, n_seg) bf16 layout produced by a
    previous conv_bn / _bn_apply call (no re-pad round trip).
    """
    B, H, W, Cin = x_nhwc.shape
    Cout, Cin_w, kh, kw = w.shape
    assert Cin_w == Cin
    cols, Ho, Wo = _im2col(x_nhwc, kh, kw, stride, padding)
    n_seg = _round_up(Cout, _LANES)
    wmat = _conv_weight_matrix(w, n_seg).astype(jnp.bfloat16)
    y_pad, ssum, ssq, tiling = _matmul_stats(cols.astype(jnp.bfloat16), wmat)
    scale, bias = _bn_fold(ssum, ssq, tiling["m"], gamma, beta, n_seg, 0)
    out_pad = _bn_apply(y_pad, 0, n_seg, scale, bias, tiling, relu=relu,
                        residual=residual_pad)
    return out_pad, (B, Ho, Wo, Cout)


def _act_nhwc(act):
    """(padded 2D bf16, (B,H,W,C)) -> NHWC view (XLA slice/reshape glue)."""
    pad2d, (B, H, W, C) = act
    return pad2d[:B * H * W, :C].reshape(B, H, W, C)


# ----------------------------------------------------------------------------
# Residual blocks
# ----------------------------------------------------------------------------
def res_block_identity(act, p):
    """Res_block with identity skip (cin == cout and down == 1)."""
    x_pad, _ = act
    h_pad, shp = conv_bn(_act_nhwc(act), p["w1"], *p["bn1"],
                         stride=1, padding=1, relu=True)
    out_pad, shp2 = conv_bn(_act_nhwc((h_pad, shp)), p["w2"], *p["bn2"],
                            stride=1, padding=1, relu=True, residual_pad=x_pad)
    return out_pad, shp2


def res_block_downsample(act, p, down):
    """Res_block with a 1x1/stride skip conv, fused into the 3x3 conv matmul.

    The 1x1 skip conv (stride=down, pad=0) reads exactly the centre-tap pixels
    of the 3x3 conv's im2col (stride=down, pad=1), so its weight is zero-padded
    along K (nonzero only at rows [4*Cin, 5*Cin)) and concatenated along N.
    One matmul produces both pre-BN activations; two BN-apply calls read the
    two disjoint 128-lane column segments of the same Y.
    """
    x = _act_nhwc(act)
    B, H, W, Cin = x.shape
    w1 = p["w1"]
    Cout = w1.shape[0]
    n_seg = _round_up(Cout, _LANES)

    cols, Ho, Wo = _im2col(x, 3, 3, down, 1)
    K = cols.shape[1]

    w_main = _conv_weight_matrix(w1, n_seg)                          # (K, n_seg)
    ws = jnp.transpose(p["w_skip"].reshape(Cout, Cin))               # (Cin, Cout)
    w_skip = jnp.zeros((K, n_seg), jnp.float32)
    w_skip = w_skip.at[4 * Cin:5 * Cin, :Cout].set(ws)               # centre tap
    w_comb = jnp.concatenate([w_main, w_skip], axis=1).astype(jnp.bfloat16)

    y_pad, ssum, ssq, tiling = _matmul_stats(cols.astype(jnp.bfloat16), w_comb)
    sc1, bi1 = _bn_fold(ssum, ssq, tiling["m"], *p["bn1"], n_seg, 0)
    scs, bis = _bn_fold(ssum, ssq, tiling["m"], *p["bn_skip"], n_seg, n_seg)

    h_pad = _bn_apply(y_pad, 0, n_seg, sc1, bi1, tiling, relu=True)
    skip_pad = _bn_apply(y_pad, 1, n_seg, scs, bis, tiling, relu=False)

    out_pad, shp = conv_bn(_act_nhwc((h_pad, (B, Ho, Wo, Cout))),
                           p["w2"], *p["bn2"], stride=1, padding=1, relu=True,
                           residual_pad=skip_pad)
    return out_pad, shp


# ----------------------------------------------------------------------------
# Pool + FC + Sigmoid
# ----------------------------------------------------------------------------
def pool_fc_sigmoid(x_nhwc, w_fc, b_fc):
    """x: (B, H, W, C) -> (B, dim_out) through avg-pool + fc + sigmoid."""
    B, H, W, C = x_nhwc.shape
    dim_out = w_fc.shape[0]
    n_pad = _round_up(dim_out, _LANES)
    wt = jnp.pad(jnp.transpose(w_fc),
                 ((0, 0), (0, n_pad - dim_out))).astype(jnp.float32)
    bb = jnp.pad(b_fc, (0, n_pad - dim_out)).reshape(1, n_pad).astype(jnp.float32)
    out = pl.pallas_call(
        _pool_fc_sigmoid_kernel,
        out_shape=jax.ShapeDtypeStruct((B, n_pad), jnp.float32),
        compiler_params=pltpu.CompilerParams(vmem_limit_bytes=_VMEM_LIMIT),
    )(x_nhwc.reshape(B, H * W, C), wt, bb)
    return out[:, :dim_out]


# ----------------------------------------------------------------------------
# Parameter init (deterministic, synthetic) + model assembly
# ----------------------------------------------------------------------------
def init_params(key, dim_in=1, dim_out=1, dim_base=16):
    keys = iter(jax.random.split(key, 64))

    def conv_w(cout, cin, k):
        fan = cin * k * k
        return jax.random.normal(next(keys), (cout, cin, k, k),
                                 jnp.float32) / jnp.sqrt(fan)

    def bn(c):
        g = 1.0 + 0.1 * jax.random.normal(next(keys), (c,), jnp.float32)
        b = 0.1 * jax.random.normal(next(keys), (c,), jnp.float32)
        return (g, b)

    def res_block(cin, cout, down):
        p = {"w1": conv_w(cout, cin, 3), "bn1": bn(cout),
             "w2": conv_w(cout, cout, 3), "bn2": bn(cout)}
        if not (cin == cout and down == 1):
            p["w_skip"] = conv_w(cout, cin, 1)
            p["bn_skip"] = bn(cout)
        return p

    d = dim_base
    return {
        "conv1_w": conv_w(d, dim_in, 7), "conv1_bn": bn(d),
        "enc1_b1": res_block(d, d, 1),
        "enc2_b1": res_block(d, 2 * d, 2),
        "enc2_b2": res_block(2 * d, 2 * d, 1),
        "enc3_b1": res_block(2 * d, 4 * d, 2),
        "enc3_b2": res_block(4 * d, 4 * d, 2),
        "enc4_b1": res_block(4 * d, 8 * d, 2),
        "enc4_b2": res_block(8 * d, 8 * d, 1),
        "fc_w": 0.1 * jax.random.normal(next(keys), (dim_out, 8 * d), jnp.float32),
        "fc_b": jnp.zeros((dim_out,), jnp.float32),
    }


def resnet_forward(params, x_nchw):
    x = jnp.transpose(x_nchw, (0, 2, 3, 1))                     # NCHW -> NHWC
    # encoder_1: conv7x7 s2 p3 -> BN -> ReLU -> Res_block(down=1, identity skip)
    act = conv_bn(x, params["conv1_w"], *params["conv1_bn"],
                  stride=2, padding=3, relu=True)
    act = res_block_identity(act, params["enc1_b1"])
    # encoder_2
    act = res_block_downsample(act, params["enc2_b1"], down=2)
    act = res_block_identity(act, params["enc2_b2"])
    # encoder_3
    act = res_block_downsample(act, params["enc3_b1"], down=2)
    act = res_block_downsample(act, params["enc3_b2"], down=2)
    # encoder_4
    act = res_block_downsample(act, params["enc4_b1"], down=2)
    act = res_block_identity(act, params["enc4_b2"])
    # pool -> reshape -> fc -> sigmoid
    return pool_fc_sigmoid(_act_nhwc(act), params["fc_w"], params["fc_b"])


# ----------------------------------------------------------------------------
if __name__ == "__main__":
    key = jax.random.PRNGKey(0)
    pkey, xkey = jax.random.split(key)

    # Small shapes: B=2, dim_in=1 (NCHW input as in PyTorch), 16x16 spatial,
    # dim_base=16, dim_out=1.
    params = init_params(pkey, dim_in=1, dim_out=1, dim_base=16)
    x = jax.random.normal(xkey, (2, 1, 16, 16), jnp.float32)

    fwd = jax.jit(resnet_forward)
    out = fwd(params, x)
    out = jax.block_until_ready(out)

    assert out.shape == (2, 1), out.shape
    assert bool(jnp.all(jnp.isfinite(out)))
    assert bool(jnp.all((out >= 0.0) & (out <= 1.0)))            # sigmoid range
    print("KERNEL_OK")
</pallas_src>

<mosaic_0001>
module attributes {stable_mosaic.version = 11 : i64} {
  func.func @_matmul_stats_kernel(%arg0: i32, %arg1: memref<128x56xbf16, #tpu.memory_space<vmem>>, %arg2: memref<56x128xbf16, #tpu.memory_space<vmem>>, %arg3: memref<128x128xbf16, #tpu.memory_space<vmem>>, %arg4: memref<8x128xf32, #tpu.memory_space<vmem>>) attributes {dimension_semantics = [#tpu.dimension_semantics<parallel>], iteration_bounds = array<i64: 1>, scalar_prefetch = 0 : i64, scratch_operands = 0 : i64, tpu.core_type = #tpu.core_type<tc>, window_params = [{transform_indices = @transform_0, window_bounds = array<i64: 128, 56>}, {pipeline_mode = #tpu.pipeline_mode<synchronous>, transform_indices = @transform_1, window_bounds = array<i64: 56, 128>}, {transform_indices = @transform_2, window_bounds = array<i64: 128, 128>}, {transform_indices = @transform_3, window_bounds = array<i64: 8, 128>}]} {
    %c0 = arith.constant 0 : index
    %c0_0 = arith.constant 0 : index
    %0 = vector.load %arg1[%c0, %c0_0] : memref<128x56xbf16, #tpu.memory_space<vmem>>, vector<128x56xbf16>
    %c0_1 = arith.constant 0 : index
    %c0_2 = arith.constant 0 : index
    %1 = vector.load %arg2[%c0_1, %c0_2] : memref<56x128xbf16, #tpu.memory_space<vmem>>, vector<56x128xbf16>
    %cst = arith.constant dense<0.000000e+00> : vector<128x128xf32>
    %2 = tpu.matmul %0, %1, %cst {dimension_numbers = #tpu.dot_dimension_numbers<[1], [0], [0], [1], [0, 0, 1, 1], [], []>} : vector<128x56xbf16>, vector<56x128xbf16>, vector<128x128xf32> -> vector<128x128xf32>
    %3 = arith.truncf %2 : vector<128x128xf32> to vector<128x128xbf16>
    %c0_3 = arith.constant 0 : index
    %c0_4 = arith.constant 0 : index
    %4 = vector.load %arg3[%c0_3, %c0_4] : memref<128x128xbf16, #tpu.memory_space<vmem>>, vector<128x128xbf16>
    tpu.vector_store %arg3[%c0_3, %c0_4], %3 {strides = array<i32>} : memref<128x128xbf16, #tpu.memory_space<vmem>>, vector<128x128xbf16>,
    %cst_5 = arith.constant dense<0.000000e+00> : vector<128xf32>
    %5 = vector.multi_reduction <add>, %2, %cst_5 [0] : vector<128x128xf32> to vector<128xf32>
    %6 = vector.shape_cast %5 : vector<128xf32> to vector<1x128xf32>
    %7 = arith.mulf %2, %2 : vector<128x128xf32>
    %cst_6 = arith.constant dense<0.000000e+00> : vector<128xf32>
    %8 = vector.multi_reduction <add>, %7, %cst_6 [0] : vector<128x128xf32> to vector<128xf32>
    %9 = vector.shape_cast %8 : vector<128xf32> to vector<1x128xf32>
    %10 = tpu.iota {dimensions = array<i32: 0>} : vector<8x128xi32>
    %c0_i32 = arith.constant 0 : i32
    %11 = vector.broadcast %c0_i32 : i32 to vector<8x128xi32>
    %12 = arith.cmpi eq, %10, %11 : vector<8x128xi32>
    %c1_i32 = arith.constant 1 : i32
    %13 = vector.broadcast %c1_i32 : i32 to vector<8x128xi32>
    %14 = arith.cmpi eq, %10, %13 : vector<8x128xi32>
    %cst_7 = arith.constant 0.000000e+00 : f32
    %15 = vector.shape_cast %9 : vector<1x128xf32> to vector<1x128xf32>
    %16 = vector.broadcast %15 : vector<1x128xf32> to vector<8x128xf32>
    %17 = vector.broadcast %cst_7 : f32 to vector<8x128xf32>
    %18 = arith.select %14, %16, %17 : vector<8x128xi1>, vector<8x128xf32>
    %19 = vector.shape_cast %6 : vector<1x128xf32> to vector<1x128xf32>
    %20 = vector.broadcast %19 : vector<1x128xf32> to vector<8x128xf32>
    %21 = arith.select %12, %20, %18 : vector<8x128xi1>, vector<8x128xf32>
    %c0_8 = arith.constant 0 : index
    %c0_9 = arith.constant 0 : index
    %22 = vector.load %arg4[%c0_8, %c0_9] : memref<8x128xf32, #tpu.memory_space<vmem>>, vector<8x128xf32>
    tpu.vector_store %arg4[%c0_8, %c0_9], %21 {strides = array<i32>} : memref<8x128xf32, #tpu.memory_space<vmem>>, vector<8x128xf32>,
    return
  }
  func.func @transform_0(%arg0: i32) -> (i32, i32) {
    %c0_i32 = arith.constant 0 : i32
    %c0_i32_0 = arith.constant 0 : i32
    return %arg0, %c0_i32 : i32, i32
  }
  func.func @transform_1(%arg0: i32) -> (i32, i32) {
    %c0_i32 = arith.constant 0 : i32
    %c0_i32_0 = arith.constant 0 : i32
    %c0_i32_1 = arith.constant 0 : i32
    return %c0_i32, %c0_i32_0 : i32, i32
  }
  func.func @transform_2(%arg0: i32) -> (i32, i32) {
    %c0_i32 = arith.constant 0 : i32
    %c0_i32_0 = arith.constant 0 : i32
    return %arg0, %c0_i32 : i32, i32
  }
  func.func @transform_3(%arg0: i32) -> (i32, i32) {
    %c0_i32 = arith.constant 0 : i32
    %c0_i32_0 = arith.constant 0 : i32
    return %arg0, %c0_i32 : i32, i32
  }
}

module attributes {stable_mosaic.version = 11 : i64} {
  func.func @kernel(%arg0: i32, %arg1: memref<128x128xbf16, #tpu.memory_space<vmem>>, %arg2: memref<1x128xf32, #tpu.memory_space<vmem>>, %arg3: memref<1x128xf32, #tpu.memory_space<vmem>>, %arg4: memref<128x128xbf16, #tpu.memory_space<vmem>>) attributes {dimension_semantics = [#tpu.dimension_semantics<parallel>], iteration_bounds = array<i64: 1>, scalar_prefetch = 0 : i64, scratch_operands = 0 : i64, tpu.core_type = #tpu.core_type<tc>, window_params = [{transform_indices = @transform_0, window_bounds = array<i64: 128, 128>}, {pipeline_mode = #tpu.pipeline_mode<synchronous>, transform_indices = @transform_1, window_bounds = array<i64: 1, 128>}, {pipeline_mode = #tpu.pipeline_mode<synchronous>, transform_indices = @transform_2, window_bounds = array<i64: 1, 128>}, {transform_indices = @transform_3, window_bounds = array<i64: 128, 128>}]} {
    %c0 = arith.constant 0 : index
    %c0_0 = arith.constant 0 : index
    %0 = vector.load %arg1[%c0, %c0_0] : memref<128x128xbf16, #tpu.memory_space<vmem>>, vector<128x128xbf16>
    %1 = arith.extf %0 : vector<128x128xbf16> to vector<128x128xf32>
    %c0_1 = arith.constant 0 : index
    %c0_2 = arith.constant 0 : index
    %2 = vector.load %arg2[%c0_1, %c0_2] : memref<1x128xf32, #tpu.memory_space<vmem>>, vector<1x128xf32>
    %3 = vector.broadcast %2 : vector<1x128xf32> to vector<128x128xf32>
    %4 = arith.mulf %1, %3 : vector<128x128xf32>
    %c0_3 = arith.constant 0 : index
    %c0_4 = arith.constant 0 : index
    %5 = vector.load %arg3[%c0_3, %c0_4] : memref<1x128xf32, #tpu.memory_space<vmem>>, vector<1x128xf32>
    %6 = vector.broadcast %5 : vector<1x128xf32> to vector<128x128xf32>
    %7 = arith.addf %4, %6 : vector<128x128xf32>
    %cst = arith.constant 0.000000e+00 : f32
    %8 = vector.broadcast %cst : f32 to vector<128x128xf32>
    %9 = arith.maximumf %7, %8 : vector<128x128xf32>
    %10 = arith.truncf %9 : vector<128x128xf32> to vector<128x128xbf16>
    %c0_5 = arith.constant 0 : index
    %c0_6 = arith.constant 0 : index
    %11 = vector.load %arg4[%c0_5, %c0_6] : memref<128x128xbf16, #tpu.memory_space<vmem>>, vector<128x128xbf16>
    tpu.vector_store %arg4[%c0_5, %c0_6], %10 {strides = array<i32>} : memref<128x128xbf16, #tpu.memory_space<vmem>>, vector<128x128xbf16>,
    return
  }
  func.func @transform_0(%arg0: i32) -> (i32, i32) {
    %c0_i32 = arith.constant 0 : i32
    %c0_i32_0 = arith.constant 0 : i32
    return %arg0, %c0_i32 : i32, i32
  }
  func.func @transform_1(%arg0: i32) -> (i32, i32) {
    %c0_i32 = arith.constant 0 : i32
    %c0_i32_0 = arith.constant 0 : i32
    %c0_i32_1 = arith.constant 0 : i32
    return %c0_i32, %c0_i32_0 : i32, i32
  }
  func.func @transform_2(%arg0: i32) -> (i32, i32) {
    %c0_i32 = arith.constant 0 : i32
    %c0_i32_0 = arith.constant 0 : i32
    %c0_i32_1 = arith.constant 0 : i32
    return %c0_i32, %c0_i32_0 : i32, i32
  }
  func.func @transform_3(%arg0: i32) -> (i32, i32) {
    %c0_i32 = arith.constant 0 : i32
    %c0_i32_0 = arith.constant 0 : i32
    return %arg0, %c0_i32 : i32, i32
  }
}

module attributes {stable_mosaic.version = 11 : i64} {
  func.func @_matmul_stats_kernel(%arg0: i32, %arg1: memref<128x144xbf16, #tpu.memory_space<vmem>>, %arg2: memref<144x128xbf16, #tpu.memory_space<vmem>>, %arg3: memref<128x128xbf16, #tpu.memory_space<vmem>>, %arg4: memref<8x128xf32, #tpu.memory_space<vmem>>) attributes {dimension_semantics = [#tpu.dimension_semantics<parallel>], iteration_bounds = array<i64: 1>, scalar_prefetch = 0 : i64, scratch_operands = 0 : i64, tpu.core_type = #tpu.core_type<tc>, window_params = [{transform_indices = @transform_0, window_bounds = array<i64: 128, 144>}, {pipeline_mode = #tpu.pipeline_mode<synchronous>, transform_indices = @transform_1, window_bounds = array<i64: 144, 128>}, {transform_indices = @transform_2, window_bounds = array<i64: 128, 128>}, {transform_indices = @transform_3, window_bounds = array<i64: 8, 128>}]} {
    %c0 = arith.constant 0 : index
    %c0_0 = arith.constant 0 : index
    %0 = vector.load %arg1[%c0, %c0_0] : memref<128x144xbf16, #tpu.memory_space<vmem>>, vector<128x144xbf16>
    %c0_1 = arith.constant 0 : index
    %c0_2 = arith.constant 0 : index
    %1 = vector.load %arg2[%c0_1, %c0_2] : memref<144x128xbf16, #tpu.memory_space<vmem>>, vector<144x128xbf16>
    %cst = arith.constant dense<0.000000e+00> : vector<128x128xf32>
    %2 = tpu.matmul %0, %1, %cst {dimension_numbers = #tpu.dot_dimension_numbers<[1], [0], [0], [1], [0, 0, 1, 1], [], []>} : vector<128x144xbf16>, vector<144x128xbf16>, vector<128x128xf32> -> vector<128x128xf32>
    %3 = arith.truncf %2 : vector<128x128xf32> to vector<128x128xbf16>
    %c0_3 = arith.constant 0 : index
    %c0_4 = arith.constant 0 : index
    %4 = vector.load %arg3[%c0_3, %c0_4] : memref<128x128xbf16, #tpu.memory_space<vmem>>, vector<128x128xbf16>
    tpu.vector_store %arg3[%c0_3, %c0_4], %3 {strides = array<i32>} : memref<128x128xbf16, #tpu.memory_space<vmem>>, vector<128x128xbf16>,
    %cst_5 = arith.constant dense<0.000000e+00> : vector<128xf32>
    %5 = vector.multi_reduction <add>, %2, %cst_5 [0] : vector<128x128xf32> to vector<128xf32>
    %6 = vector.shape_cast %5 : vector<128xf32> to vector<1x128xf32>
    %7 = arith.mulf %2, %2 : vector<128x128xf32>
    %cst_6 = arith.constant dense<0.000000e+00> : vector<128xf32>
    %8 = vector.multi_reduction <add>, %7, %cst_6 [0] : vector<128x128xf32> to vector<128xf32>
    %9 = vector.shape_cast %8 : vector<128xf32> to vector<1x128xf32>
    %10 = tpu.iota {dimensions = array<i32: 0>} : vector<8x128xi32>
    %c0_i32 = arith.constant 0 : i32
    %11 = vector.broadcast %c0_i32 : i32 to vector<8x128xi32>
    %12 = arith.cmpi eq, %10, %11 : vector<8x128xi32>
    %c1_i32 = arith.constant 1 : i32
    %13 = vector.broadcast %c1_i32 : i32 to vector<8x128xi32>
    %14 = arith.cmpi eq, %10, %13 : vector<8x128xi32>
    %cst_7 = arith.constant 0.000000e+00 : f32
    %15 = vector.shape_cast %9 : vector<1x128xf32> to vector<1x128xf32>
    %16 = vector.broadcast %15 : vector<1x128xf32> to vector<8x128xf32>
    %17 = vector.broadcast %cst_7 : f32 to vector<8x128xf32>
    %18 = arith.select %14, %16, %17 : vector<8x128xi1>, vector<8x128xf32>
    %19 = vector.shape_cast %6 : vector<1x128xf32> to vector<1x128xf32>
    %20 = vector.broadcast %19 : vector<1x128xf32> to vector<8x128xf32>
    %21 = arith.select %12, %20, %18 : vector<8x128xi1>, vector<8x128xf32>
    %c0_8 = arith.constant 0 : index
    %c0_9 = arith.constant 0 : index
    %22 = vector.load %arg4[%c0_8, %c0_9] : memref<8x128xf32, #tpu.memory_space<vmem>>, vector<8x128xf32>
    tpu.vector_store %arg4[%c0_8, %c0_9], %21 {strides = array<i32>} : memref<8x128xf32, #tpu.memory_space<vmem>>, vector<8x128xf32>,
    return
  }
  func.func @transform_0(%arg0: i32) -> (i32, i32) {
    %c0_i32 = arith.constant 0 : i32
    %c0_i32_0 = arith.constant 0 : i32
    return %arg0, %c0_i32 : i32, i32
  }
  func.func @transform_1(%arg0: i32) -> (i32, i32) {
    %c0_i32 = arith.constant 0 : i32
    %c0_i32_0 = arith.constant 0 : i32
    %c0_i32_1 = arith.constant 0 : i32
    return %c0_i32, %c0_i32_0 : i32, i32
  }
  func.func @transform_2(%arg0: i32) -> (i32, i32) {
    %c0_i32 = arith.constant 0 : i32
    %c0_i32_0 = arith.constant 0 : i32
    return %arg0, %c0_i32 : i32, i32
  }
  func.func @transform_3(%arg0: i32) -> (i32, i32) {
    %c0_i32 = arith.constant 0 : i32
    %c0_i32_0 = arith.constant 0 : i32
    return %arg0, %c0_i32 : i32, i32
  }
}

module attributes {stable_mosaic.version = 11 : i64} {
  func.func @kernel(%arg0: i32, %arg1: memref<128x128xbf16, #tpu.memory_space<vmem>>, %arg2: memref<1x128xf32, #tpu.memory_space<vmem>>, %arg3: memref<1x128xf32, #tpu.memory_space<vmem>>, %arg4: memref<128x128xbf16, #tpu.memory_space<vmem>>, %arg5: memref<128x128xbf16, #tpu.memory_space<vmem>>) attributes {dimension_semantics = [#tpu.dimension_semantics<parallel>], iteration_bounds = array<i64: 1>, scalar_prefetch = 0 : i64, scratch_operands = 0 : i64, tpu.core_type = #tpu.core_type<tc>, window_params = [{transform_indices = @transform_0, window_bounds = array<i64: 128, 128>}, {pipeline_mode = #tpu.pipeline_mode<synchronous>, transform_indices = @transform_1, window_bounds = array<i64: 1, 128>}, {pipeline_mode = #tpu.pipeline_mode<synchronous>, transform_indices = @transform_2, window_bounds = array<i64: 1, 128>}, {transform_indices = @transform_3, window_bounds = array<i64: 128, 128>}, {transform_indices = @transform_4, window_bounds = array<i64: 128, 128>}]} {
    %c0 = arith.constant 0 : index
    %c0_0 = arith.constant 0 : index
    %0 = vector.load %arg1[%c0, %c0_0] : memref<128x128xbf16, #tpu.memory_space<vmem>>, vector<128x128xbf16>
    %1 = arith.extf %0 : vector<128x128xbf16> to vector<128x128xf32>
    %c0_1 = arith.constant 0 : index
    %c0_2 = arith.constant 0 : index
    %2 = vector.load %arg2[%c0_1, %c0_2] : memref<1x128xf32, #tpu.memory_space<vmem>>, vector<1x128xf32>
    %3 = vector.broadcast %2 : vector<1x128xf32> to vector<128x128xf32>
    %4 = arith.mulf %1, %3 : vector<128x128xf32>
    %c0_3 = arith.constant 0 : index
    %c0_4 = arith.constant 0 : index
    %5 = vector.load %arg3[%c0_3, %c0_4] : memref<1x128xf32, #tpu.memory_space<vmem>>, vector<1x128xf32>
    %6 = vector.broadcast %5 : vector<1x128xf32> to vector<128x128xf32>
    %7 = arith.addf %4, %6 : vector<128x128xf32>
    %c0_5 = arith.constant 0 : index
    %c0_6 = arith.constant 0 : index
    %8 = vector.load %arg4[%c0_5, %c0_6] : memref<128x128xbf16, #tpu.memory_space<vmem>>, vector<128x128xbf16>
    %9 = arith.extf %8 : vector<128x128xbf16> to vector<128x128xf32>
    %10 = arith.addf %7, %9 : vector<128x128xf32>
    %cst = arith.constant 0.000000e+00 : f32
    %11 = vector.broadcast %cst : f32 to vector<128x128xf32>
    %12 = arith.maximumf %10, %11 : vector<128x128xf32>
    %13 = arith.truncf %12 : vector<128x128xf32> to vector<128x128xbf16>
    %c0_7 = arith.constant 0 : index
    %c0_8 = arith.constant 0 : index
    %14 = vector.load %arg5[%c0_7, %c0_8] : memref<128x128xbf16, #tpu.memory_space<vmem>>, vector<128x128xbf16>
    tpu.vector_store %arg5[%c0_7, %c0_8], %13 {strides = array<i32>} : memref<128x128xbf16, #tpu.memory_space<vmem>>, vector<128x128xbf16>,
    return
  }
  func.func @transform_0(%arg0: i32) -> (i32, i32) {
    %c0_i32 = arith.constant 0 : i32
    %c0_i32_0 = arith.constant 0 : i32
    return %arg0, %c0_i32 : i32, i32
  }
  func.func @transform_1(%arg0: i32) -> (i32, i32) {
    %c0_i32 = arith.constant 0 : i32
    %c0_i32_0 = arith.constant 0 : i32
    %c0_i32_1 = arith.constant 0 : i32
    return %c0_i32, %c0_i32_0 : i32, i32
  }
  func.func @transform_2(%arg0: i32) -> (i32, i32) {
    %c0_i32 = arith.constant 0 : i32
    %c0_i32_0 = arith.constant 0 : i32
    %c0_i32_1 = arith.constant 0 : i32
    return %c0_i32, %c0_i32_0 : i32, i32
  }
  func.func @transform_3(%arg0: i32) -> (i32, i32) {
    %c0_i32 = arith.constant 0 : i32
    %c0_i32_0 = arith.constant 0 : i32
    return %arg0, %c0_i32 : i32, i32
  }
  func.func @transform_4(%arg0: i32) -> (i32, i32) {
    %c0_i32 = arith.constant 0 : i32
    %c0_i32_0 = arith.constant 0 : i32
    return %arg0, %c0_i32 : i32, i32
  }
}

module attributes {stable_mosaic.version = 11 : i64} {
  func.func @kernel(%arg0: i32, %arg1: memref<32x128xbf16, #tpu.memory_space<vmem>>, %arg2: memref<1x128xf32, #tpu.memory_space<vmem>>, %arg3: memref<1x128xf32, #tpu.memory_space<vmem>>, %arg4: memref<32x128xbf16, #tpu.memory_space<vmem>>) attributes {dimension_semantics = [#tpu.dimension_semantics<parallel>], iteration_bounds = array<i64: 1>, scalar_prefetch = 0 : i64, scratch_operands = 0 : i64, tpu.core_type = #tpu.core_type<tc>, window_params = [{transform_indices = @transform_0, window_bounds = array<i64: 32, 128>}, {pipeline_mode = #tpu.pipeline_mode<synchronous>, transform_indices = @transform_1, window_bounds = array<i64: 1, 128>}, {pipeline_mode = #tpu.pipeline_mode<synchronous>, transform_indices = @transform_2, window_bounds = array<i64: 1, 128>}, {transform_indices = @transform_3, window_bounds = array<i64: 32, 128>}]} {
    %c0 = arith.constant 0 : index
    %c0_0 = arith.constant 0 : index
    %0 = vector.load %arg1[%c0, %c0_0] : memref<32x128xbf16, #tpu.memory_space<vmem>>, vector<32x128xbf16>
    %1 = arith.extf %0 : vector<32x128xbf16> to vector<32x128xf32>
    %c0_1 = arith.constant 0 : index
    %c0_2 = arith.constant 0 : index
    %2 = vector.load %arg2[%c0_1, %c0_2] : memref<1x128xf32, #tpu.memory_space<vmem>>, vector<1x128xf32>
    %3 = vector.broadcast %2 : vector<1x128xf32> to vector<32x128xf32>
    %4 = arith.mulf %1, %3 : vector<32x128xf32>
    %c0_3 = arith.constant 0 : index
    %c0_4 = arith.constant 0 : index
    %5 = vector.load %arg3[%c0_3, %c0_4] : memref<1x128xf32, #tpu.memory_space<vmem>>, vector<1x128xf32>
    %6 = vector.broadcast %5 : vector<1x128xf32> to vector<32x128xf32>
    %7 = arith.addf %4, %6 : vector<32x128xf32>
    %8 = arith.truncf %7 : vector<32x128xf32> to vector<32x128xbf16>
    %c0_5 = arith.constant 0 : index
    %c0_6 = arith.constant 0 : index
    %9 = vector.load %arg4[%c0_5, %c0_6] : memref<32x128xbf16, #tpu.memory_space<vmem>>, vector<32x128xbf16>
    tpu.vector_store %arg4[%c0_5, %c0_6], %8 {strides = array<i32>} : memref<32x128xbf16, #tpu.memory_space<vmem>>, vector<32x128xbf16>,
    return
  }
  func.func @transform_0(%arg0: i32) -> (i32, i32) {
    %c1_i32 = arith.constant 1 : i32
    %c0_i32 = arith.constant 0 : i32
    return %arg0, %c1_i32 : i32, i32
  }
  func.func @transform_1(%arg0: i32) -> (i32, i32) {
    %c0_i32 = arith.constant 0 : i32
    %c0_i32_0 = arith.constant 0 : i32
    %c0_i32_1 = arith.constant 0 : i32
    return %c0_i32, %c0_i32_0 : i32, i32
  }
  func.func @transform_2(%arg0: i32) -> (i32, i32) {
    %c0_i32 = arith.constant 0 : i32
    %c0_i32_0 = arith.constant 0 : i32
    %c0_i32_1 = arith.constant 0 : i32
    return %c0_i32, %c0_i32_0 : i32, i32
  }
  func.func @transform_3(%arg0: i32) -> (i32, i32) {
    %c0_i32 = arith.constant 0 : i32
    %c0_i32_0 = arith.constant 0 : i32
    return %arg0, %c0_i32 : i32, i32
  }
}

module attributes {stable_mosaic.version = 11 : i64} {
  func.func @_matmul_stats_kernel(%arg0: i32, %arg1: memref<32x144xbf16, #tpu.memory_space<vmem>>, %arg2: memref<144x256xbf16, #tpu.memory_space<vmem>>, %arg3: memref<32x256xbf16, #tpu.memory_space<vmem>>, %arg4: memref<8x256xf32, #tpu.memory_space<vmem>>) attributes {dimension_semantics = [#tpu.dimension_semantics<parallel>], iteration_bounds = array<i64: 1>, scalar_prefetch = 0 : i64, scratch_operands = 0 : i64, tpu.core_type = #tpu.core_type<tc>, window_params = [{transform_indices = @transform_0, window_bounds = array<i64: 32, 144>}, {pipeline_mode = #tpu.pipeline_mode<synchronous>, transform_indices = @transform_1, window_bounds = array<i64: 144, 256>}, {transform_indices = @transform_2, window_bounds = array<i64: 32, 256>}, {transform_indices = @transform_3, window_bounds = array<i64: 8, 256>}]} {
    %c0 = arith.constant 0 : index
    %c0_0 = arith.constant 0 : index
    %0 = vector.load %arg1[%c0, %c0_0] : memref<32x144xbf16, #tpu.memory_space<vmem>>, vector<32x144xbf16>
    %c0_1 = arith.constant 0 : index
    %c0_2 = arith.constant 0 : index
    %1 = vector.load %arg2[%c0_1, %c0_2] : memref<144x256xbf16, #tpu.memory_space<vmem>>, vector<144x256xbf16>
    %cst = arith.constant dense<0.000000e+00> : vector<32x256xf32>
    %2 = tpu.matmul %0, %1, %cst {dimension_numbers = #tpu.dot_dimension_numbers<[1], [0], [0], [1], [0, 0, 1, 1], [], []>} : vector<32x144xbf16>, vector<144x256xbf16>, vector<32x256xf32> -> vector<32x256xf32>
    %3 = arith.truncf %2 : vector<32x256xf32> to vector<32x256xbf16>
    %c0_3 = arith.constant 0 : index
    %c0_4 = arith.constant 0 : index
    %4 = vector.load %arg3[%c0_3, %c0_4] : memref<32x256xbf16, #tpu.memory_space<vmem>>, vector<32x256xbf16>
    tpu.vector_store %arg3[%c0_3, %c0_4], %3 {strides = array<i32>} : memref<32x256xbf16, #tpu.memory_space<vmem>>, vector<32x256xbf16>,
    %cst_5 = arith.constant dense<0.000000e+00> : vector<256xf32>
    %5 = vector.multi_reduction <add>, %2, %cst_5 [0] : vector<32x256xf32> to vector<256xf32>
    %6 = vector.shape_cast %5 : vector<256xf32> to vector<1x256xf32>
    %7 = arith.mulf %2, %2 : vector<32x256xf32>
    %cst_6 = arith.constant dense<0.000000e+00> : vector<256xf32>
    %8 = vector.multi_reduction <add>, %7, %cst_6 [0] : vector<32x256xf32> to vector<256xf32>
    %9 = vector.shape_cast %8 : vector<256xf32> to vector<1x256xf32>
    %10 = tpu.iota {dimensions = array<i32: 0>} : vector<8x256xi32>
    %c0_i32 = arith.constant 0 : i32
    %11 = vector.broadcast %c0_i32 : i32 to vector<8x256xi32>
    %12 = arith.cmpi eq, %10, %11 : vector<8x256xi32>
    %c1_i32 = arith.constant 1 : i32
    %13 = vector.broadcast %c1_i32 : i32 to vector<8x256xi32>
    %14 = arith.cmpi eq, %10, %13 : vector<8x256xi32>
    %cst_7 = arith.constant 0.000000e+00 : f32
    %15 = vector.shape_cast %9 : vector<1x256xf32> to vector<1x256xf32>
    %16 = vector.broadcast %15 : vector<1x256xf32> to vector<8x256xf32>
    %17 = vector.broadcast %cst_7 : f32 to vector<8x256xf32>
    %18 = arith.select %14, %16, %17 : vector<8x256xi1>, vector<8x256xf32>
    %19 = vector.shape_cast %6 : vector<1x256xf32> to vector<1x256xf32>
    %20 = vector.broadcast %19 : vector<1x256xf32> to vector<8x256xf32>
    %21 = arith.select %12, %20, %18 : vector<8x256xi1>, vector<8x256xf32>
    %c0_8 = arith.constant 0 : index
    %c0_9 = arith.constant 0 : index
    %22 = vector.load %arg4[%c0_8, %c0_9] : memref<8x256xf32, #tpu.memory_space<vmem>>, vector<8x256xf32>
    tpu.vector_store %arg4[%c0_8, %c0_9], %21 {strides = array<i32>} : memref<8x256xf32, #tpu.memory_space<vmem>>, vector<8x256xf32>,
    return
  }
  func.func @transform_0(%arg0: i32) -> (i32, i32) {
    %c0_i32 = arith.constant 0 : i32
    %c0_i32_0 = arith.constant 0 : i32
    return %arg0, %c0_i32 : i32, i32
  }
  func.func @transform_1(%arg0: i32) -> (i32, i32) {
    %c0_i32 = arith.constant 0 : i32
    %c0_i32_0 = arith.constant 0 : i32
    %c0_i32_1 = arith.constant 0 : i32
    return %c0_i32, %c0_i32_0 : i32, i32
  }
  func.func @transform_2(%arg0: i32) -> (i32, i32) {
    %c0_i32 = arith.constant 0 : i32
    %c0_i32_0 = arith.constant 0 : i32
    return %arg0, %c0_i32 : i32, i32
  }
  func.func @transform_3(%arg0: i32) -> (i32, i32) {
    %c0_i32 = arith.constant 0 : i32
    %c0_i32_0 = arith.constant 0 : i32
    return %arg0, %c0_i32 : i32, i32
  }
}

module attributes {stable_mosaic.version = 11 : i64} {
  func.func @kernel(%arg0: i32, %arg1: memref<32x128xbf16, #tpu.memory_space<vmem>>, %arg2: memref<1x128xf32, #tpu.memory_space<vmem>>, %arg3: memref<1x128xf32, #tpu.memory_space<vmem>>, %arg4: memref<32x128xbf16, #tpu.memory_space<vmem>>) attributes {dimension_semantics = [#tpu.dimension_semantics<parallel>], iteration_bounds = array<i64: 1>, scalar_prefetch = 0 : i64, scratch_operands = 0 : i64, tpu.core_type = #tpu.core_type<tc>, window_params = [{transform_indices = @transform_0, window_bounds = array<i64: 32, 128>}, {pipeline_mode = #tpu.pipeline_mode<synchronous>, transform_indices = @transform_1, window_bounds = array<i64: 1, 128>}, {pipeline_mode = #tpu.pipeline_mode<synchronous>, transform_indices = @transform_2, window_bounds = array<i64: 1, 128>}, {transform_indices = @transform_3, window_bounds = array<i64: 32, 128>}]} {
    %c0 = arith.constant 0 : index
    %c0_0 = arith.constant 0 : index
    %0 = vector.load %arg1[%c0, %c0_0] : memref<32x128xbf16, #tpu.memory_space<vmem>>, vector<32x128xbf16>
    %1 = arith.extf %0 : vector<32x128xbf16> to vector<32x128xf32>
    %c0_1 = arith.constant 0 : index
    %c0_2 = arith.constant 0 : index
    %2 = vector.load %arg2[%c0_1, %c0_2] : memref<1x128xf32, #tpu.memory_space<vmem>>, vector<1x128xf32>
    %3 = vector.broadcast %2 : vector<1x128xf32> to vector<32x128xf32>
    %4 = arith.mulf %1, %3 : vector<32x128xf32>
    %c0_3 = arith.constant 0 : index
    %c0_4 = arith.constant 0 : index
    %5 = vector.load %arg3[%c0_3, %c0_4] : memref<1x128xf32, #tpu.memory_space<vmem>>, vector<1x128xf32>
    %6 = vector.broadcast %5 : vector<1x128xf32> to vector<32x128xf32>
    %7 = arith.addf %4, %6 : vector<32x128xf32>
    %cst = arith.constant 0.000000e+00 : f32
    %8 = vector.broadcast %cst : f32 to vector<32x128xf32>
    %9 = arith.maximumf %7, %8 : vector<32x128xf32>
    %10 = arith.truncf %9 : vector<32x128xf32> to vector<32x128xbf16>
    %c0_5 = arith.constant 0 : index
    %c0_6 = arith.constant 0 : index
    %11 = vector.load %arg4[%c0_5, %c0_6] : memref<32x128xbf16, #tpu.memory_space<vmem>>, vector<32x128xbf16>
    tpu.vector_store %arg4[%c0_5, %c0_6], %10 {strides = array<i32>} : memref<32x128xbf16, #tpu.memory_space<vmem>>, vector<32x128xbf16>,
    return
  }
  func.func @transform_0(%arg0: i32) -> (i32, i32) {
    %c0_i32 = arith.constant 0 : i32
    %c0_i32_0 = arith.constant 0 : i32
    return %arg0, %c0_i32 : i32, i32
  }
  func.func @transform_1(%arg0: i32) -> (i32, i32) {
    %c0_i32 = arith.constant 0 : i32
    %c0_i32_0 = arith.constant 0 : i32
    %c0_i32_1 = arith.constant 0 : i32
    return %c0_i32, %c0_i32_0 : i32, i32
  }
  func.func @transform_2(%arg0: i32) -> (i32, i32) {
    %c0_i32 = arith.constant 0 : i32
    %c0_i32_0 = arith.constant 0 : i32
    %c0_i32_1 = arith.constant 0 : i32
    return %c0_i32, %c0_i32_0 : i32, i32
  }
  func.func @transform_3(%arg0: i32) -> (i32, i32) {
    %c0_i32 = arith.constant 0 : i32
    %c0_i32_0 = arith.constant 0 : i32
    return %arg0, %c0_i32 : i32, i32
  }
}

module attributes {stable_mosaic.version = 11 : i64} {
  func.func @kernel(%arg0: i32, %arg1: memref<32x128xbf16, #tpu.memory_space<vmem>>, %arg2: memref<1x128xf32, #tpu.memory_space<vmem>>, %arg3: memref<1x128xf32, #tpu.memory_space<vmem>>, %arg4: memref<32x128xbf16, #tpu.memory_space<vmem>>, %arg5: memref<32x128xbf16, #tpu.memory_space<vmem>>) attributes {dimension_semantics = [#tpu.dimension_semantics<parallel>], iteration_bounds = array<i64: 1>, scalar_prefetch = 0 : i64, scratch_operands = 0 : i64, tpu.core_type = #tpu.core_type<tc>, window_params = [{transform_indices = @transform_0, window_bounds = array<i64: 32, 128>}, {pipeline_mode = #tpu.pipeline_mode<synchronous>, transform_indices = @transform_1, window_bounds = array<i64: 1, 128>}, {pipeline_mode = #tpu.pipeline_mode<synchronous>, transform_indices = @transform_2, window_bounds = array<i64: 1, 128>}, {transform_indices = @transform_3, window_bounds = array<i64: 32, 128>}, {transform_indices = @transform_4, window_bounds = array<i64: 32, 128>}]} {
    %c0 = arith.constant 0 : index
    %c0_0 = arith.constant 0 : index
    %0 = vector.load %arg1[%c0, %c0_0] : memref<32x128xbf16, #tpu.memory_space<vmem>>, vector<32x128xbf16>
    %1 = arith.extf %0 : vector<32x128xbf16> to vector<32x128xf32>
    %c0_1 = arith.constant 0 : index
    %c0_2 = arith.constant 0 : index
    %2 = vector.load %arg2[%c0_1, %c0_2] : memref<1x128xf32, #tpu.memory_space<vmem>>, vector<1x128xf32>
    %3 = vector.broadcast %2 : vector<1x128xf32> to vector<32x128xf32>
    %4 = arith.mulf %1, %3 : vector<32x128xf32>
    %c0_3 = arith.constant 0 : index
    %c0_4 = arith.constant 0 : index
    %5 = vector.load %arg3[%c0_3, %c0_4] : memref<1x128xf32, #tpu.memory_space<vmem>>, vector<1x128xf32>
    %6 = vector.broadcast %5 : vector<1x128xf32> to vector<32x128xf32>
    %7 = arith.addf %4, %6 : vector<32x128xf32>
    %c0_5 = arith.constant 0 : index
    %c0_6 = arith.constant 0 : index
    %8 = vector.load %arg4[%c0_5, %c0_6] : memref<32x128xbf16, #tpu.memory_space<vmem>>, vector<32x128xbf16>
    %9 = arith.extf %8 : vector<32x128xbf16> to vector<32x128xf32>
    %10 = arith.addf %7, %9 : vector<32x128xf32>
    %cst = arith.constant 0.000000e+00 : f32
    %11 = vector.broadcast %cst : f32 to vector<32x128xf32>
    %12 = arith.maximumf %10, %11 : vector<32x128xf32>
    %13 = arith.truncf %12 : vector<32x128xf32> to vector<32x128xbf16>
    %c0_7 = arith.constant 0 : index
    %c0_8 = arith.constant 0 : index
    %14 = vector.load %arg5[%c0_7, %c0_8] : memref<32x128xbf16, #tpu.memory_space<vmem>>, vector<32x128xbf16>
    tpu.vector_store %arg5[%c0_7, %c0_8], %13 {strides = array<i32>} : memref<32x128xbf16, #tpu.memory_space<vmem>>, vector<32x128xbf16>,
    return
  }
  func.func @transform_0(%arg0: i32) -> (i32, i32) {
    %c0_i32 = arith.constant 0 : i32
    %c0_i32_0 = arith.constant 0 : i32
    return %arg0, %c0_i32 : i32, i32
  }
  func.func @transform_1(%arg0: i32) -> (i32, i32) {
    %c0_i32 = arith.constant 0 : i32
    %c0_i32_0 = arith.constant 0 : i32
    %c0_i32_1 = arith.constant 0 : i32
    return %c0_i32, %c0_i32_0 : i32, i32
  }
  func.func @transform_2(%arg0: i32) -> (i32, i32) {
    %c0_i32 = arith.constant 0 : i32
    %c0_i32_0 = arith.constant 0 : i32
    %c0_i32_1 = arith.constant 0 : i32
    return %c0_i32, %c0_i32_0 : i32, i32
  }
  func.func @transform_3(%arg0: i32) -> (i32, i32) {
    %c0_i32 = arith.constant 0 : i32
    %c0_i32_0 = arith.constant 0 : i32
    return %arg0, %c0_i32 : i32, i32
  }
  func.func @transform_4(%arg0: i32) -> (i32, i32) {
    %c0_i32 = arith.constant 0 : i32
    %c0_i32_0 = arith.constant 0 : i32
    return %arg0, %c0_i32 : i32, i32
  }
}

module attributes {stable_mosaic.version = 11 : i64} {
  func.func @_matmul_stats_kernel(%arg0: i32, %arg1: memref<32x288xbf16, #tpu.memory_space<vmem>>, %arg2: memref<288x128xbf16, #tpu.memory_space<vmem>>, %arg3: memref<32x128xbf16, #tpu.memory_space<vmem>>, %arg4: memref<8x128xf32, #tpu.memory_space<vmem>>) attributes {dimension_semantics = [#tpu.dimension_semantics<parallel>], iteration_bounds = array<i64: 1>, scalar_prefetch = 0 : i64, scratch_operands = 0 : i64, tpu.core_type = #tpu.core_type<tc>, window_params = [{transform_indices = @transform_0, window_bounds = array<i64: 32, 288>}, {pipeline_mode = #tpu.pipeline_mode<synchronous>, transform_indices = @transform_1, window_bounds = array<i64: 288, 128>}, {transform_indices = @transform_2, window_bounds = array<i64: 32, 128>}, {transform_indices = @transform_3, window_bounds = array<i64: 8, 128>}]} {
    %c0 = arith.constant 0 : index
    %c0_0 = arith.constant 0 : index
    %0 = vector.load %arg1[%c0, %c0_0] : memref<32x288xbf16, #tpu.memory_space<vmem>>, vector<32x288xbf16>
    %c0_1 = arith.constant 0 : index
    %c0_2 = arith.constant 0 : index
    %1 = vector.load %arg2[%c0_1, %c0_2] : memref<288x128xbf16, #tpu.memory_space<vmem>>, vector<288x128xbf16>
    %cst = arith.constant dense<0.000000e+00> : vector<32x128xf32>
    %2 = tpu.matmul %0, %1, %cst {dimension_numbers = #tpu.dot_dimension_numbers<[1], [0], [0], [1], [0, 0, 1, 1], [], []>} : vector<32x288xbf16>, vector<288x128xbf16>, vector<32x128xf32> -> vector<32x128xf32>
    %3 = arith.truncf %2 : vector<32x128xf32> to vector<32x128xbf16>
    %c0_3 = arith.constant 0 : index
    %c0_4 = arith.constant 0 : index
    %4 = vector.load %arg3[%c0_3, %c0_4] : memref<32x128xbf16, #tpu.memory_space<vmem>>, vector<32x128xbf16>
    tpu.vector_store %arg3[%c0_3, %c0_4], %3 {strides = array<i32>} : memref<32x128xbf16, #tpu.memory_space<vmem>>, vector<32x128xbf16>,
    %cst_5 = arith.constant dense<0.000000e+00> : vector<128xf32>
    %5 = vector.multi_reduction <add>, %2, %cst_5 [0] : vector<32x128xf32> to vector<128xf32>
    %6 = vector.shape_cast %5 : vector<128xf32> to vector<1x128xf32>
    %7 = arith.mulf %2, %2 : vector<32x128xf32>
    %cst_6 = arith.constant dense<0.000000e+00> : vector<128xf32>
    %8 = vector.multi_reduction <add>, %7, %cst_6 [0] : vector<32x128xf32> to vector<128xf32>
    %9 = vector.shape_cast %8 : vector<128xf32> to vector<1x128xf32>
    %10 = tpu.iota {dimensions = array<i32: 0>} : vector<8x128xi32>
    %c0_i32 = arith.constant 0 : i32
    %11 = vector.broadcast %c0_i32 : i32 to vector<8x128xi32>
    %12 = arith.cmpi eq, %10, %11 : vector<8x128xi32>
    %c1_i32 = arith.constant 1 : i32
    %13 = vector.broadcast %c1_i32 : i32 to vector<8x128xi32>
    %14 = arith.cmpi eq, %10, %13 : vector<8x128xi32>
    %cst_7 = arith.constant 0.000000e+00 : f32
    %15 = vector.shape_cast %9 : vector<1x128xf32> to vector<1x128xf32>
    %16 = vector.broadcast %15 : vector<1x128xf32> to vector<8x128xf32>
    %17 = vector.broadcast %cst_7 : f32 to vector<8x128xf32>
    %18 = arith.select %14, %16, %17 : vector<8x128xi1>, vector<8x128xf32>
    %19 = vector.shape_cast %6 : vector<1x128xf32> to vector<1x128xf32>
    %20 = vector.broadcast %19 : vector<1x128xf32> to vector<8x128xf32>
    %21 = arith.select %12, %20, %18 : vector<8x128xi1>, vector<8x128xf32>
    %c0_8 = arith.constant 0 : index
    %c0_9 = arith.constant 0 : index
    %22 = vector.load %arg4[%c0_8, %c0_9] : memref<8x128xf32, #tpu.memory_space<vmem>>, vector<8x128xf32>
    tpu.vector_store %arg4[%c0_8, %c0_9], %21 {strides = array<i32>} : memref<8x128xf32, #tpu.memory_space<vmem>>, vector<8x128xf32>,
    return
  }
  func.func @transform_0(%arg0: i32) -> (i32, i32) {
    %c0_i32 = arith.constant 0 : i32
    %c0_i32_0 = arith.constant 0 : i32
    return %arg0, %c0_i32 : i32, i32
  }
  func.func @transform_1(%arg0: i32) -> (i32, i32) {
    %c0_i32 = arith.constant 0 : i32
    %c0_i32_0 = arith.constant 0 : i32
    %c0_i32_1 = arith.constant 0 : i32
    return %c0_i32, %c0_i32_0 : i32, i32
  }
  func.func @transform_2(%arg0: i32) -> (i32, i32) {
    %c0_i32 = arith.constant 0 : i32
    %c0_i32_0 = arith.constant 0 : i32
    return %arg0, %c0_i32 : i32, i32
  }
  func.func @transform_3(%arg0: i32) -> (i32, i32) {
    %c0_i32 = arith.constant 0 : i32
    %c0_i32_0 = arith.constant 0 : i32
    return %arg0, %c0_i32 : i32, i32
  }
}

module attributes {stable_mosaic.version = 11 : i64} {
  func.func @kernel(%arg0: i32, %arg1: memref<32x128xbf16, #tpu.memory_space<vmem>>, %arg2: memref<1x128xf32, #tpu.memory_space<vmem>>, %arg3: memref<1x128xf32, #tpu.memory_space<vmem>>, %arg4: memref<32x128xbf16, #tpu.memory_space<vmem>>) attributes {dimension_semantics = [#tpu.dimension_semantics<parallel>], iteration_bounds = array<i64: 1>, scalar_prefetch = 0 : i64, scratch_operands = 0 : i64, tpu.core_type = #tpu.core_type<tc>, window_params = [{transform_indices = @transform_0, window_bounds = array<i64: 32, 128>}, {pipeline_mode = #tpu.pipeline_mode<synchronous>, transform_indices = @transform_1, window_bounds = array<i64: 1, 128>}, {pipeline_mode = #tpu.pipeline_mode<synchronous>, transform_indices = @transform_2, window_bounds = array<i64: 1, 128>}, {transform_indices = @transform_3, window_bounds = array<i64: 32, 128>}]} {
    %c0 = arith.constant 0 : index
    %c0_0 = arith.constant 0 : index
    %0 = vector.load %arg1[%c0, %c0_0] : memref<32x128xbf16, #tpu.memory_space<vmem>>, vector<32x128xbf16>
    %1 = arith.extf %0 : vector<32x128xbf16> to vector<32x128xf32>
    %c0_1 = arith.constant 0 : index
    %c0_2 = arith.constant 0 : index
    %2 = vector.load %arg2[%c0_1, %c0_2] : memref<1x128xf32, #tpu.memory_space<vmem>>, vector<1x128xf32>
    %3 = vector.broadcast %2 : vector<1x128xf32> to vector<32x128xf32>
    %4 = arith.mulf %1, %3 : vector<32x128xf32>
    %c0_3 = arith.constant 0 : index
    %c0_4 = arith.constant 0 : index
    %5 = vector.load %arg3[%c0_3, %c0_4] : memref<1x128xf32, #tpu.memory_space<vmem>>, vector<1x128xf32>
    %6 = vector.broadcast %5 : vector<1x128xf32> to vector<32x128xf32>
    %7 = arith.addf %4, %6 : vector<32x128xf32>
    %cst = arith.constant 0.000000e+00 : f32
    %8 = vector.broadcast %cst : f32 to vector<32x128xf32>
    %9 = arith.maximumf %7, %8 : vector<32x128xf32>
    %10 = arith.truncf %9 : vector<32x128xf32> to vector<32x128xbf16>
    %c0_5 = arith.constant 0 : index
    %c0_6 = arith.constant 0 : index
    %11 = vector.load %arg4[%c0_5, %c0_6] : memref<32x128xbf16, #tpu.memory_space<vmem>>, vector<32x128xbf16>
    tpu.vector_store %arg4[%c0_5, %c0_6], %10 {strides = array<i32>} : memref<32x128xbf16, #tpu.memory_space<vmem>>, vector<32x128xbf16>,
    return
  }
  func.func @transform_0(%arg0: i32) -> (i32, i32) {
    %c0_i32 = arith.constant 0 : i32
    %c0_i32_0 = arith.constant 0 : i32
    return %arg0, %c0_i32 : i32, i32
  }
  func.func @transform_1(%arg0: i32) -> (i32, i32) {
    %c0_i32 = arith.constant 0 : i32
    %c0_i32_0 = arith.constant 0 : i32
    %c0_i32_1 = arith.constant 0 : i32
    return %c0_i32, %c0_i32_0 : i32, i32
  }
  func.func @transform_2(%arg0: i32) -> (i32, i32) {
    %c0_i32 = arith.constant 0 : i32
    %c0_i32_0 = arith.constant 0 : i32
    %c0_i32_1 = arith.constant 0 : i32
    return %c0_i32, %c0_i32_0 : i32, i32
  }
  func.func @transform_3(%arg0: i32) -> (i32, i32) {
    %c0_i32 = arith.constant 0 : i32
    %c0_i32_0 = arith.constant 0 : i32
    return %arg0, %c0_i32 : i32, i32
  }
}

module attributes {stable_mosaic.version = 11 : i64} {
  func.func @_matmul_stats_kernel(%arg0: i32, %arg1: memref<8x288xbf16, #tpu.memory_space<vmem>>, %arg2: memref<288x256xbf16, #tpu.memory_space<vmem>>, %arg3: memref<8x256xbf16, #tpu.memory_space<vmem>>, %arg4: memref<8x256xf32, #tpu.memory_space<vmem>>) attributes {dimension_semantics = [#tpu.dimension_semantics<parallel>], iteration_bounds = array<i64: 1>, scalar_prefetch = 0 : i64, scratch_operands = 0 : i64, tpu.core_type = #tpu.core_type<tc>, window_params = [{transform_indices = @transform_0, window_bounds = array<i64: 8, 288>}, {pipeline_mode = #tpu.pipeline_mode<synchronous>, transform_indices = @transform_1, window_bounds = array<i64: 288, 256>}, {transform_indices = @transform_2, window_bounds = array<i64: 8, 256>}, {transform_indices = @transform_3, window_bounds = array<i64: 8, 256>}]} {
    %c0 = arith.constant 0 : index
    %c0_0 = arith.constant 0 : index
    %0 = vector.load %arg1[%c0, %c0_0] : memref<8x288xbf16, #tpu.memory_space<vmem>>, vector<8x288xbf16>
    %c0_1 = arith.constant 0 : index
    %c0_2 = arith.constant 0 : index
    %1 = vector.load %arg2[%c0_1, %c0_2] : memref<288x256xbf16, #tpu.memory_space<vmem>>, vector<288x256xbf16>
    %cst = arith.constant dense<0.000000e+00> : vector<8x256xf32>
    %2 = tpu.matmul %0, %1, %cst {dimension_numbers = #tpu.dot_dimension_numbers<[1], [0], [0], [1], [0, 0, 1, 1], [], []>} : vector<8x288xbf16>, vector<288x256xbf16>, vector<8x256xf32> -> vector<8x256xf32>
    %3 = arith.truncf %2 : vector<8x256xf32> to vector<8x256xbf16>
    %c0_3 = arith.constant 0 : index
    %c0_4 = arith.constant 0 : index
    %4 = vector.load %arg3[%c0_3, %c0_4] : memref<8x256xbf16, #tpu.memory_space<vmem>>, vector<8x256xbf16>
    tpu.vector_store %arg3[%c0_3, %c0_4], %3 {strides = array<i32>} : memref<8x256xbf16, #tpu.memory_space<vmem>>, vector<8x256xbf16>,
    %cst_5 = arith.constant dense<0.000000e+00> : vector<256xf32>
    %5 = vector.multi_reduction <add>, %2, %cst_5 [0] : vector<8x256xf32> to vector<256xf32>
    %6 = vector.shape_cast %5 : vector<256xf32> to vector<1x256xf32>
    %7 = arith.mulf %2, %2 : vector<8x256xf32>
    %cst_6 = arith.constant dense<0.000000e+00> : vector<256xf32>
    %8 = vector.multi_reduction <add>, %7, %cst_6 [0] : vector<8x256xf32> to vector<256xf32>
    %9 = vector.shape_cast %8 : vector<256xf32> to vector<1x256xf32>
    %10 = tpu.iota {dimensions = array<i32: 0>} : vector<8x256xi32>
    %c0_i32 = arith.constant 0 : i32
    %11 = vector.broadcast %c0_i32 : i32 to vector<8x256xi32>
    %12 = arith.cmpi eq, %10, %11 : vector<8x256xi32>
    %c1_i32 = arith.constant 1 : i32
    %13 = vector.broadcast %c1_i32 : i32 to vector<8x256xi32>
    %14 = arith.cmpi eq, %10, %13 : vector<8x256xi32>
    %cst_7 = arith.constant 0.000000e+00 : f32
    %15 = vector.shape_cast %9 : vector<1x256xf32> to vector<1x256xf32>
    %16 = vector.broadcast %15 : vector<1x256xf32> to vector<8x256xf32>
    %17 = vector.broadcast %cst_7 : f32 to vector<8x256xf32>
    %18 = arith.select %14, %16, %17 : vector<8x256xi1>, vector<8x256xf32>
    %19 = vector.shape_cast %6 : vector<1x256xf32> to vector<1x256xf32>
    %20 = vector.broadcast %19 : vector<1x256xf32> to vector<8x256xf32>
    %21 = arith.select %12, %20, %18 : vector<8x256xi1>, vector<8x256xf32>
    %c0_8 = arith.constant 0 : index
    %c0_9 = arith.constant 0 : index
    %22 = vector.load %arg4[%c0_8, %c0_9] : memref<8x256xf32, #tpu.memory_space<vmem>>, vector<8x256xf32>
    tpu.vector_store %arg4[%c0_8, %c0_9], %21 {strides = array<i32>} : memref<8x256xf32, #tpu.memory_space<vmem>>, vector<8x256xf32>,
    return
  }
  func.func @transform_0(%arg0: i32) -> (i32, i32) {
    %c0_i32 = arith.constant 0 : i32
    %c0_i32_0 = arith.constant 0 : i32
    return %arg0, %c0_i32 : i32, i32
  }
  func.func @transform_1(%arg0: i32) -> (i32, i32) {
    %c0_i32 = arith.constant 0 : i32
    %c0_i32_0 = arith.constant 0 : i32
    %c0_i32_1 = arith.constant 0 : i32
    return %c0_i32, %c0_i32_0 : i32, i32
  }
  func.func @transform_2(%arg0: i32) -> (i32, i32) {
    %c0_i32 = arith.constant 0 : i32
    %c0_i32_0 = arith.constant 0 : i32
    return %arg0, %c0_i32 : i32, i32
  }
  func.func @transform_3(%arg0: i32) -> (i32, i32) {
    %c0_i32 = arith.constant 0 : i32
    %c0_i32_0 = arith.constant 0 : i32
    return %arg0, %c0_i32 : i32, i32
  }
}

module attributes {stable_mosaic.version = 11 : i64} {
  func.func @kernel(%arg0: i32, %arg1: memref<8x128xbf16, #tpu.memory_space<vmem>>, %arg2: memref<1x128xf32, #tpu.memory_space<vmem>>, %arg3: memref<1x128xf32, #tpu.memory_space<vmem>>, %arg4: memref<8x128xbf16, #tpu.memory_space<vmem>>) attributes {dimension_semantics = [#tpu.dimension_semantics<parallel>], iteration_bounds = array<i64: 1>, scalar_prefetch = 0 : i64, scratch_operands = 0 : i64, tpu.core_type = #tpu.core_type<tc>, window_params = [{transform_indices = @transform_0, window_bounds = array<i64: 8, 128>}, {pipeline_mode = #tpu.pipeline_mode<synchronous>, transform_indices = @transform_1, window_bounds = array<i64: 1, 128>}, {pipeline_mode = #tpu.pipeline_mode<synchronous>, transform_indices = @transform_2, window_bounds = array<i64: 1, 128>}, {transform_indices = @transform_3, window_bounds = array<i64: 8, 128>}]} {
    %c0 = arith.constant 0 : index
    %c0_0 = arith.constant 0 : index
    %0 = vector.load %arg1[%c0, %c0_0] : memref<8x128xbf16, #tpu.memory_space<vmem>>, vector<8x128xbf16>
    %1 = arith.extf %0 : vector<8x128xbf16> to vector<8x128xf32>
    %c0_1 = arith.constant 0 : index
    %c0_2 = arith.constant 0 : index
    %2 = vector.load %arg2[%c0_1, %c0_2] : memref<1x128xf32, #tpu.memory_space<vmem>>, vector<1x128xf32>
    %3 = vector.broadcast %2 : vector<1x128xf32> to vector<8x128xf32>
    %4 = arith.mulf %1, %3 : vector<8x128xf32>
    %c0_3 = arith.constant 0 : index
    %c0_4 = arith.constant 0 : index
    %5 = vector.load %arg3[%c0_3, %c0_4] : memref<1x128xf32, #tpu.memory_space<vmem>>, vector<1x128xf32>
    %6 = vector.broadcast %5 : vector<1x128xf32> to vector<8x128xf32>
    %7 = arith.addf %4, %6 : vector<8x128xf32>
    %8 = arith.truncf %7 : vector<8x128xf32> to vector<8x128xbf16>
    %c0_5 = arith.constant 0 : index
    %c0_6 = arith.constant 0 : index
    %9 = vector.load %arg4[%c0_5, %c0_6] : memref<8x128xbf16, #tpu.memory_space<vmem>>, vector<8x128xbf16>
    tpu.vector_store %arg4[%c0_5, %c0_6], %8 {strides = array<i32>} : memref<8x128xbf16, #tpu.memory_space<vmem>>, vector<8x128xbf16>,
    return
  }
  func.func @transform_0(%arg0: i32) -> (i32, i32) {
    %c1_i32 = arith.constant 1 : i32
    %c0_i32 = arith.constant 0 : i32
    return %arg0, %c1_i32 : i32, i32
  }
  func.func @transform_1(%arg0: i32) -> (i32, i32) {
    %c0_i32 = arith.constant 0 : i32
    %c0_i32_0 = arith.constant 0 : i32
    %c0_i32_1 = arith.constant 0 : i32
    return %c0_i32, %c0_i32_0 : i32, i32
  }
  func.func @transform_2(%arg0: i32) -> (i32, i32) {
    %c0_i32 = arith.constant 0 : i32
    %c0_i32_0 = arith.constant 0 : i32
    %c0_i32_1 = arith.constant 0 : i32
    return %c0_i32, %c0_i32_0 : i32, i32
  }
  func.func @transform_3(%arg0: i32) -> (i32, i32) {
    %c0_i32 = arith.constant 0 : i32
    %c0_i32_0 = arith.constant 0 : i32
    return %arg0, %c0_i32 : i32, i32
  }
}

module attributes {stable_mosaic.version = 11 : i64} {
  func.func @kernel(%arg0: i32, %arg1: memref<8x128xbf16, #tpu.memory_space<vmem>>, %arg2: memref<1x128xf32, #tpu.memory_space<vmem>>, %arg3: memref<1x128xf32, #tpu.memory_space<vmem>>, %arg4: memref<8x128xbf16, #tpu.memory_space<vmem>>) attributes {dimension_semantics = [#tpu.dimension_semantics<parallel>], iteration_bounds = array<i64: 1>, scalar_prefetch = 0 : i64, scratch_operands = 0 : i64, tpu.core_type = #tpu.core_type<tc>, window_params = [{transform_indices = @transform_0, window_bounds = array<i64: 8, 128>}, {pipeline_mode = #tpu.pipeline_mode<synchronous>, transform_indices = @transform_1, window_bounds = array<i64: 1, 128>}, {pipeline_mode = #tpu.pipeline_mode<synchronous>, transform_indices = @transform_2, window_bounds = array<i64: 1, 128>}, {transform_indices = @transform_3, window_bounds = array<i64: 8, 128>}]} {
    %c0 = arith.constant 0 : index
    %c0_0 = arith.constant 0 : index
    %0 = vector.load %arg1[%c0, %c0_0] : memref<8x128xbf16, #tpu.memory_space<vmem>>, vector<8x128xbf16>
    %1 = arith.extf %0 : vector<8x128xbf16> to vector<8x128xf32>
    %c0_1 = arith.constant 0 : index
    %c0_2 = arith.constant 0 : index
    %2 = vector.load %arg2[%c0_1, %c0_2] : memref<1x128xf32, #tpu.memory_space<vmem>>, vector<1x128xf32>
    %3 = vector.broadcast %2 : vector<1x128xf32> to vector<8x128xf32>
    %4 = arith.mulf %1, %3 : vector<8x128xf32>
    %c0_3 = arith.constant 0 : index
    %c0_4 = arith.constant 0 : index
    %5 = vector.load %arg3[%c0_3, %c0_4] : memref<1x128xf32, #tpu.memory_space<vmem>>, vector<1x128xf32>
    %6 = vector.broadcast %5 : vector<1x128xf32> to vector<8x128xf32>
    %7 = arith.addf %4, %6 : vector<8x128xf32>
    %cst = arith.constant 0.000000e+00 : f32
    %8 = vector.broadcast %cst : f32 to vector<8x128xf32>
    %9 = arith.maximumf %7, %8 : vector<8x128xf32>
    %10 = arith.truncf %9 : vector<8x128xf32> to vector<8x128xbf16>
    %c0_5 = arith.constant 0 : index
    %c0_6 = arith.constant 0 : index
    %11 = vector.load %arg4[%c0_5, %c0_6] : memref<8x128xbf16, #tpu.memory_space<vmem>>, vector<8x128xbf16>
    tpu.vector_store %arg4[%c0_5, %c0_6], %10 {strides = array<i32>} : memref<8x128xbf16, #tpu.memory_space<vmem>>, vector<8x128xbf16>,
    return
  }
  func.func @transform_0(%arg0: i32) -> (i32, i32) {
    %c0_i32 = arith.constant 0 : i32
    %c0_i32_0 = arith.constant 0 : i32
    return %arg0, %c0_i32 : i32, i32
  }
  func.func @transform_1(%arg0: i32) -> (i32, i32) {
    %c0_i32 = arith.constant 0 : i32
    %c0_i32_0 = arith.constant 0 : i32
    %c0_i32_1 = arith.constant 0 : i32
    return %c0_i32, %c0_i32_0 : i32, i32
  }
  func.func @transform_2(%arg0: i32) -> (i32, i32) {
    %c0_i32 = arith.constant 0 : i32
    %c0_i32_0 = arith.constant 0 : i32
    %c0_i32_1 = arith.constant 0 : i32
    return %c0_i32, %c0_i32_0 : i32, i32
  }
  func.func @transform_3(%arg0: i32) -> (i32, i32) {
    %c0_i32 = arith.constant 0 : i32
    %c0_i32_0 = arith.constant 0 : i32
    return %arg0, %c0_i32 : i32, i32
  }
}

module attributes {stable_mosaic.version = 11 : i64} {
  func.func @_matmul_stats_kernel(%arg0: i32, %arg1: memref<8x576xbf16, #tpu.memory_space<vmem>>, %arg2: memref<576x128xbf16, #tpu.memory_space<vmem>>, %arg3: memref<8x128xbf16, #tpu.memory_space<vmem>>, %arg4: memref<8x128xf32, #tpu.memory_space<vmem>>) attributes {dimension_semantics = [#tpu.dimension_semantics<parallel>], iteration_bounds = array<i64: 1>, scalar_prefetch = 0 : i64, scratch_operands = 0 : i64, tpu.core_type = #tpu.core_type<tc>, window_params = [{transform_indices = @transform_0, window_bounds = array<i64: 8, 576>}, {pipeline_mode = #tpu.pipeline_mode<synchronous>, transform_indices = @transform_1, window_bounds = array<i64: 576, 128>}, {transform_indices = @transform_2, window_bounds = array<i64: 8, 128>}, {transform_indices = @transform_3, window_bounds = array<i64: 8, 128>}]} {
    %c0 = arith.constant 0 : index
    %c0_0 = arith.constant 0 : index
    %0 = vector.load %arg1[%c0, %c0_0] : memref<8x576xbf16, #tpu.memory_space<vmem>>, vector<8x576xbf16>
    %c0_1 = arith.constant 0 : index
    %c0_2 = arith.constant 0 : index
    %1 = vector.load %arg2[%c0_1, %c0_2] : memref<576x128xbf16, #tpu.memory_space<vmem>>, vector<576x128xbf16>
    %cst = arith.constant dense<0.000000e+00> : vector<8x128xf32>
    %2 = tpu.matmul %0, %1, %cst {dimension_numbers = #tpu.dot_dimension_numbers<[1], [0], [0], [1], [0, 0, 1, 1], [], []>} : vector<8x576xbf16>, vector<576x128xbf16>, vector<8x128xf32> -> vector<8x128xf32>
    %3 = arith.truncf %2 : vector<8x128xf32> to vector<8x128xbf16>
    %c0_3 = arith.constant 0 : index
    %c0_4 = arith.constant 0 : index
    %4 = vector.load %arg3[%c0_3, %c0_4] : memref<8x128xbf16, #tpu.memory_space<vmem>>, vector<8x128xbf16>
    tpu.vector_store %arg3[%c0_3, %c0_4], %3 {strides = array<i32>} : memref<8x128xbf16, #tpu.memory_space<vmem>>, vector<8x128xbf16>,
    %cst_5 = arith.constant dense<0.000000e+00> : vector<128xf32>
    %5 = vector.multi_reduction <add>, %2, %cst_5 [0] : vector<8x128xf32> to vector<128xf32>
    %6 = vector.shape_cast %5 : vector<128xf32> to vector<1x128xf32>
    %7 = arith.mulf %2, %2 : vector<8x128xf32>
    %cst_6 = arith.constant dense<0.000000e+00> : vector<128xf32>
    %8 = vector.multi_reduction <add>, %7, %cst_6 [0] : vector<8x128xf32> to vector<128xf32>
    %9 = vector.shape_cast %8 : vector<128xf32> to vector<1x128xf32>
    %10 = tpu.iota {dimensions = array<i32: 0>} : vector<8x128xi32>
    %c0_i32 = arith.constant 0 : i32
    %11 = vector.broadcast %c0_i32 : i32 to vector<8x128xi32>
    %12 = arith.cmpi eq, %10, %11 : vector<8x128xi32>
    %c1_i32 = arith.constant 1 : i32
    %13 = vector.broadcast %c1_i32 : i32 to vector<8x128xi32>
    %14 = arith.cmpi eq, %10, %13 : vector<8x128xi32>
    %cst_7 = arith.constant 0.000000e+00 : f32
    %15 = vector.shape_cast %9 : vector<1x128xf32> to vector<1x128xf32>
    %16 = vector.broadcast %15 : vector<1x128xf32> to vector<8x128xf32>
    %17 = vector.broadcast %cst_7 : f32 to vector<8x128xf32>
    %18 = arith.select %14, %16, %17 : vector<8x128xi1>, vector<8x128xf32>
    %19 = vector.shape_cast %6 : vector<1x128xf32> to vector<1x128xf32>
    %20 = vector.broadcast %19 : vector<1x128xf32> to vector<8x128xf32>
    %21 = arith.select %12, %20, %18 : vector<8x128xi1>, vector<8x128xf32>
    %c0_8 = arith.constant 0 : index
    %c0_9 = arith.constant 0 : index
    %22 = vector.load %arg4[%c0_8, %c0_9] : memref<8x128xf32, #tpu.memory_space<vmem>>, vector<8x128xf32>
    tpu.vector_store %arg4[%c0_8, %c0_9], %21 {strides = array<i32>} : memref<8x128xf32, #tpu.memory_space<vmem>>, vector<8x128xf32>,
    return
  }
  func.func @transform_0(%arg0: i32) -> (i32, i32) {
    %c0_i32 = arith.constant 0 : i32
    %c0_i32_0 = arith.constant 0 : i32
    return %arg0, %c0_i32 : i32, i32
  }
  func.func @transform_1(%arg0: i32) -> (i32, i32) {
    %c0_i32 = arith.constant 0 : i32
    %c0_i32_0 = arith.constant 0 : i32
    %c0_i32_1 = arith.constant 0 : i32
    return %c0_i32, %c0_i32_0 : i32, i32
  }
  func.func @transform_2(%arg0: i32) -> (i32, i32) {
    %c0_i32 = arith.constant 0 : i32
    %c0_i32_0 = arith.constant 0 : i32
    return %arg0, %c0_i32 : i32, i32
  }
  func.func @transform_3(%arg0: i32) -> (i32, i32) {
    %c0_i32 = arith.constant 0 : i32
    %c0_i32_0 = arith.constant 0 : i32
    return %arg0, %c0_i32 : i32, i32
  }
}

module attributes {stable_mosaic.version = 11 : i64} {
  func.func @kernel(%arg0: i32, %arg1: memref<8x128xbf16, #tpu.memory_space<vmem>>, %arg2: memref<1x128xf32, #tpu.memory_space<vmem>>, %arg3: memref<1x128xf32, #tpu.memory_space<vmem>>, %arg4: memref<8x128xbf16, #tpu.memory_space<vmem>>, %arg5: memref<8x128xbf16, #tpu.memory_space<vmem>>) attributes {dimension_semantics = [#tpu.dimension_semantics<parallel>], iteration_bounds = array<i64: 1>, scalar_prefetch = 0 : i64, scratch_operands = 0 : i64, tpu.core_type = #tpu.core_type<tc>, window_params = [{transform_indices = @transform_0, window_bounds = array<i64: 8, 128>}, {pipeline_mode = #tpu.pipeline_mode<synchronous>, transform_indices = @transform_1, window_bounds = array<i64: 1, 128>}, {pipeline_mode = #tpu.pipeline_mode<synchronous>, transform_indices = @transform_2, window_bounds = array<i64: 1, 128>}, {transform_indices = @transform_3, window_bounds = array<i64: 8, 128>}, {transform_indices = @transform_4, window_bounds = array<i64: 8, 128>}]} {
    %c0 = arith.constant 0 : index
    %c0_0 = arith.constant 0 : index
    %0 = vector.load %arg1[%c0, %c0_0] : memref<8x128xbf16, #tpu.memory_space<vmem>>, vector<8x128xbf16>
    %1 = arith.extf %0 : vector<8x128xbf16> to vector<8x128xf32>
    %c0_1 = arith.constant 0 : index
    %c0_2 = arith.constant 0 : index
    %2 = vector.load %arg2[%c0_1, %c0_2] : memref<1x128xf32, #tpu.memory_space<vmem>>, vector<1x128xf32>
    %3 = vector.broadcast %2 : vector<1x128xf32> to vector<8x128xf32>
    %4 = arith.mulf %1, %3 : vector<8x128xf32>
    %c0_3 = arith.constant 0 : index
    %c0_4 = arith.constant 0 : index
    %5 = vector.load %arg3[%c0_3, %c0_4] : memref<1x128xf32, #tpu.memory_space<vmem>>, vector<1x128xf32>
    %6 = vector.broadcast %5 : vector<1x128xf32> to vector<8x128xf32>
    %7 = arith.addf %4, %6 : vector<8x128xf32>
    %c0_5 = arith.constant 0 : index
    %c0_6 = arith.constant 0 : index
    %8 = vector.load %arg4[%c0_5, %c0_6] : memref<8x128xbf16, #tpu.memory_space<vmem>>, vector<8x128xbf16>
    %9 = arith.extf %8 : vector<8x128xbf16> to vector<8x128xf32>
    %10 = arith.addf %7, %9 : vector<8x128xf32>
    %cst = arith.constant 0.000000e+00 : f32
    %11 = vector.broadcast %cst : f32 to vector<8x128xf32>
    %12 = arith.maximumf %10, %11 : vector<8x128xf32>
    %13 = arith.truncf %12 : vector<8x128xf32> to vector<8x128xbf16>
    %c0_7 = arith.constant 0 : index
    %c0_8 = arith.constant 0 : index
    %14 = vector.load %arg5[%c0_7, %c0_8] : memref<8x128xbf16, #tpu.memory_space<vmem>>, vector<8x128xbf16>
    tpu.vector_store %arg5[%c0_7, %c0_8], %13 {strides = array<i32>} : memref<8x128xbf16, #tpu.memory_space<vmem>>, vector<8x128xbf16>,
    return
  }
  func.func @transform_0(%arg0: i32) -> (i32, i32) {
    %c0_i32 = arith.constant 0 : i32
    %c0_i32_0 = arith.constant 0 : i32
    return %arg0, %c0_i32 : i32, i32
  }
  func.func @transform_1(%arg0: i32) -> (i32, i32) {
    %c0_i32 = arith.constant 0 : i32
    %c0_i32_0 = arith.constant 0 : i32
    %c0_i32_1 = arith.constant 0 : i32
    return %c0_i32, %c0_i32_0 : i32, i32
  }
  func.func @transform_2(%arg0: i32) -> (i32, i32) {
    %c0_i32 = arith.constant 0 : i32
    %c0_i32_0 = arith.constant 0 : i32
    %c0_i32_1 = arith.constant 0 : i32
    return %c0_i32, %c0_i32_0 : i32, i32
  }
  func.func @transform_3(%arg0: i32) -> (i32, i32) {
    %c0_i32 = arith.constant 0 : i32
    %c0_i32_0 = arith.constant 0 : i32
    return %arg0, %c0_i32 : i32, i32
  }
  func.func @transform_4(%arg0: i32) -> (i32, i32) {
    %c0_i32 = arith.constant 0 : i32
    %c0_i32_0 = arith.constant 0 : i32
    return %arg0, %c0_i32 : i32, i32
  }
}

module attributes {stable_mosaic.version = 11 : i64} {
  func.func @_matmul_stats_kernel(%arg0: i32, %arg1: memref<8x576xbf16, #tpu.memory_space<vmem>>, %arg2: memref<576x256xbf16, #tpu.memory_space<vmem>>, %arg3: memref<8x256xbf16, #tpu.memory_space<vmem>>, %arg4: memref<8x256xf32, #tpu.memory_space<vmem>>) attributes {dimension_semantics = [#tpu.dimension_semantics<parallel>], iteration_bounds = array<i64: 1>, scalar_prefetch = 0 : i64, scratch_operands = 0 : i64, tpu.core_type = #tpu.core_type<tc>, window_params = [{transform_indices = @transform_0, window_bounds = array<i64: 8, 576>}, {pipeline_mode = #tpu.pipeline_mode<synchronous>, transform_indices = @transform_1, window_bounds = array<i64: 576, 256>}, {transform_indices = @transform_2, window_bounds = array<i64: 8, 256>}, {transform_indices = @transform_3, window_bounds = array<i64: 8, 256>}]} {
    %c0 = arith.constant 0 : index
    %c0_0 = arith.constant 0 : index
    %0 = vector.load %arg1[%c0, %c0_0] : memref<8x576xbf16, #tpu.memory_space<vmem>>, vector<8x576xbf16>
    %c0_1 = arith.constant 0 : index
    %c0_2 = arith.constant 0 : index
    %1 = vector.load %arg2[%c0_1, %c0_2] : memref<576x256xbf16, #tpu.memory_space<vmem>>, vector<576x256xbf16>
    %cst = arith.constant dense<0.000000e+00> : vector<8x256xf32>
    %2 = tpu.matmul %0, %1, %cst {dimension_numbers = #tpu.dot_dimension_numbers<[1], [0], [0], [1], [0, 0, 1, 1], [], []>} : vector<8x576xbf16>, vector<576x256xbf16>, vector<8x256xf32> -> vector<8x256xf32>
    %3 = arith.truncf %2 : vector<8x256xf32> to vector<8x256xbf16>
    %c0_3 = arith.constant 0 : index
    %c0_4 = arith.constant 0 : index
    %4 = vector.load %arg3[%c0_3, %c0_4] : memref<8x256xbf16, #tpu.memory_space<vmem>>, vector<8x256xbf16>
    tpu.vector_store %arg3[%c0_3, %c0_4], %3 {strides = array<i32>} : memref<8x256xbf16, #tpu.memory_space<vmem>>, vector<8x256xbf16>,
    %cst_5 = arith.constant dense<0.000000e+00> : vector<256xf32>
    %5 = vector.multi_reduction <add>, %2, %cst_5 [0] : vector<8x256xf32> to vector<256xf32>
    %6 = vector.shape_cast %5 : vector<256xf32> to vector<1x256xf32>
    %7 = arith.mulf %2, %2 : vector<8x256xf32>
    %cst_6 = arith.constant dense<0.000000e+00> : vector<256xf32>
    %8 = vector.multi_reduction <add>, %7, %cst_6 [0] : vector<8x256xf32> to vector<256xf32>
    %9 = vector.shape_cast %8 : vector<256xf32> to vector<1x256xf32>
    %10 = tpu.iota {dimensions = array<i32: 0>} : vector<8x256xi32>
    %c0_i32 = arith.constant 0 : i32
    %11 = vector.broadcast %c0_i32 : i32 to vector<8x256xi32>
    %12 = arith.cmpi eq, %10, %11 : vector<8x256xi32>
    %c1_i32 = arith.constant 1 : i32
    %13 = vector.broadcast %c1_i32 : i32 to vector<8x256xi32>
    %14 = arith.cmpi eq, %10, %13 : vector<8x256xi32>
    %cst_7 = arith.constant 0.000000e+00 : f32
    %15 = vector.shape_cast %9 : vector<1x256xf32> to vector<1x256xf32>
    %16 = vector.broadcast %15 : vector<1x256xf32> to vector<8x256xf32>
    %17 = vector.broadcast %cst_7 : f32 to vector<8x256xf32>
    %18 = arith.select %14, %16, %17 : vector<8x256xi1>, vector<8x256xf32>
    %19 = vector.shape_cast %6 : vector<1x256xf32> to vector<1x256xf32>
    %20 = vector.broadcast %19 : vector<1x256xf32> to vector<8x256xf32>
    %21 = arith.select %12, %20, %18 : vector<8x256xi1>, vector<8x256xf32>
    %c0_8 = arith.constant 0 : index
    %c0_9 = arith.constant 0 : index
    %22 = vector.load %arg4[%c0_8, %c0_9] : memref<8x256xf32, #tpu.memory_space<vmem>>, vector<8x256xf32>
    tpu.vector_store %arg4[%c0_8, %c0_9], %21 {strides = array<i32>} : memref<8x256xf32, #tpu.memory_space<vmem>>, vector<8x256xf32>,
    return
  }
  func.func @transform_0(%arg0: i32) -> (i32, i32) {
    %c0_i32 = arith.constant 0 : i32
    %c0_i32_0 = arith.constant 0 : i32
    return %arg0, %c0_i32 : i32, i32
  }
  func.func @transform_1(%arg0: i32) -> (i32, i32) {
    %c0_i32 = arith.constant 0 : i32
    %c0_i32_0 = arith.constant 0 : i32
    %c0_i32_1 = arith.constant 0 : i32
    return %c0_i32, %c0_i32_0 : i32, i32
  }
  func.func @transform_2(%arg0: i32) -> (i32, i32) {
    %c0_i32 = arith.constant 0 : i32
    %c0_i32_0 = arith.constant 0 : i32
    return %arg0, %c0_i32 : i32, i32
  }
  func.func @transform_3(%arg0: i32) -> (i32, i32) {
    %c0_i32 = arith.constant 0 : i32
    %c0_i32_0 = arith.constant 0 : i32
    return %arg0, %c0_i32 : i32, i32
  }
}

module attributes {stable_mosaic.version = 11 : i64} {
  func.func @_matmul_stats_kernel(%arg0: i32, %arg1: memref<8x1152xbf16, #tpu.memory_space<vmem>>, %arg2: memref<1152x128xbf16, #tpu.memory_space<vmem>>, %arg3: memref<8x128xbf16, #tpu.memory_space<vmem>>, %arg4: memref<8x128xf32, #tpu.memory_space<vmem>>) attributes {dimension_semantics = [#tpu.dimension_semantics<parallel>], iteration_bounds = array<i64: 1>, scalar_prefetch = 0 : i64, scratch_operands = 0 : i64, tpu.core_type = #tpu.core_type<tc>, window_params = [{transform_indices = @transform_0, window_bounds = array<i64: 8, 1152>}, {pipeline_mode = #tpu.pipeline_mode<synchronous>, transform_indices = @transform_1, window_bounds = array<i64: 1152, 128>}, {transform_indices = @transform_2, window_bounds = array<i64: 8, 128>}, {transform_indices = @transform_3, window_bounds = array<i64: 8, 128>}]} {
    %c0 = arith.constant 0 : index
    %c0_0 = arith.constant 0 : index
    %0 = vector.load %arg1[%c0, %c0_0] : memref<8x1152xbf16, #tpu.memory_space<vmem>>, vector<8x1152xbf16>
    %c0_1 = arith.constant 0 : index
    %c0_2 = arith.constant 0 : index
    %1 = vector.load %arg2[%c0_1, %c0_2] : memref<1152x128xbf16, #tpu.memory_space<vmem>>, vector<1152x128xbf16>
    %cst = arith.constant dense<0.000000e+00> : vector<8x128xf32>
    %2 = tpu.matmul %0, %1, %cst {dimension_numbers = #tpu.dot_dimension_numbers<[1], [0], [0], [1], [0, 0, 1, 1], [], []>} : vector<8x1152xbf16>, vector<1152x128xbf16>, vector<8x128xf32> -> vector<8x128xf32>
    %3 = arith.truncf %2 : vector<8x128xf32> to vector<8x128xbf16>
    %c0_3 = arith.constant 0 : index
    %c0_4 = arith.constant 0 : index
    %4 = vector.load %arg3[%c0_3, %c0_4] : memref<8x128xbf16, #tpu.memory_space<vmem>>, vector<8x128xbf16>
    tpu.vector_store %arg3[%c0_3, %c0_4], %3 {strides = array<i32>} : memref<8x128xbf16, #tpu.memory_space<vmem>>, vector<8x128xbf16>,
    %cst_5 = arith.constant dense<0.000000e+00> : vector<128xf32>
    %5 = vector.multi_reduction <add>, %2, %cst_5 [0] : vector<8x128xf32> to vector<128xf32>
    %6 = vector.shape_cast %5 : vector<128xf32> to vector<1x128xf32>
    %7 = arith.mulf %2, %2 : vector<8x128xf32>
    %cst_6 = arith.constant dense<0.000000e+00> : vector<128xf32>
    %8 = vector.multi_reduction <add>, %7, %cst_6 [0] : vector<8x128xf32> to vector<128xf32>
    %9 = vector.shape_cast %8 : vector<128xf32> to vector<1x128xf32>
    %10 = tpu.iota {dimensions = array<i32: 0>} : vector<8x128xi32>
    %c0_i32 = arith.constant 0 : i32
    %11 = vector.broadcast %c0_i32 : i32 to vector<8x128xi32>
    %12 = arith.cmpi eq, %10, %11 : vector<8x128xi32>
    %c1_i32 = arith.constant 1 : i32
    %13 = vector.broadcast %c1_i32 : i32 to vector<8x128xi32>
    %14 = arith.cmpi eq, %10, %13 : vector<8x128xi32>
    %cst_7 = arith.constant 0.000000e+00 : f32
    %15 = vector.shape_cast %9 : vector<1x128xf32> to vector<1x128xf32>
    %16 = vector.broadcast %15 : vector<1x128xf32> to vector<8x128xf32>
    %17 = vector.broadcast %cst_7 : f32 to vector<8x128xf32>
    %18 = arith.select %14, %16, %17 : vector<8x128xi1>, vector<8x128xf32>
    %19 = vector.shape_cast %6 : vector<1x128xf32> to vector<1x128xf32>
    %20 = vector.broadcast %19 : vector<1x128xf32> to vector<8x128xf32>
    %21 = arith.select %12, %20, %18 : vector<8x128xi1>, vector<8x128xf32>
    %c0_8 = arith.constant 0 : index
    %c0_9 = arith.constant 0 : index
    %22 = vector.load %arg4[%c0_8, %c0_9] : memref<8x128xf32, #tpu.memory_space<vmem>>, vector<8x128xf32>
    tpu.vector_store %arg4[%c0_8, %c0_9], %21 {strides = array<i32>} : memref<8x128xf32, #tpu.memory_space<vmem>>, vector<8x128xf32>,
    return
  }
  func.func @transform_0(%arg0: i32) -> (i32, i32) {
    %c0_i32 = arith.constant 0 : i32
    %c0_i32_0 = arith.constant 0 : i32
    return %arg0, %c0_i32 : i32, i32
  }
  func.func @transform_1(%arg0: i32) -> (i32, i32) {
    %c0_i32 = arith.constant 0 : i32
    %c0_i32_0 = arith.constant 0 : i32
    %c0_i32_1 = arith.constant 0 : i32
    return %c0_i32, %c0_i32_0 : i32, i32
  }
  func.func @transform_2(%arg0: i32) -> (i32, i32) {
    %c0_i32 = arith.constant 0 : i32
    %c0_i32_0 = arith.constant 0 : i32
    return %arg0, %c0_i32 : i32, i32
  }
  func.func @transform_3(%arg0: i32) -> (i32, i32) {
    %c0_i32 = arith.constant 0 : i32
    %c0_i32_0 = arith.constant 0 : i32
    return %arg0, %c0_i32 : i32, i32
  }
}

module attributes {stable_mosaic.version = 11 : i64} {
  func.func @kernel(%arg0: i32, %arg1: memref<8x128xbf16, #tpu.memory_space<vmem>>, %arg2: memref<1x128xf32, #tpu.memory_space<vmem>>, %arg3: memref<1x128xf32, #tpu.memory_space<vmem>>, %arg4: memref<8x128xbf16, #tpu.memory_space<vmem>>) attributes {dimension_semantics = [#tpu.dimension_semantics<parallel>], iteration_bounds = array<i64: 1>, scalar_prefetch = 0 : i64, scratch_operands = 0 : i64, tpu.core_type = #tpu.core_type<tc>, window_params = [{transform_indices = @transform_0, window_bounds = array<i64: 8, 128>}, {pipeline_mode = #tpu.pipeline_mode<synchronous>, transform_indices = @transform_1, window_bounds = array<i64: 1, 128>}, {pipeline_mode = #tpu.pipeline_mode<synchronous>, transform_indices = @transform_2, window_bounds = array<i64: 1, 128>}, {transform_indices = @transform_3, window_bounds = array<i64: 8, 128>}]} {
    %c0 = arith.constant 0 : index
    %c0_0 = arith.constant 0 : index
    %0 = vector.load %arg1[%c0, %c0_0] : memref<8x128xbf16, #tpu.memory_space<vmem>>, vector<8x128xbf16>
    %1 = arith.extf %0 : vector<8x128xbf16> to vector<8x128xf32>
    %c0_1 = arith.constant 0 : index
    %c0_2 = arith.constant 0 : index
    %2 = vector.load %arg2[%c0_1, %c0_2] : memref<1x128xf32, #tpu.memory_space<vmem>>, vector<1x128xf32>
    %3 = vector.broadcast %2 : vector<1x128xf32> to vector<8x128xf32>
    %4 = arith.mulf %1, %3 : vector<8x128xf32>
    %c0_3 = arith.constant 0 : index
    %c0_4 = arith.constant 0 : index
    %5 = vector.load %arg3[%c0_3, %c0_4] : memref<1x128xf32, #tpu.memory_space<vmem>>, vector<1x128xf32>
    %6 = vector.broadcast %5 : vector<1x128xf32> to vector<8x128xf32>
    %7 = arith.addf %4, %6 : vector<8x128xf32>
    %cst = arith.constant 0.000000e+00 : f32
    %8 = vector.broadcast %cst : f32 to vector<8x128xf32>
    %9 = arith.maximumf %7, %8 : vector<8x128xf32>
    %10 = arith.truncf %9 : vector<8x128xf32> to vector<8x128xbf16>
    %c0_5 = arith.constant 0 : index
    %c0_6 = arith.constant 0 : index
    %11 = vector.load %arg4[%c0_5, %c0_6] : memref<8x128xbf16, #tpu.memory_space<vmem>>, vector<8x128xbf16>
    tpu.vector_store %arg4[%c0_5, %c0_6], %10 {strides = array<i32>} : memref<8x128xbf16, #tpu.memory_space<vmem>>, vector<8x128xbf16>,
    return
  }
  func.func @transform_0(%arg0: i32) -> (i32, i32) {
    %c0_i32 = arith.constant 0 : i32
    %c0_i32_0 = arith.constant 0 : i32
    return %arg0, %c0_i32 : i32, i32
  }
  func.func @transform_1(%arg0: i32) -> (i32, i32) {
    %c0_i32 = arith.constant 0 : i32
    %c0_i32_0 = arith.constant 0 : i32
    %c0_i32_1 = arith.constant 0 : i32
    return %c0_i32, %c0_i32_0 : i32, i32
  }
  func.func @transform_2(%arg0: i32) -> (i32, i32) {
    %c0_i32 = arith.constant 0 : i32
    %c0_i32_0 = arith.constant 0 : i32
    %c0_i32_1 = arith.constant 0 : i32
    return %c0_i32, %c0_i32_0 : i32, i32
  }
  func.func @transform_3(%arg0: i32) -> (i32, i32) {
    %c0_i32 = arith.constant 0 : i32
    %c0_i32_0 = arith.constant 0 : i32
    return %arg0, %c0_i32 : i32, i32
  }
}

module attributes {stable_mosaic.version = 11 : i64} {
  func.func @_pool_fc_sigmoid_kernel(%arg0: memref<2x1x128xbf16, #tpu.memory_space<vmem>>, %arg1: memref<128x128xf32, #tpu.memory_space<vmem>>, %arg2: memref<1x128xf32, #tpu.memory_space<vmem>>, %arg3: memref<2x128xf32, #tpu.memory_space<vmem>>) attributes {dimension_semantics = [], scalar_prefetch = 0 : i64, scratch_operands = 0 : i64, tpu.core_type = #tpu.core_type<tc>} {
    %c0 = arith.constant 0 : index
    %c0_0 = arith.constant 0 : index
    %c0_1 = arith.constant 0 : index
    %0 = vector.load %arg0[%c0, %c0_0, %c0_1] : memref<2x1x128xbf16, #tpu.memory_space<vmem>>, vector<2x1x128xbf16>
    %1 = arith.extf %0 : vector<2x1x128xbf16> to vector<2x1x128xf32>
    %cst = arith.constant dense<0.000000e+00> : vector<2x128xf32>
    %2 = vector.multi_reduction <add>, %1, %cst [1] : vector<2x1x128xf32> to vector<2x128xf32>
    %cst_2 = arith.constant 1.000000e+00 : f32
    %3 = vector.broadcast %cst_2 : f32 to vector<2x128xf32>
    %4 = arith.divf %2, %3 : vector<2x128xf32>
    %c0_3 = arith.constant 0 : index
    %c0_4 = arith.constant 0 : index
    %5 = vector.load %arg1[%c0_3, %c0_4] : memref<128x128xf32, #tpu.memory_space<vmem>>, vector<128x128xf32>
    %cst_5 = arith.constant dense<0.000000e+00> : vector<2x128xf32>
    %6 = tpu.matmul %4, %5, %cst_5 {dimension_numbers = #tpu.dot_dimension_numbers<[1], [0], [0], [1], [0, 0, 1, 1], [], []>} : vector<2x128xf32>, vector<128x128xf32>, vector<2x128xf32> -> vector<2x128xf32>
    %c0_6 = arith.constant 0 : index
    %c0_7 = arith.constant 0 : index
    %7 = vector.load %arg2[%c0_6, %c0_7] : memref<1x128xf32, #tpu.memory_space<vmem>>, vector<1x128xf32>
    %8 = vector.broadcast %7 : vector<1x128xf32> to vector<2x128xf32>
    %9 = arith.addf %6, %8 : vector<2x128xf32>
    %cst_8 = arith.constant 0.000000e+00 : f32
    %10 = vector.broadcast %cst_8 : f32 to vector<2x128xf32>
    %11 = arith.subf %10, %9 : vector<2x128xf32>
    %12 = math.exp %11 : vector<2x128xf32>
    %cst_9 = arith.constant 1.000000e+00 : f32
    %13 = vector.broadcast %cst_9 : f32 to vector<2x128xf32>
    %14 = arith.addf %13, %12 : vector<2x128xf32>
    %cst_10 = arith.constant 1.000000e+00 : f32
    %15 = vector.broadcast %cst_10 : f32 to vector<2x128xf32>
    %16 = arith.divf %15, %14 : vector<2x128xf32>
    %c0_11 = arith.constant 0 : index
    %c0_12 = arith.constant 0 : index
    %17 = vector.load %arg3[%c0_11, %c0_12] : memref<2x128xf32, #tpu.memory_space<vmem>>, vector<2x128xf32>
    tpu.vector_store %arg3[%c0_11, %c0_12], %16 {strides = array<i32>} : memref<2x128xf32, #tpu.memory_space<vmem>>, vector<2x128xf32>,
    return
  }
}

</mosaic_0001>

<bundles_post_ra>
// kernel: resnet_forward.36
= control target key start
LH: loop header
LB: loop body
LE: loop exit
PB: predicated region body
PF: predicated region fallthrough
CT: control target
= control target key end

     0   :  { %s422_s0 = inlined_call_operand.vmem [shape: bf16[128,128], index: 0, kind: input, shape index: {}]   ;;  %s423_s1 = inlined_call_operand.vmem [shape: f32[1,128], index: 1, kind: input, shape index: {}]   ;;  %s424_s2 = inlined_call_operand.vmem [shape: f32[1,128], index: 2, kind: input, shape index: {}]   ;;  %s425_s3 = inlined_call_operand.vmem [shape: bf16[128,128], index: 3, kind: output, shape index: {}]  }
   0x1   :  { %v227_v0 = vld [vmem:[%s422_s0] sm:$0xff]   ;;  %v298_v4 = vld [vmem:[%s422_s0 + $0x8] sm:$0xff]   ;;  %v299_v5 = vld [vmem:[%s422_s0 + $0x10] sm:$0xff]  }
   0x2   :  { %v338_v1 = vld [vmem:[%s423_s1] ss:$0 sm:$0xff]  ;;  %v228_v2 = vunpack.c.l.bf16 %v227_v0  ;;  %v229_v3 = vunpack.c.h.bf16 %v227_v0  ;;  %v300_v6 = vld [vmem:[%s422_s0 + $0x18] sm:$0xff]   ;;  %v232_v8 = vunpack.c.l.bf16 %v298_v4  ;;  %v233_v9 = vunpack.c.h.bf16 %v298_v4  ;;  %v302_v33 = vld [vmem:[%s422_s0 + $0x28] sm:$0xff]  }
   0x3   :  { %v352_v7 = vld [vmem:[%s424_s2] ss:$0 sm:$0xff]  ;;  %v236_v10 = vunpack.c.l.bf16 %v299_v5  ;;  %v237_v11 = vunpack.c.h.bf16 %v299_v5  ;;  %v240_v14 = vunpack.c.l.bf16 %v300_v6  ;;  %v241_v15 = vunpack.c.h.bf16 %v300_v6  ;;  %v303_v38 = vld [vmem:[%s422_s0 + $0x30] sm:$0xff]   ;;  %v304_v43 = vld [vmem:[%s422_s0 + $0x38] sm:$0xff]  }
   0x4   :  { %v53_v12 = vmul.f32 %v228_v2, %v338_v1  ;;  %v54_v13 = vmul.f32 %v229_v3, %v338_v1  ;;  %v55_v16 = vmul.f32 %v232_v8, %v338_v1  ;;  %v56_v17 = vmul.f32 %v233_v9, %v338_v1  ;;  %v301_v28 = vld [vmem:[%s422_s0 + $0x20] sm:$0xff]  }
   0x5   :  { %v57_v18 = vmul.f32 %v236_v10, %v338_v1  ;;  %v58_v19 = vmul.f32 %v237_v11, %v338_v1  ;;  %v59_v22 = vmul.f32 %v240_v14, %v338_v1  ;;  %v60_v23 = vmul.f32 %v241_v15, %v338_v1 }
   0x6   :  { %v76_v20 = vadd.f32 %v352_v7, %v53_v12  ;;  %v77_v21 = vadd.f32 %v352_v7, %v54_v13  ;;  %v78_v24 = vadd.f32 %v352_v7, %v55_v16  ;;  %v79_v25 = vadd.f32 %v352_v7, %v56_v17 }
   0x7   :  { %v80_v26 = vadd.f32 %v352_v7, %v57_v18  ;;  %v81_v27 = vadd.f32 %v352_v7, %v58_v19  ;;  %v82_v31 = vadd.f32 %v352_v7, %v59_v22  ;;  %v83_v32 = vadd.f32 %v352_v7, %v60_v23 }
   0x8   :  { %v92_v29 = vmax.f32 %v76_v20, 0.0  ;;  %v93_v30 = vmax.f32 %v77_v21, 0.0  ;;  %v94_v34 = vmax.f32 %v78_v24, 0.0  ;;  %v95_v35 = vmax.f32 %v79_v25, 0.0 }
   0x9   :  { %v96_v36 = vmax.f32 %v80_v26, 0.0  ;;  %v97_v37 = vmax.f32 %v81_v27, 0.0  ;;  %v98_v40 = vmax.f32 %v82_v31, 0.0  ;;  %v99_v41 = vmax.f32 %v83_v32, 0.0 }
   0xa   :  { %v261_v39 = vpack.c.bf16 %v93_v30, %v92_v29  ;;  %v244_v42 = vunpack.c.l.bf16 %v301_v28  ;;  %v266_v44 = vpack.c.bf16 %v95_v35, %v94_v34  ;;  %v245_v46 = vunpack.c.h.bf16 %v301_v28 }
   0xb   :  { %v271_v45 = vpack.c.bf16 %v97_v37, %v96_v36  ;;  %v248_v47 = vunpack.c.l.bf16 %v302_v33  ;;  %v276_v48 = vpack.c.bf16 %v99_v41, %v98_v40  ;;  %v249_v50 = vunpack.c.h.bf16 %v302_v33 }
   0xc   :  { %262 = vst [vmem:[%s425_s3] sm:$0xff] %v261_v39   ;;  %v61_v49 = vmul.f32 %v244_v42, %v338_v1  ;;  %v252_v51 = vunpack.c.l.bf16 %v303_v38  ;;  %305 = vst [vmem:[%s425_s3 + $0x8] sm:$0xff] %v266_v44   ;;  %v62_v52 = vmul.f32 %v245_v46, %v338_v1  ;;  %v253_v54 = vunpack.c.h.bf16 %v303_v38 }
   0xd   :  { %306 = vst [vmem:[%s425_s3 + $0x10] sm:$0xff] %v271_v45   ;;  %v63_v53 = vmul.f32 %v248_v47, %v338_v1  ;;  %v256_v55 = vunpack.c.l.bf16 %v304_v43  ;;  %307 = vst [vmem:[%s425_s3 + $0x18] sm:$0xff] %v276_v48   ;;  %v64_v57 = vmul.f32 %v249_v50, %v338_v1  ;;  %v257_v59 = vunpack.c.h.bf16 %v304_v43 }
   0xe   :  { %v84_v56 = vadd.f32 %v352_v7, %v61_v49  ;;  %v65_v58 = vmul.f32 %v252_v51, %v338_v1  ;;  %v85_v60 = vadd.f32 %v352_v7, %v62_v52  ;;  %v66_v62 = vmul.f32 %v253_v54, %v338_v1 }
   0xf   :  { %v86_v61 = vadd.f32 %v352_v7, %v63_v53  ;;  %v67_v63 = vmul.f32 %v256_v55, %v338_v1  ;;  %v87_v2 = vadd.f32 %v352_v7, %v64_v57  ;;  %v68_v4 = vmul.f32 %v257_v59, %v338_v1 }
  0x10   :  { %v100_v0 = vmax.f32 %v84_v56, 0.0  ;;  %v88_v3 = vadd.f32 %v352_v7, %v65_v58  ;;  %v101_v5 = vmax.f32 %v85_v60, 0.0  ;;  %v89_v8 = vadd.f32 %v352_v7, %v66_v62 }
  0x11   :  { %v102_v6 = vmax.f32 %v86_v61, 0.0  ;;  %v90_v9 = vadd.f32 %v352_v7, %v67_v63  ;;  %v103_v10 = vmax.f32 %v87_v2, 0.0  ;;  %v91_v12 = vadd.f32 %v352_v7, %v68_v4 }
  0x12   :  { %v104_v11 = vmax.f32 %v88_v3, 0.0  ;;  %v281_v13 = vpack.c.bf16 %v101_v5, %v100_v0  ;;  %v105_v14 = vmax.f32 %v89_v8, 0.0 }
  0x13   :  { %v106_v15 = vmax.f32 %v90_v9, 0.0  ;;  %v286_v16 = vpack.c.bf16 %v103_v10, %v102_v6  ;;  %v107_v17 = vmax.f32 %v91_v12, 0.0 }
  0x14   :  { %308 = vst [vmem:[%s425_s3 + $0x20] sm:$0xff] %v281_v13   ;;  %v291_v1 = vpack.c.bf16 %v105_v14, %v104_v11 }
  0x15   :  { %309 = vst [vmem:[%s425_s3 + $0x28] sm:$0xff] %v286_v16   ;;  %v296_v18 = vpack.c.bf16 %v107_v17, %v106_v15 }
  0x16   :  { %310 = vst [vmem:[%s425_s3 + $0x30] sm:$0xff] %v291_v1  }
  0x17   :  { %311 = vst [vmem:[%s425_s3 + $0x38] sm:$0xff] %v296_v18  }

// kernel: resnet_forward.35
= control target key start
LH: loop header
LB: loop body
LE: loop exit
PB: predicated region body
PF: predicated region fallthrough
CT: control target
= control target key end

     0   :  { %vm123_vm0 = vcmask 1043456   ;;  %vm98_vm1 = vcmask 457728   ;;  %s625_s1 = inlined_call_operand.vmem [shape: bf16[56,128], index: 1, kind: input, shape index: {}]   ;;  %s626_s0 = inlined_call_operand.vmem [shape: bf16[128,56], index: 0, kind: input, shape index: {}]   ;;  %s627_s2 = inlined_call_operand.vmem [shape: bf16[128,128], index: 2, kind: output, shape index: {0}]   ;;  %s628_s3 = inlined_call_operand.vmem [shape: f32[8,128], index: 3, kind: output, shape index: {1}]  }
   0x1   :  { %v522_v0 = vld [vmem:[%s625_s1 + $0x18] ss:$0 sps:$4 sm:$0xff]   ;;  %v523_v1 = vld [vmem:[%s625_s1 + $0x10] sm:$0xff]   ;;  %v524_v3 = vld [vmem:[%s625_s1 + $0x8] sm:$0xff]  }
   0x2   :  { %520 = vmatprep.subr.msk.bf16.mxu0 %vm123_vm0, %v522_v0  ;;  %v125_v2 = vsel %vm123_vm0, %v522_v0, 0  ;;  %521 = vmatprep.subr.msk.bf16.mxu1 %vm123_vm0, %v522_v0  ;;  %v526_v4 = vld [vmem:[%s626_s0] sm:$0xff]   ;;  %v527_v7 = vld [vmem:[%s626_s0 + $0x8] sm:$0xff]   ;;  %v528_v9 = vld [vmem:[%s626_s0 + $0x10] sm:$0xff]  }
   0x3   :  { %489 = vmatpush3.bf16.msra.mxu0 %v125_v2  ;;  %516 = vmatpush3.bf16.msra.mxu1 %v125_v2  ;;  %v525_v5 = vld [vmem:[%s625_s1] sm:$0xff]   ;;  %v531_v8 = vld [vmem:[%s626_s0 + $0x28] sm:$0xff]   ;;  %v532_v10 = vld [vmem:[%s626_s0 + $0x30] sm:$0xff]  }
   0x4   :  { %490 = vmatprep.subr.bf16.mxu0 %v523_v1  ;;  %513 = vmatprep.subr.bf16.mxu1 %v523_v1  ;;  %v530_v6 = vld [vmem:[%s626_s0 + $0x20] sm:$0xff]   ;;  %v529_v11 = vld [vmem:[%s626_s0 + $0x18] sm:$0xff]  }
   0x5   :  { %496 = vmatprep.mubr.msk.bf16.mxu0 %vm98_vm1, %v526_v4  ;;  %504 = vmatprep.mubr.msk.bf16.mxu1 %vm98_vm1, %v530_v6  ;;  %v533_v12 = vld [vmem:[%s626_s0 + $0x38] sm:$0xff]  }
   0x7   :  { %491 = vmatpush3.bf16.msra.mxu0 %v523_v1  ;;  %517 = vmatpush3.bf16.msra.mxu1 %v523_v1 }
   0x8   :  { %492 = vmatprep.subr.bf16.mxu0 %v524_v3  ;;  %514 = vmatprep.subr.bf16.mxu1 %v524_v3 }
   0xb   :  { %493 = vmatpush3.bf16.msra.mxu0 %v524_v3  ;;  %518 = vmatpush3.bf16.msra.mxu1 %v524_v3 }
   0xc   :  { %494 = vmatprep.subr.bf16.mxu0 %v525_v5  ;;  %515 = vmatprep.subr.bf16.mxu1 %v525_v5 }
   0xf   :  { %495 = vmatpush3.bf16.msra.mxu0 %v525_v5  ;;  %519 = vmatpush3.bf16.msra.mxu1 %v525_v5 }
  0x12   :  { %497 = vmatmul.mubr.msk.bf16.vlgmr.msra.gmra.mxu0 %vm98_vm1, %v527_v7  ;;  %505 = vmatmul.mubr.msk.bf16.vlgmr.msra.gmra.mxu1 %vm98_vm1, %v531_v8 }
  0x13   :  { %500 = vmatprep.mubr.msk.bf16.mxu0 %vm98_vm1, %v528_v9  ;;  %508 = vmatprep.mubr.msk.bf16.mxu1 %vm98_vm1, %v532_v10 }
  0x1a   :  { %501 = vmatmul.mubr.msk.bf16.gmra.mxu0 %vm98_vm1, %v529_v11  ;;  %509 = vmatmul.mubr.msk.bf16.gmra.mxu1 %vm98_vm1, %v533_v12 }
  0xd2   :  { %v498_v13 = vpop.f32.mrf.mxu0  ;;  %v506_v14 = vpop.f32.mrf.mxu1 }
  0xd3   :  { %v327_v30 = vmul.f32 %v498_v13, %v498_v13  ;;  %v335_v0 = vmul.f32 %v506_v14, %v506_v14 }
  0xd4   :  { %v161_v15 = vpop.f32.mrf.mxu0  ;;  %v193_v16 = vpop.f32.mrf.mxu1 }
  0xd5   :  { %v325_v21 = vmul.f32 %v161_v15, %v161_v15  ;;  %v333_v58 = vmul.f32 %v193_v16, %v193_v16 }
  0xd6   :  { %v499_v17 = vpop.f32.mrf.mxu0  ;;  %v507_v18 = vpop.f32.mrf.mxu1 }
  0xd7   :  { %v437_v19 = vpack.c.bf16 %v499_v17, %v498_v13  ;;  %v457_v20 = vpack.c.bf16 %v507_v18, %v506_v14  ;;  %v328_v35 = vmul.f32 %v499_v17, %v499_v17  ;;  %v336_v3 = vmul.f32 %v507_v18, %v507_v18 }
  0xd8   :  { %v164_v22 = vpop.f32.mrf.mxu0  ;;  %v196_v23 = vpop.f32.mrf.mxu1 }
  0xd9   :  { %469 = vst [vmem:[%s627_s2 + $0x8] sm:$0xff] %v437_v19   ;;  %v432_v24 = vpack.c.bf16 %v164_v22, %v161_v15  ;;  %v304_v25 = vadd.f32 %v164_v22, %v161_v15  ;;  %v326_v26 = vmul.f32 %v164_v22, %v164_v22  ;;  %473 = vst [vmem:[%s627_s2 + $0x28] sm:$0xff] %v457_v20  }
  0xda   :  { %v452_v27 = vpack.c.bf16 %v196_v23, %v193_v16  ;;  %v502_v28 = vpop.f32.mrf.mxu0  ;;  %v510_v29 = vpop.f32.mrf.mxu1  ;;  %v334_v62 = vmul.f32 %v196_v23, %v196_v23 }
  0xdb   :  { %433 = vst [vmem:[%s627_s2] sm:$0xff] %v432_v24   ;;  %v305_v31 = vadd.f32 %v498_v13, %v304_v25  ;;  %v341_v32 = vadd.f32 %v326_v26, %v325_v21  ;;  %v331_v52 = vmul.f32 %v502_v28, %v502_v28  ;;  %v339_v12 = vmul.f32 %v510_v29, %v510_v29 }
  0xdc   :  { %472 = vst [vmem:[%s627_s2 + $0x20] sm:$0xff] %v452_v27   ;;  %v177_v33 = vpop.f32.mrf.mxu0  ;;  %v209_v34 = vpop.f32.mrf.mxu1 }
  0xdd   :  { %v342_v36 = vadd.f32 %v341_v32, %v327_v30  ;;  %v306_v37 = vadd.f32 %v499_v17, %v305_v31  ;;  %v329_v41 = vmul.f32 %v177_v33, %v177_v33  ;;  %v337_v7 = vmul.f32 %v209_v34, %v209_v34 }
  0xde   :  { %v503_v38 = vpop.f32.mrf.mxu0  ;;  %v511_v39 = vpop.f32.mrf.mxu1 }
  0xdf   :  { %v307_v40 = vadd.f32 %v306_v37, %v177_v33  ;;  %v343_v42 = vadd.f32 %v342_v36, %v328_v35  ;;  %v447_v43 = vpack.c.bf16 %v503_v38, %v502_v28  ;;  %v467_v45 = vpack.c.bf16 %v511_v39, %v510_v29 }
  0xe0   :  { %v180_v44 = vpop.f32.mrf.mxu0  ;;  %v212_v46 = vpop.f32.mrf.mxu1  ;;  %v332_v55 = vmul.f32 %v503_v38, %v503_v38  ;;  %v340_v17 = vmul.f32 %v511_v39, %v511_v39 }
  0xe1   :  { %v344_v47 = vadd.f32 %v343_v42, %v329_v41  ;;  %471 = vst [vmem:[%s627_s2 + $0x18] sm:$0xff] %v447_v43   ;;  %v442_v48 = vpack.c.bf16 %v180_v44, %v177_v33  ;;  %v308_v49 = vadd.f32 %v307_v40, %v180_v44  ;;  %v330_v50 = vmul.f32 %v180_v44, %v180_v44 }
  0xe2   :  { %475 = vst [vmem:[%s627_s2 + $0x38] sm:$0xff] %v467_v45   ;;  %v462_v51 = vpack.c.bf16 %v212_v46, %v209_v34  ;;  %v338_v11 = vmul.f32 %v212_v46, %v212_v46 }
  0xe3   :  { %470 = vst [vmem:[%s627_s2 + $0x10] sm:$0xff] %v442_v48   ;;  %v309_v53 = vadd.f32 %v502_v28, %v308_v49  ;;  %v345_v54 = vadd.f32 %v344_v47, %v330_v50 }
  0xe4   :  { %474 = vst [vmem:[%s627_s2 + $0x30] sm:$0xff] %v462_v51  }
  0xe5   :  { %v310_v56 = vadd.f32 %v503_v38, %v309_v53  ;;  %v346_v57 = vadd.f32 %v345_v54, %v331_v52 }
  0xe7   :  { %v347_v59 = vadd.f32 %v346_v57, %v332_v55  ;;  %v311_v60 = vadd.f32 %v310_v56, %v193_v16 }
  0xe9   :  { %v312_v61 = vadd.f32 %v311_v60, %v196_v23  ;;  %v348_v63 = vadd.f32 %v347_v59, %v333_v58  ;;  %v362_v23 = vlaneseq }
  0xeb   :  { %v313_v1 = vadd.f32 %v506_v14, %v312_v61  ;;  %v349_v2 = vadd.f32 %v348_v63, %v334_v62  ;;  %v363_v27 = vshrl.u32 %v362_v23, 7 }
  0xed   :  { %v350_v4 = vadd.f32 %v349_v2, %v335_v0  ;;  %v314_v5 = vadd.f32 %v507_v18, %v313_v1  ;;  %vm365_vm2 = vcmp.eq.s32.totalorder %v363_v27, 1  ;;  %vm364_vm3 = vcmp.eq.s32.totalorder %v363_v27, 0 }
  0xef   :  { %v315_v6 = vadd.f32 %v314_v5, %v209_v34  ;;  %v351_v8 = vadd.f32 %v350_v4, %v336_v3 }
  0xf1   :  { %v352_v9 = vadd.f32 %v351_v8, %v337_v7  ;;  %v316_v10 = vadd.f32 %v315_v6, %v212_v46 }
  0xf3   :  { %v317_v13 = vadd.f32 %v510_v29, %v316_v10  ;;  %v353_v15 = vadd.f32 %v352_v9, %v338_v11 }
  0xf5   :  { %v318_v16 = vadd.f32 %v511_v39, %v317_v13  ;;  %v354_v19 = vadd.f32 %v353_v15, %v339_v12 }
  0xf7   :  { %v319_v20 = vrot.slane %v318_v16, 4  ;;  %v355_v21 = vadd.f32 %v354_v19, %v340_v17 }
  0xf9   :  { %v320_v22 = vadd.f32 %v319_v20, %v318_v16  ;;  %v356_v14 = vrot.slane %v355_v21, 4 }
  0xfb   :  { %v321_v24 = vrot.slane %v320_v22, 2  ;;  %v357_v25 = vadd.f32 %v356_v14, %v355_v21 }
  0xfd   :  { %v322_v18 = vadd.f32 %v321_v24, %v320_v22  ;;  %v358_v26 = vrot.slane %v357_v25, 2 }
  0xff   :  { %v359_v28 = vadd.f32 %v358_v26, %v357_v25  ;;  %v323_v30 = vrot.slane %v322_v18, 1 }
 0x101   :  { %v360_v31 = vrot.slane %v359_v28, 1  ;;  %v324_v29 = vadd.f32 %v323_v30, %v322_v18 }
 0x103   :  { %v361_v32 = vadd.f32 %v360_v31, %v359_v28 }
 0x105   :  { %v366_v33 = vsel %vm365_vm2, %v361_v32, 0.0 }
 0x106   :  { %v367_v34 = vsel %vm364_vm3, %v324_v29, %v366_v33 }
 0x107   :  { %368 = vst [vmem:[%s628_s3] sm:$0xff] %v367_v34 }

// kernel: resnet_forward.40
= control target key start
LH: loop header
LB: loop body
LE: loop exit
PB: predicated region body
PF: predicated region fallthrough
CT: control target
= control target key end

     0   :  { %s541_s0 = inlined_call_operand.vmem [shape: bf16[128,128], index: 0, kind: input, shape index: {}]   ;;  %s542_s1 = inlined_call_operand.vmem [shape: f32[1,128], index: 1, kind: input, shape index: {}]   ;;  %s543_s2 = inlined_call_operand.vmem [shape: f32[1,128], index: 2, kind: input, shape index: {}]   ;;  %s544_s3 = inlined_call_operand.vmem [shape: bf16[128,128], index: 3, kind: input, shape index: {}]   ;;  %s545_s4 = inlined_call_operand.vmem [shape: bf16[128,128], index: 4, kind: output, shape index: {}]  }
   0x1   :  { %v278_v0 = vld [vmem:[%s541_s0] sm:$0xff]   ;;  %v381_v5 = vld [vmem:[%s541_s0 + $0x8] sm:$0xff]   ;;  %v382_v12 = vld [vmem:[%s541_s0 + $0x10] sm:$0xff]  }
   0x2   :  { %v433_v1 = vld [vmem:[%s542_s1] ss:$0 sm:$0xff]  ;;  %v279_v2 = vunpack.c.l.bf16 %v278_v0  ;;  %v280_v3 = vunpack.c.h.bf16 %v278_v0  ;;  %v388_v6 = vld [vmem:[%s544_s3 + $0x8] sm:$0xff]   ;;  %v283_v10 = vunpack.c.l.bf16 %v381_v5  ;;  %v284_v11 = vunpack.c.h.bf16 %v381_v5  ;;  %v389_v13 = vld [vmem:[%s544_s3 + $0x10] sm:$0xff]  }
   0x3   :  { %v310_v4 = vld [vmem:[%s544_s3] sm:$0xff]   ;;  %v315_v16 = vunpack.c.l.bf16 %v388_v6  ;;  %v316_v17 = vunpack.c.h.bf16 %v388_v6  ;;  %v287_v20 = vunpack.c.l.bf16 %v382_v12  ;;  %v288_v21 = vunpack.c.h.bf16 %v382_v12  ;;  %v383_v22 = vld [vmem:[%s541_s0 + $0x18] sm:$0xff]   ;;  %v385_v54 = vld [vmem:[%s541_s0 + $0x28] sm:$0xff]  }
   0x4   :  { %v447_v7 = vld [vmem:[%s543_s2] ss:$0 sm:$0xff]  ;;  %v311_v8 = vunpack.c.l.bf16 %v310_v4  ;;  %v312_v9 = vunpack.c.h.bf16 %v310_v4  ;;  %v56_v14 = vmul.f32 %v279_v2, %v433_v1  ;;  %v57_v15 = vmul.f32 %v280_v3, %v433_v1  ;;  %v390_v39 = vld [vmem:[%s544_s3 + $0x18] sm:$0xff]   ;;  %v392_v63 = vld [vmem:[%s544_s3 + $0x28] sm:$0xff]  }
   0x5   :  { %v58_v18 = vmul.f32 %v283_v10, %v433_v1  ;;  %v59_v19 = vmul.f32 %v284_v11, %v433_v1  ;;  %v319_v25 = vunpack.c.l.bf16 %v389_v13  ;;  %v320_v26 = vunpack.c.h.bf16 %v389_v13  ;;  %v384_v48 = vld [vmem:[%s541_s0 + $0x20] sm:$0xff]   ;;  %v386_v5 = vld [vmem:[%s541_s0 + $0x30] sm:$0xff]  }
   0x6   :  { %v79_v23 = vadd.f32 %v447_v7, %v56_v14  ;;  %v80_v24 = vadd.f32 %v447_v7, %v57_v15  ;;  %v60_v29 = vmul.f32 %v287_v20, %v433_v1  ;;  %v61_v30 = vmul.f32 %v288_v21, %v433_v1  ;;  %v391_v49 = vld [vmem:[%s544_s3 + $0x20] sm:$0xff]   ;;  %v393_v11 = vld [vmem:[%s544_s3 + $0x30] sm:$0xff]   ;;  %v387_v20 = vld [vmem:[%s541_s0 + $0x38] sm:$0xff]  }
   0x7   :  { %v81_v27 = vadd.f32 %v447_v7, %v58_v18  ;;  %v82_v28 = vadd.f32 %v447_v7, %v59_v19  ;;  %v291_v33 = vunpack.c.l.bf16 %v383_v22  ;;  %v292_v34 = vunpack.c.h.bf16 %v383_v22 }
   0x8   :  { %v127_v31 = vadd.f32 %v311_v8, %v79_v23  ;;  %v128_v32 = vadd.f32 %v312_v9, %v80_v24  ;;  %v83_v37 = vadd.f32 %v447_v7, %v60_v29  ;;  %v84_v38 = vadd.f32 %v447_v7, %v61_v30 }
   0x9   :  { %v129_v35 = vadd.f32 %v315_v16, %v81_v27  ;;  %v130_v36 = vadd.f32 %v316_v17, %v82_v28  ;;  %v62_v42 = vmul.f32 %v291_v33, %v433_v1  ;;  %v63_v43 = vmul.f32 %v292_v34, %v433_v1  ;;  %v394_v33 = vld [vmem:[%s544_s3 + $0x38] sm:$0xff]  }
   0xa   :  { %v143_v40 = vmax.f32 %v127_v31, 0.0  ;;  %v144_v41 = vmax.f32 %v128_v32, 0.0  ;;  %v131_v46 = vadd.f32 %v319_v25, %v83_v37  ;;  %v132_v47 = vadd.f32 %v320_v26, %v84_v38 }
   0xb   :  { %v145_v44 = vmax.f32 %v129_v35, 0.0  ;;  %v146_v45 = vmax.f32 %v130_v36, 0.0  ;;  %v85_v51 = vadd.f32 %v447_v7, %v62_v42  ;;  %v86_v52 = vadd.f32 %v447_v7, %v63_v43 }
   0xc   :  { %v344_v50 = vpack.c.bf16 %v144_v41, %v143_v40  ;;  %v323_v53 = vunpack.c.l.bf16 %v390_v39  ;;  %v147_v56 = vmax.f32 %v131_v46, 0.0  ;;  %v148_v57 = vmax.f32 %v132_v47, 0.0 }
   0xd   :  { %v349_v55 = vpack.c.bf16 %v146_v45, %v145_v44  ;;  %v324_v58 = vunpack.c.h.bf16 %v390_v39  ;;  %v295_v60 = vunpack.c.l.bf16 %v384_v48  ;;  %v296_v61 = vunpack.c.h.bf16 %v384_v48 }
   0xe   :  { %345 = vst [vmem:[%s545_s4] sm:$0xff] %v344_v50   ;;  %v133_v59 = vadd.f32 %v323_v53, %v85_v51  ;;  %v327_v62 = vunpack.c.l.bf16 %v391_v49  ;;  %v354_v0 = vpack.c.bf16 %v148_v57, %v147_v56  ;;  %v328_v3 = vunpack.c.h.bf16 %v391_v49 }
   0xf   :  { %395 = vst [vmem:[%s545_s4 + $0x8] sm:$0xff] %v349_v55   ;;  %v134_v2 = vadd.f32 %v324_v58, %v86_v52  ;;  %v299_v4 = vunpack.c.l.bf16 %v385_v54  ;;  %v64_v8 = vmul.f32 %v295_v60, %v433_v1  ;;  %v65_v9 = vmul.f32 %v296_v61, %v433_v1 }
  0x10   :  { %v149_v6 = vmax.f32 %v133_v59, 0.0  ;;  %v300_v10 = vunpack.c.h.bf16 %v385_v54  ;;  %396 = vst [vmem:[%s545_s4 + $0x10] sm:$0xff] %v354_v0   ;;  %v331_v14 = vunpack.c.l.bf16 %v392_v63  ;;  %v332_v15 = vunpack.c.h.bf16 %v392_v63 }
  0x11   :  { %v150_v12 = vmax.f32 %v134_v2, 0.0  ;;  %v66_v13 = vmul.f32 %v299_v4, %v433_v1  ;;  %v87_v16 = vadd.f32 %v447_v7, %v64_v8  ;;  %v88_v17 = vadd.f32 %v447_v7, %v65_v9 }
  0x12   :  { %v67_v18 = vmul.f32 %v300_v10, %v433_v1  ;;  %v303_v19 = vunpack.c.l.bf16 %v386_v5  ;;  %v304_v23 = vunpack.c.h.bf16 %v386_v5  ;;  %v335_v24 = vunpack.c.l.bf16 %v393_v11 }
  0x13   :  { %v359_v21 = vpack.c.bf16 %v150_v12, %v149_v6  ;;  %v89_v22 = vadd.f32 %v447_v7, %v66_v13  ;;  %v135_v25 = vadd.f32 %v327_v62, %v87_v16  ;;  %v136_v26 = vadd.f32 %v328_v3, %v88_v17 }
  0x14   :  { %v90_v27 = vadd.f32 %v447_v7, %v67_v18  ;;  %v68_v28 = vmul.f32 %v303_v19, %v433_v1  ;;  %v69_v30 = vmul.f32 %v304_v23, %v433_v1  ;;  %v336_v31 = vunpack.c.h.bf16 %v393_v11 }
  0x15   :  { %397 = vst [vmem:[%s545_s4 + $0x18] sm:$0xff] %v359_v21   ;;  %v137_v29 = vadd.f32 %v331_v14, %v89_v22  ;;  %v307_v32 = vunpack.c.l.bf16 %v387_v20  ;;  %v151_v34 = vmax.f32 %v135_v25, 0.0  ;;  %v152_v35 = vmax.f32 %v136_v26, 0.0 }
  0x16   :  { %v138_v36 = vadd.f32 %v332_v15, %v90_v27  ;;  %v91_v37 = vadd.f32 %v447_v7, %v68_v28  ;;  %v92_v39 = vadd.f32 %v447_v7, %v69_v30  ;;  %v308_v40 = vunpack.c.h.bf16 %v387_v20 }
  0x17   :  { %v153_v38 = vmax.f32 %v137_v29, 0.0  ;;  %v70_v41 = vmul.f32 %v307_v32, %v433_v1  ;;  %v364_v42 = vpack.c.bf16 %v152_v35, %v151_v34  ;;  %v339_v45 = vunpack.c.l.bf16 %v394_v33 }
  0x18   :  { %v154_v43 = vmax.f32 %v138_v36, 0.0  ;;  %v139_v44 = vadd.f32 %v335_v24, %v91_v37  ;;  %v140_v46 = vadd.f32 %v336_v31, %v92_v39  ;;  %v71_v47 = vmul.f32 %v308_v40, %v433_v1 }
  0x19   :  { %v93_v48 = vadd.f32 %v447_v7, %v70_v41  ;;  %v340_v49 = vunpack.c.h.bf16 %v394_v33  ;;  %398 = vst [vmem:[%s545_s4 + $0x20] sm:$0xff] %v364_v42  }
  0x1a   :  { %v369_v50 = vpack.c.bf16 %v154_v43, %v153_v38  ;;  %v155_v51 = vmax.f32 %v139_v44, 0.0  ;;  %v156_v52 = vmax.f32 %v140_v46, 0.0  ;;  %v94_v53 = vadd.f32 %v447_v7, %v71_v47 }
  0x1b   :  { %v141_v54 = vadd.f32 %v339_v45, %v93_v48 }
  0x1c   :  { %399 = vst [vmem:[%s545_s4 + $0x28] sm:$0xff] %v369_v50   ;;  %v374_v55 = vpack.c.bf16 %v156_v52, %v155_v51  ;;  %v142_v56 = vadd.f32 %v340_v49, %v94_v53 }
  0x1d   :  { %v157_v1 = vmax.f32 %v141_v54, 0.0 }
  0x1e   :  { %400 = vst [vmem:[%s545_s4 + $0x30] sm:$0xff] %v374_v55   ;;  %v158_v57 = vmax.f32 %v142_v56, 0.0 }
  0x20   :  { %v379_v58 = vpack.c.bf16 %v158_v57, %v157_v1 }
  0x22   :  { %401 = vst [vmem:[%s545_s4 + $0x38] sm:$0xff] %v379_v58  }

// kernel: resnet_forward.37
= control target key start
LH: loop header
LB: loop body
LE: loop exit
PB: predicated region body
PF: predicated region fallthrough
CT: control target
= control target key end

     0   :  { %v613_v0 = vmov 0   ;;  %vm174_vm0 = vcmask 130048   ;;  %s762_s1 = inlined_call_operand.vmem [shape: bf16[144,128], index: 1, kind: input, shape index: {}]   ;;  %s763_s0 = inlined_call_operand.vmem [shape: bf16[128,144], index: 0, kind: input, shape index: {}]   ;;  %s764_s2 = inlined_call_operand.vmem [shape: bf16[128,128], index: 2, kind: output, shape index: {0}]   ;;  %s765_s3 = inlined_call_operand.vmem [shape: f32[8,128], index: 3, kind: output, shape index: {1}]  }
   0x1   :  { %199 = vmatprep.subr.bf16.mxu0 %v613_v0  ;;  %v580_v1 = vld [vmem:[%s762_s1 + $0x38] sm:$0xff]   ;;  %561 = vmatprep.subr.bf16.mxu1 %v613_v0  ;;  %v581_v2 = vld [vmem:[%s762_s1 + $0x30] sm:$0xff]   ;;  %v582_v3 = vld [vmem:[%s762_s1 + $0x28] sm:$0xff]  }
   0x2   :  { %200 = vmatpush1.bf16.msra.mxu0 %v580_v1  ;;  %570 = vmatpush1.bf16.msra.mxu1 %v580_v1  ;;  %v583_v4 = vld [vmem:[%s762_s1 + $0x20] sm:$0xff]   ;;  %v584_v7 = vld [vmem:[%s762_s1 + $0x18] sm:$0xff]   ;;  %v585_v8 = vld [vmem:[%s762_s1 + $0x10] sm:$0xff]  }
   0x3   :  { %201 = vmatprep.subr.bf16.mxu0 %v613_v0  ;;  %562 = vmatprep.subr.bf16.mxu1 %v613_v0  ;;  %v591_v5 = vld [vmem:[%s763_s0 + $0x4] ss:$8 sps:$4 sm:$0xff]   ;;  %v589_v12 = vld [vmem:[%s763_s0] ss:$8 sps:$4 sm:$0xff]   ;;  %v592_v14 = vld [vmem:[%s763_s0 + $0x14] ss:$8 sps:$4 sm:$0xff]  }
   0x4   :  { %474 = vmatprep.mubr.msk.bf16.mxu0 %vm174_vm0, %v591_v5  ;;  %v597_v6 = vld [vmem:[%s763_s0 + $0x44] ss:$8 sps:$4 sm:$0xff]   ;;  %v595_v13 = vld [vmem:[%s763_s0 + $0x40] ss:$8 sps:$4 sm:$0xff]   ;;  %v601_v15 = vld [vmem:[%s763_s0 + $0x54] ss:$8 sps:$4 sm:$0xff]  }
   0x5   :  { %478 = vmatprep.mubr.msk.bf16.mxu1 %vm174_vm0, %v597_v6  ;;  %v586_v9 = vld [vmem:[%s762_s1 + $0x8] sm:$0xff]   ;;  %v587_v10 = vld [vmem:[%s762_s1] sm:$0xff]   ;;  %v594_v16 = vld [vmem:[%s763_s0 + $0x10] ss:$8 sps:$4 sm:$0xff]  }
   0x6   :  { %202 = vmatpush1.bf16.msra.mxu0 %v581_v2  ;;  %571 = vmatpush1.bf16.msra.mxu1 %v581_v2  ;;  %v588_v11 = vld [vmem:[%s762_s1 + $0x40] sm:$0xff]   ;;  %v603_v17 = vld [vmem:[%s763_s0 + $0x50] ss:$8 sps:$4 sm:$0xff]   ;;  %v604_v22 = vld [vmem:[%s763_s0 + $0x34] ss:$8 sps:$4 sm:$0xff]  }
   0x7   :  { %203 = vmatprep.subr.bf16.mxu0 %v613_v0  ;;  %563 = vmatprep.subr.bf16.mxu1 %v613_v0  ;;  %v598_v18 = vld [vmem:[%s763_s0 + $0x24] ss:$8 sps:$4 sm:$0xff]   ;;  %v600_v20 = vld [vmem:[%s763_s0 + $0x20] ss:$8 sps:$4 sm:$0xff]   ;;  %v610_v23 = vld [vmem:[%s763_s0 + $0x74] ss:$8 sps:$4 sm:$0xff]  }
   0x8   :  { %v607_v19 = vld [vmem:[%s763_s0 + $0x64] ss:$8 sps:$4 sm:$0xff]   ;;  %v609_v21 = vld [vmem:[%s763_s0 + $0x60] ss:$8 sps:$4 sm:$0xff]   ;;  %v606_v24 = vld [vmem:[%s763_s0 + $0x30] ss:$8 sps:$4 sm:$0xff]  }
   0x9   :  { %v612_v25 = vld [vmem:[%s763_s0 + $0x70] ss:$8 sps:$4 sm:$0xff]  }
   0xa   :  { %204 = vmatpush1.bf16.msra.mxu0 %v582_v3  ;;  %572 = vmatpush1.bf16.msra.mxu1 %v582_v3 }
   0xb   :  { %205 = vmatprep.subr.bf16.mxu0 %v613_v0  ;;  %564 = vmatprep.subr.bf16.mxu1 %v613_v0 }
   0xe   :  { %206 = vmatpush1.bf16.msra.mxu0 %v583_v4  ;;  %573 = vmatpush1.bf16.msra.mxu1 %v583_v4 }
   0xf   :  { %207 = vmatprep.subr.bf16.mxu0 %v613_v0  ;;  %565 = vmatprep.subr.bf16.mxu1 %v613_v0 }
  0x12   :  { %208 = vmatpush1.bf16.msra.mxu0 %v584_v7  ;;  %574 = vmatpush1.bf16.msra.mxu1 %v584_v7 }
  0x13   :  { %209 = vmatprep.subr.bf16.mxu0 %v613_v0  ;;  %566 = vmatprep.subr.bf16.mxu1 %v613_v0 }
  0x16   :  { %210 = vmatpush1.bf16.msra.mxu0 %v585_v8  ;;  %575 = vmatpush1.bf16.msra.mxu1 %v585_v8 }
  0x17   :  { %211 = vmatprep.subr.bf16.mxu0 %v613_v0  ;;  %567 = vmatprep.subr.bf16.mxu1 %v613_v0 }
  0x1a   :  { %212 = vmatpush1.bf16.msra.mxu0 %v586_v9  ;;  %576 = vmatpush1.bf16.msra.mxu1 %v586_v9 }
  0x1b   :  { %213 = vmatprep.subr.bf16.mxu0 %v613_v0  ;;  %568 = vmatprep.subr.bf16.mxu1 %v613_v0 }
  0x1e   :  { %214 = vmatpush1.bf16.msra.mxu0 %v587_v10  ;;  %577 = vmatpush1.bf16.msra.mxu1 %v587_v10 }
  0x1f   :  { %229 = vmatprep.subr.bf16.mxu0 %v613_v0  ;;  %569 = vmatprep.subr.bf16.mxu1 %v613_v0 }
  0x22   :  { %230 = vmatpush2.bf16.msra.mxu0 %v588_v11  ;;  %578 = vmatpush2.bf16.msra.mxu1 %v588_v11 }
  0x25   :  { %232 = vmatmul.mubr.bf16.vlgmr.msra.gmra.mxu0 %v589_v12  ;;  %264 = vmatmul.mubr.bf16.vlgmr.msra.gmra.mxu1 %v595_v13 }
  0x26   :  { %475 = vmatprep.mubr.msk.bf16.mxu0 %vm174_vm0, %v592_v14  ;;  %479 = vmatprep.mubr.msk.bf16.mxu1 %vm174_vm0, %v601_v15 }
  0x2d   :  { %240 = vmatmul.mubr.bf16.gmra.mxu0 %v594_v16  ;;  %272 = vmatmul.mubr.bf16.gmra.mxu1 %v603_v17 }
  0x2e   :  { %476 = vmatprep.mubr.msk.bf16.mxu0 %vm174_vm0, %v598_v18  ;;  %480 = vmatprep.mubr.msk.bf16.mxu1 %vm174_vm0, %v607_v19 }
  0x35   :  { %248 = vmatmul.mubr.bf16.gmra.mxu0 %v600_v20  ;;  %280 = vmatmul.mubr.bf16.gmra.mxu1 %v609_v21 }
  0x36   :  { %477 = vmatprep.mubr.msk.bf16.mxu0 %vm174_vm0, %v604_v22  ;;  %481 = vmatprep.mubr.msk.bf16.mxu1 %vm174_vm0, %v610_v23 }
  0x3d   :  { %256 = vmatmul.mubr.bf16.gmra.mxu0 %v606_v24  ;;  %288 = vmatmul.mubr.bf16.gmra.mxu1 %v612_v25 }
  0xe5   :  { %v233_v26 = vpop.f32.mrf.mxu0  ;;  %v717_v27 = vpop.f32.mrf.mxu1 }
  0xe6   :  { %v397_v47 = vmul.f32 %v233_v26, %v233_v26  ;;  %v405_v23 = vmul.f32 %v717_v27, %v717_v27 }
  0xe7   :  { %v235_v28 = vpop.f32.mrf.mxu0  ;;  %v267_v29 = vpop.f32.mrf.mxu1 }
  0xe9   :  { %v236_v30 = vpop.f32.mrf.mxu0  ;;  %v719_v31 = vpop.f32.mrf.mxu1 }
  0xea   :  { %v517_v32 = vpack.c.bf16 %v236_v30, %v233_v26  ;;  %v537_v33 = vpack.c.bf16 %v719_v31, %v717_v27  ;;  %v398_v44 = vmul.f32 %v236_v30, %v236_v30  ;;  %v376_v51 = vadd.f32 %v236_v30, %v233_v26 }
  0xeb   :  { %v238_v34 = vpop.f32.mrf.mxu0  ;;  %v270_v35 = vpop.f32.mrf.mxu1  ;;  %v406_v26 = vmul.f32 %v719_v31, %v719_v31 }
  0xec   :  { %518 = vst [vmem:[%s764_s2] sm:$0xff] %v517_v32   ;;  %557 = vst [vmem:[%s764_s2 + $0x20] sm:$0xff] %v537_v33   ;;  %v413_v52 = vadd.f32 %v398_v44, %v397_v47 }
  0xed   :  { %v241_v36 = vpop.f32.mrf.mxu0  ;;  %v729_v37 = vpop.f32.mrf.mxu1 }
  0xee   :  { %v399_v48 = vmul.f32 %v241_v36, %v241_v36  ;;  %v377_v56 = vadd.f32 %v376_v51, %v241_v36  ;;  %v407_v30 = vmul.f32 %v729_v37, %v729_v37 }
  0xef   :  { %v243_v38 = vpop.f32.mrf.mxu0  ;;  %v275_v39 = vpop.f32.mrf.mxu1 }
  0xf0   :  { %v414_v57 = vadd.f32 %v413_v52, %v399_v48 }
  0xf1   :  { %v244_v40 = vpop.f32.mrf.mxu0  ;;  %v276_v41 = vpop.f32.mrf.mxu1 }
  0xf2   :  { %v522_v42 = vpack.c.bf16 %v244_v40, %v241_v36  ;;  %v542_v43 = vpack.c.bf16 %v276_v41, %v729_v37  ;;  %v400_v53 = vmul.f32 %v244_v40, %v244_v40  ;;  %v378_v61 = vadd.f32 %v377_v56, %v244_v40 }
  0xf3   :  { %v246_v45 = vpop.f32.mrf.mxu0  ;;  %v278_v46 = vpop.f32.mrf.mxu1  ;;  %v408_v34 = vmul.f32 %v276_v41, %v276_v41 }
  0xf4   :  { %554 = vst [vmem:[%s764_s2 + $0x8] sm:$0xff] %v522_v42   ;;  %558 = vst [vmem:[%s764_s2 + $0x28] sm:$0xff] %v542_v43   ;;  %v415_v0 = vadd.f32 %v414_v57, %v400_v53 }
  0xf5   :  { %v249_v49 = vpop.f32.mrf.mxu0  ;;  %v281_v50 = vpop.f32.mrf.mxu1 }
  0xf6   :  { %v401_v58 = vmul.f32 %v249_v49, %v249_v49  ;;  %v379_v4 = vadd.f32 %v378_v61, %v249_v49  ;;  %v409_v36 = vmul.f32 %v281_v50, %v281_v50 }
  0xf7   :  { %v251_v54 = vpop.f32.mrf.mxu0  ;;  %v283_v55 = vpop.f32.mrf.mxu1 }
  0xf8   :  { %v416_v5 = vadd.f32 %v415_v0, %v401_v58 }
  0xf9   :  { %v252_v59 = vpop.f32.mrf.mxu0  ;;  %v284_v60 = vpop.f32.mrf.mxu1 }
  0xfa   :  { %v527_v62 = vpack.c.bf16 %v252_v59, %v249_v49  ;;  %v547_v63 = vpack.c.bf16 %v284_v60, %v281_v50  ;;  %v402_v1 = vmul.f32 %v252_v59, %v252_v59  ;;  %v380_v8 = vadd.f32 %v379_v4, %v252_v59 }
  0xfb   :  { %v254_v2 = vpop.f32.mrf.mxu0  ;;  %v286_v3 = vpop.f32.mrf.mxu1  ;;  %v410_v42 = vmul.f32 %v284_v60, %v284_v60 }
  0xfc   :  { %555 = vst [vmem:[%s764_s2 + $0x10] sm:$0xff] %v527_v62   ;;  %559 = vst [vmem:[%s764_s2 + $0x30] sm:$0xff] %v547_v63   ;;  %v417_v10 = vadd.f32 %v416_v5, %v402_v1 }
  0xfd   :  { %v257_v6 = vpop.f32.mrf.mxu0  ;;  %v289_v7 = vpop.f32.mrf.mxu1 }
  0xfe   :  { %v403_v9 = vmul.f32 %v257_v6, %v257_v6  ;;  %v381_v13 = vadd.f32 %v380_v8, %v257_v6  ;;  %v411_v46 = vmul.f32 %v289_v7, %v289_v7 }
  0xff   :  { %v259_v11 = vpop.f32.mrf.mxu0  ;;  %v291_v12 = vpop.f32.mrf.mxu1 }
 0x100   :  { %v418_v14 = vadd.f32 %v417_v10, %v403_v9 }
 0x101   :  { %v260_v15 = vpop.f32.mrf.mxu0  ;;  %v292_v16 = vpop.f32.mrf.mxu1 }
 0x102   :  { %v532_v17 = vpack.c.bf16 %v260_v15, %v257_v6  ;;  %v382_v18 = vadd.f32 %v381_v13, %v260_v15  ;;  %v404_v19 = vmul.f32 %v260_v15, %v260_v15  ;;  %v552_v20 = vpack.c.bf16 %v292_v16, %v289_v7 }
 0x103   :  { %v262_v21 = vpop.f32.mrf.mxu0  ;;  %v294_v22 = vpop.f32.mrf.mxu1  ;;  %v412_v48 = vmul.f32 %v292_v16, %v292_v16 }
 0x104   :  { %556 = vst [vmem:[%s764_s2 + $0x18] sm:$0xff] %v532_v17   ;;  %v383_v24 = vadd.f32 %v382_v18, %v717_v27  ;;  %v419_v25 = vadd.f32 %v418_v14, %v404_v19  ;;  %560 = vst [vmem:[%s764_s2 + $0x38] sm:$0xff] %v552_v20  }
 0x106   :  { %v384_v28 = vadd.f32 %v383_v24, %v719_v31  ;;  %v420_v29 = vadd.f32 %v419_v25, %v405_v23 }
 0x108   :  { %v421_v32 = vadd.f32 %v420_v29, %v406_v26  ;;  %v385_v33 = vadd.f32 %v384_v28, %v729_v37  ;;  %v434_v37 = vlaneseq }
 0x10a   :  { %v386_v35 = vadd.f32 %v385_v33, %v276_v41  ;;  %v422_v27 = vadd.f32 %v421_v32, %v407_v30 }
 0x10c   :  { %v387_v38 = vadd.f32 %v386_v35, %v281_v50  ;;  %v423_v39 = vadd.f32 %v422_v27, %v408_v34  ;;  %v435_v50 = vshrl.u32 %v434_v37, 7 }
 0x10e   :  { %v388_v40 = vadd.f32 %v387_v38, %v284_v60  ;;  %v424_v43 = vadd.f32 %v423_v39, %v409_v36  ;;  %vm437_vm1 = vcmp.eq.s32.totalorder %v435_v50, 1  ;;  %vm436_vm2 = vcmp.eq.s32.totalorder %v435_v50, 0 }
 0x110   :  { %v425_v44 = vadd.f32 %v424_v43, %v410_v42  ;;  %v389_v45 = vadd.f32 %v388_v40, %v289_v7 }
 0x112   :  { %v426_v31 = vadd.f32 %v425_v44, %v411_v46  ;;  %v390_v47 = vadd.f32 %v389_v45, %v292_v16 }
 0x114   :  { %v391_v49 = vrot.slane %v390_v47, 4  ;;  %v427_v51 = vadd.f32 %v426_v31, %v412_v48 }
 0x116   :  { %v392_v52 = vadd.f32 %v391_v49, %v390_v47  ;;  %v428_v53 = vrot.slane %v427_v51, 4 }
 0x118   :  { %v393_v54 = vrot.slane %v392_v52, 2  ;;  %v429_v41 = vadd.f32 %v428_v53, %v427_v51 }
 0x11a   :  { %v394_v55 = vadd.f32 %v393_v54, %v392_v52  ;;  %v430_v56 = vrot.slane %v429_v41, 2 }
 0x11c   :  { %v431_v57 = vadd.f32 %v430_v56, %v429_v41  ;;  %v395_v58 = vrot.slane %v394_v55, 1 }
 0x11e   :  { %v432_v59 = vrot.slane %v431_v57, 1  ;;  %v396_v61 = vadd.f32 %v395_v58, %v394_v55 }
 0x120   :  { %v433_v60 = vadd.f32 %v432_v59, %v431_v57 }
 0x122   :  { %v438_v62 = vsel %vm437_vm1, %v433_v60, 0.0 }
 0x123   :  { %v439_v63 = vsel %vm436_vm2, %v396_v61, %v438_v62 }
 0x124   :  { %440 = vst [vmem:[%s765_s3] sm:$0xff] %v439_v63 }

// kernel: resnet_forward.43
= control target key start
LH: loop header
LB: loop body
LE: loop exit
PB: predicated region body
PF: predicated region fallthrough
CT: control target
= control target key end

     0   :  { %s206_s0 = inlined_call_operand.vmem [shape: bf16[32,256], index: 0, kind: input, shape index: {}]   ;;  %s207_s1 = inlined_call_operand.vmem [shape: f32[1,128], index: 1, kind: input, shape index: {}]   ;;  %s208_s2 = inlined_call_operand.vmem [shape: f32[1,128], index: 2, kind: input, shape index: {}]   ;;  %s209_s3 = inlined_call_operand.vmem [shape: bf16[32,128], index: 3, kind: output, shape index: {}]  }
   0x1   :  { %v128_v0 = vld [vmem:[%s206_s0 + $0x4] sm:$0xf]  ;;  %v129_v1 = vld [vmem:[%s206_s0 + $0xc] sm:$0xf]  ;;  %v130_v2 = vld [vmem:[%s206_s0 + $0x14] sm:$0xf] }
   0x2   :  { %28 = vst [vmem:[#allocation2] sm:$0xf] %v128_v0  ;;  %30 = vst [vmem:[#allocation2 + $0x4] sm:$0xf] %v129_v1  ;;  %v131_v3 = vld [vmem:[%s206_s0 + $0x1c] sm:$0xf] }
   0x3   :  { %32 = vst [vmem:[#allocation2 + $0x8] sm:$0xf] %v130_v2  ;;  %34 = vst [vmem:[#allocation2 + $0xc] sm:$0xf] %v131_v3  ;;  %v132_v5 = vld [vmem:[%s207_s1] ss:$0 sm:$0xff] }
   0x4   :  { %v133_v9 = vld [vmem:[%s208_s2] ss:$0 sm:$0xff] }
   0x9   :  { %v143_v4 = vld [vmem:[#allocation2] sm:$0xff]  }
   0xa   :  { %v144_v6 = vunpack.c.l.bf16 %v143_v4  ;;  %v145_v7 = vunpack.c.h.bf16 %v143_v4  ;;  %v160_v8 = vld [vmem:[#allocation2 + $0x8] sm:$0xff]  }
   0xb   :  { %v148_v10 = vunpack.c.l.bf16 %v160_v8  ;;  %v149_v11 = vunpack.c.h.bf16 %v160_v8 }
   0xc   :  { %v85_v12 = vmul.f32 %v144_v6, %v132_v5  ;;  %v86_v13 = vmul.f32 %v145_v7, %v132_v5 }
   0xd   :  { %v87_v14 = vmul.f32 %v148_v10, %v132_v5  ;;  %v88_v15 = vmul.f32 %v149_v11, %v132_v5 }
   0xe   :  { %v96_v16 = vadd.f32 %v133_v9, %v85_v12  ;;  %v97_v17 = vadd.f32 %v133_v9, %v86_v13 }
   0xf   :  { %v98_v18 = vadd.f32 %v133_v9, %v87_v14  ;;  %v99_v19 = vadd.f32 %v133_v9, %v88_v15 }
  0x10   :  { %v153_v20 = vpack.c.bf16 %v97_v17, %v96_v16 }
  0x11   :  { %v158_v21 = vpack.c.bf16 %v99_v19, %v98_v18 }
  0x12   :  { %154 = vst [vmem:[%s209_s3] sm:$0xff] %v153_v20  }
  0x13   :  { %161 = vst [vmem:[%s209_s3 + $0x8] sm:$0xff] %v158_v21  }

// kernel: resnet_forward.41
= control target key start
LH: loop header
LB: loop body
LE: loop exit
PB: predicated region body
PF: predicated region fallthrough
CT: control target
= control target key end

     0   :  { %vm144_vm0 = vcmask 130048   ;;  %v276_v58 = vlaneseq  ;;  %s481_s1 = inlined_call_operand.vmem [shape: bf16[144,256], index: 1, kind: input, shape index: {}]   ;;  %s482_s0 = inlined_call_operand.vmem [shape: bf16[32,144], index: 0, kind: input, shape index: {}]   ;;  %s483_s2 = inlined_call_operand.vmem [shape: bf16[32,256], index: 2, kind: output, shape index: {0}]   ;;  %s484_s3 = inlined_call_operand.vmem [shape: f32[8,256], index: 3, kind: output, shape index: {1}]  }
   0x1   :  { %v344_v0 = vld [vmem:[%s481_s1 + $0x74] ss:$8 sps:$4 sm:$0xff]   ;;  %v346_v1 = vld [vmem:[%s481_s1 + $0x70] ss:$8 sps:$4 sm:$0xff]   ;;  %v347_v2 = vld [vmem:[%s481_s1 + $0x64] ss:$8 sps:$4 sm:$0xff]  }
   0x2   :  { %151 = vmatprep.subr.bf16.mxu0 %v344_v0  ;;  %326 = vmatprep.subr.bf16.mxu1 %v344_v0  ;;  %v349_v3 = vld [vmem:[%s481_s1 + $0x60] ss:$8 sps:$4 sm:$0xff]   ;;  %v350_v4 = vld [vmem:[%s481_s1 + $0x54] ss:$8 sps:$4 sm:$0xff]   ;;  %v352_v5 = vld [vmem:[%s481_s1 + $0x50] ss:$8 sps:$4 sm:$0xff]  }
   0x3   :  { %152 = vmatpush1.bf16.msra.mxu0 %v346_v1  ;;  %335 = vmatpush1.bf16.msra.mxu1 %v346_v1  ;;  %v353_v6 = vld [vmem:[%s481_s1 + $0x44] ss:$8 sps:$4 sm:$0xff]   ;;  %v355_v7 = vld [vmem:[%s481_s1 + $0x40] ss:$8 sps:$4 sm:$0xff]   ;;  %v356_v8 = vld [vmem:[%s481_s1 + $0x34] ss:$8 sps:$4 sm:$0xff]  }
   0x4   :  { %153 = vmatprep.subr.bf16.mxu0 %v347_v2  ;;  %327 = vmatprep.subr.bf16.mxu1 %v347_v2  ;;  %v373_v9 = vld [vmem:[%s482_s0 + $0x4] ss:$8 sps:$4 sm:$0xff]   ;;  %v376_v10 = vld [vmem:[%s482_s0 + $0x14] ss:$8 sps:$4 sm:$0xff]   ;;  %v358_v11 = vld [vmem:[%s481_s1 + $0x30] ss:$8 sps:$4 sm:$0xff]  }
   0x5   :  { %v359_v12 = vld [vmem:[%s481_s1 + $0x24] ss:$8 sps:$4 sm:$0xff]   ;;  %316 = vmatprep.mubr.msk.bf16.mxu0 %vm144_vm0, %v373_v9  ;;  %317 = vmatprep.mubr.msk.bf16.mxu1 %vm144_vm0, %v376_v10  ;;  %v361_v13 = vld [vmem:[%s481_s1 + $0x20] ss:$8 sps:$4 sm:$0xff]   ;;  %v362_v14 = vld [vmem:[%s481_s1 + $0x14] ss:$8 sps:$4 sm:$0xff]  }
   0x6   :  { %v364_v15 = vld [vmem:[%s481_s1 + $0x10] ss:$8 sps:$4 sm:$0xff]   ;;  %v365_v16 = vld [vmem:[%s481_s1 + $0x4] ss:$8 sps:$4 sm:$0xff]   ;;  %v367_v17 = vld [vmem:[%s481_s1] ss:$8 sps:$4 sm:$0xff]  }
   0x7   :  { %154 = vmatpush1.bf16.msra.mxu0 %v349_v3  ;;  %336 = vmatpush1.bf16.msra.mxu1 %v349_v3  ;;  %v368_v18 = vld [vmem:[%s481_s1 + $0x84] ss:$8 sps:$4 sm:$0xff]   ;;  %v370_v19 = vld [vmem:[%s481_s1 + $0x80] ss:$8 sps:$4 sm:$0xff]   ;;  %v374_v21 = vld [vmem:[%s482_s0 + $0x10] ss:$8 sps:$4 sm:$0xff]  }
   0x8   :  { %155 = vmatprep.subr.bf16.mxu0 %v350_v4  ;;  %328 = vmatprep.subr.bf16.mxu1 %v350_v4  ;;  %v371_v20 = vld [vmem:[%s482_s0] ss:$8 sps:$4 sm:$0xff]   ;;  %v277_v3 = vshrl.u32 %v276_v58, 7 }
   0xa   :  { %vm279_vm1 = vcmp.eq.s32.totalorder %v277_v3, 1  ;;  %vm278_vm2 = vcmp.eq.s32.totalorder %v277_v3, 0 }
   0xb   :  { %156 = vmatpush1.bf16.msra.mxu0 %v352_v5  ;;  %337 = vmatpush1.bf16.msra.mxu1 %v352_v5 }
   0xc   :  { %157 = vmatprep.subr.bf16.mxu0 %v353_v6  ;;  %329 = vmatprep.subr.bf16.mxu1 %v353_v6 }
   0xf   :  { %158 = vmatpush1.bf16.msra.mxu0 %v355_v7  ;;  %338 = vmatpush1.bf16.msra.mxu1 %v355_v7 }
  0x10   :  { %159 = vmatprep.subr.bf16.mxu0 %v356_v8  ;;  %330 = vmatprep.subr.bf16.mxu1 %v356_v8 }
  0x13   :  { %160 = vmatpush1.bf16.msra.mxu0 %v358_v11  ;;  %339 = vmatpush1.bf16.msra.mxu1 %v358_v11 }
  0x14   :  { %161 = vmatprep.subr.bf16.mxu0 %v359_v12  ;;  %331 = vmatprep.subr.bf16.mxu1 %v359_v12 }
  0x17   :  { %162 = vmatpush1.bf16.msra.mxu0 %v361_v13  ;;  %340 = vmatpush1.bf16.msra.mxu1 %v361_v13 }
  0x18   :  { %163 = vmatprep.subr.bf16.mxu0 %v362_v14  ;;  %332 = vmatprep.subr.bf16.mxu1 %v362_v14 }
  0x1b   :  { %164 = vmatpush1.bf16.msra.mxu0 %v364_v15  ;;  %341 = vmatpush1.bf16.msra.mxu1 %v364_v15 }
  0x1c   :  { %165 = vmatprep.subr.bf16.mxu0 %v365_v16  ;;  %333 = vmatprep.subr.bf16.mxu1 %v365_v16 }
  0x1f   :  { %166 = vmatpush1.bf16.msra.mxu0 %v367_v17  ;;  %342 = vmatpush1.bf16.msra.mxu1 %v367_v17 }
  0x20   :  { %181 = vmatprep.subr.bf16.mxu0 %v368_v18  ;;  %334 = vmatprep.subr.bf16.mxu1 %v368_v18 }
  0x23   :  { %182 = vmatpush2.bf16.msra.mxu0 %v370_v19  ;;  %343 = vmatpush2.bf16.msra.mxu1 %v370_v19 }
  0x26   :  { %184 = vmatmul.mubr.bf16.vlgmr.msra.gmra.mxu0 %v371_v20  ;;  %194 = vmatmul.mubr.bf16.vlgmr.msra.gmra.mxu1 %v374_v21 }
  0xe6   :  { %v185_v22 = vpop.f32.mrf.mxu0  ;;  %v195_v23 = vpop.f32.mrf.mxu1 }
  0xe7   :  { %v250_v30 = vmul.f32 %v185_v22, %v185_v22  ;;  %v254_v33 = vmul.f32 %v195_v23, %v195_v23 }
  0xe8   :  { %v187_v24 = vpop.f32.mrf.mxu0  ;;  %v197_v25 = vpop.f32.mrf.mxu1 }
  0xe9   :  { %v322_v26 = vpack.c.bf16 %v187_v24, %v185_v22  ;;  %v324_v27 = vpack.c.bf16 %v197_v25, %v195_v23  ;;  %v251_v40 = vmul.f32 %v187_v24, %v187_v24  ;;  %v255_v47 = vmul.f32 %v197_v25, %v197_v25 }
  0xea   :  { %v189_v28 = vpop.f32.mrf.mxu0  ;;  %v199_v29 = vpop.f32.mrf.mxu1 }
  0xeb   :  { %228 = vst [vmem:[%s483_s2] sm:$0xff] %v322_v26  ;;  %230 = vst [vmem:[%s483_s2 + $0x10] sm:$0xff] %v324_v27  ;;  %v232_v31 = vadd.f32 %v189_v28, %v185_v22  ;;  %v252_v32 = vmul.f32 %v189_v28, %v189_v28  ;;  %v256_v44 = vmul.f32 %v199_v29, %v199_v29 }
  0xec   :  { %v191_v34 = vpop.f32.mrf.mxu0  ;;  %v201_v35 = vpop.f32.mrf.mxu1 }
  0xed   :  { %v258_v36 = vadd.f32 %v252_v32, %v250_v30  ;;  %v233_v37 = vadd.f32 %v232_v31, %v195_v23  ;;  %v323_v38 = vpack.c.bf16 %v191_v34, %v189_v28  ;;  %v241_v39 = vadd.f32 %v191_v34, %v187_v24 }
  0xee   :  { %v253_v41 = vmul.f32 %v191_v34, %v191_v34  ;;  %v325_v42 = vpack.c.bf16 %v201_v35, %v199_v29  ;;  %v257_v52 = vmul.f32 %v201_v35, %v201_v35 }
  0xef   :  { %v234_v43 = vadd.f32 %v233_v37, %v199_v29  ;;  %v259_v45 = vadd.f32 %v258_v36, %v254_v33  ;;  %229 = vst [vmem:[%s483_s2 + $0x8] sm:$0xff] %v323_v38  ;;  %v242_v46 = vadd.f32 %v241_v39, %v197_v25 }
  0xf0   :  { %v267_v48 = vadd.f32 %v253_v41, %v251_v40  ;;  %231 = vst [vmem:[%s483_s2 + $0x18] sm:$0xff] %v325_v42 }
  0xf1   :  { %v235_v49 = vrot.slane %v234_v43, 4  ;;  %v260_v50 = vadd.f32 %v259_v45, %v256_v44  ;;  %v243_v51 = vadd.f32 %v242_v46, %v201_v35 }
  0xf2   :  { %v268_v53 = vadd.f32 %v267_v48, %v255_v47 }
  0xf3   :  { %v236_v54 = vadd.f32 %v235_v49, %v234_v43  ;;  %v261_v55 = vrot.slane %v260_v50, 4  ;;  %v244_v56 = vrot.slane %v243_v51, 4 }
  0xf4   :  { %v269_v57 = vadd.f32 %v268_v53, %v257_v52 }
  0xf5   :  { %v237_v59 = vrot.slane %v236_v54, 2  ;;  %v262_v60 = vadd.f32 %v261_v55, %v260_v50  ;;  %v245_v61 = vadd.f32 %v244_v56, %v243_v51 }
  0xf6   :  { %v270_v62 = vrot.slane %v269_v57, 4 }
  0xf7   :  { %v238_v63 = vadd.f32 %v237_v59, %v236_v54  ;;  %v263_v0 = vrot.slane %v262_v60, 2  ;;  %v246_v1 = vrot.slane %v245_v61, 2 }
  0xf8   :  { %v271_v2 = vadd.f32 %v270_v62, %v269_v57 }
  0xf9   :  { %v264_v4 = vadd.f32 %v263_v0, %v262_v60  ;;  %v247_v5 = vadd.f32 %v246_v1, %v245_v61  ;;  %v239_v6 = vrot.slane %v238_v63, 1 }
  0xfa   :  { %v272_v7 = vrot.slane %v271_v2, 2 }
  0xfb   :  { %v265_v8 = vrot.slane %v264_v4, 1  ;;  %v248_v11 = vrot.slane %v247_v5, 1  ;;  %v240_v12 = vadd.f32 %v239_v6, %v238_v63 }
  0xfc   :  { %v273_v9 = vadd.f32 %v272_v7, %v271_v2 }
  0xfd   :  { %v266_v10 = vadd.f32 %v265_v8, %v264_v4  ;;  %v249_v17 = vadd.f32 %v248_v11, %v247_v5 }
  0xfe   :  { %v274_v13 = vrot.slane %v273_v9, 1 }
  0xff   :  { %v280_v14 = vsel %vm279_vm1, %v266_v10, 0.0 }
 0x100   :  { %v275_v15 = vadd.f32 %v274_v13, %v273_v9  ;;  %v282_v16 = vsel %vm278_vm2, %v240_v12, %v280_v14 }
 0x101   :  { %284 = vst [vmem:[%s484_s3] sm:$0xff] %v282_v16 }
 0x102   :  { %v281_v18 = vsel %vm279_vm1, %v275_v15, 0.0 }
 0x103   :  { %v283_v19 = vsel %vm278_vm2, %v249_v17, %v281_v18 }
 0x104   :  { %285 = vst [vmem:[%s484_s3 + $0x8] sm:$0xff] %v283_v19 }

// kernel: resnet_forward.42
= control target key start
LH: loop header
LB: loop body
LE: loop exit
PB: predicated region body
PF: predicated region fallthrough
CT: control target
= control target key end

     0   :  { %s205_s0 = inlined_call_operand.vmem [shape: bf16[32,256], index: 0, kind: input, shape index: {}]   ;;  %s206_s1 = inlined_call_operand.vmem [shape: f32[1,128], index: 1, kind: input, shape index: {}]   ;;  %s207_s2 = inlined_call_operand.vmem [shape: f32[1,128], index: 2, kind: input, shape index: {}]   ;;  %s208_s3 = inlined_call_operand.vmem [shape: bf16[32,128], index: 3, kind: output, shape index: {}]  }
   0x1   :  { %v26_v0 = vld [vmem:[%s205_s0] sm:$0xf]  ;;  %v28_v1 = vld [vmem:[%s205_s0 + $0x8] sm:$0xf]  ;;  %v30_v2 = vld [vmem:[%s205_s0 + $0x10] sm:$0xf] }
   0x2   :  { %27 = vst [vmem:[#allocation2] sm:$0xf] %v26_v0  ;;  %29 = vst [vmem:[#allocation2 + $0x4] sm:$0xf] %v28_v1  ;;  %v32_v3 = vld [vmem:[%s205_s0 + $0x18] sm:$0xf] }
   0x3   :  { %31 = vst [vmem:[#allocation2 + $0x8] sm:$0xf] %v30_v2  ;;  %33 = vst [vmem:[#allocation2 + $0xc] sm:$0xf] %v32_v3  ;;  %v131_v5 = vld [vmem:[%s206_s1] ss:$0 sm:$0xff] }
   0x4   :  { %v132_v9 = vld [vmem:[%s207_s2] ss:$0 sm:$0xff] }
   0x9   :  { %v142_v4 = vld [vmem:[#allocation2] sm:$0xff]  }
   0xa   :  { %v143_v6 = vunpack.c.l.bf16 %v142_v4  ;;  %v144_v7 = vunpack.c.h.bf16 %v142_v4  ;;  %v159_v8 = vld [vmem:[#allocation2 + $0x8] sm:$0xff]  }
   0xb   :  { %v147_v10 = vunpack.c.l.bf16 %v159_v8  ;;  %v148_v11 = vunpack.c.h.bf16 %v159_v8 }
   0xc   :  { %v84_v12 = vmul.f32 %v143_v6, %v131_v5  ;;  %v85_v13 = vmul.f32 %v144_v7, %v131_v5 }
   0xd   :  { %v86_v14 = vmul.f32 %v147_v10, %v131_v5  ;;  %v87_v15 = vmul.f32 %v148_v11, %v131_v5 }
   0xe   :  { %v95_v16 = vadd.f32 %v132_v9, %v84_v12  ;;  %v96_v17 = vadd.f32 %v132_v9, %v85_v13 }
   0xf   :  { %v97_v18 = vadd.f32 %v132_v9, %v86_v14  ;;  %v98_v19 = vadd.f32 %v132_v9, %v87_v15 }
  0x10   :  { %v99_v20 = vmax.f32 %v95_v16, 0.0  ;;  %v100_v21 = vmax.f32 %v96_v17, 0.0 }
  0x11   :  { %v101_v22 = vmax.f32 %v97_v18, 0.0  ;;  %v102_v23 = vmax.f32 %v98_v19, 0.0 }
  0x12   :  { %v152_v24 = vpack.c.bf16 %v100_v21, %v99_v20 }
  0x13   :  { %v157_v25 = vpack.c.bf16 %v102_v23, %v101_v22 }
  0x14   :  { %153 = vst [vmem:[%s208_s3] sm:$0xff] %v152_v24  }
  0x15   :  { %160 = vst [vmem:[%s208_s3 + $0x8] sm:$0xff] %v157_v25  }

// kernel: resnet_forward.45
= control target key start
LH: loop header
LB: loop body
LE: loop exit
PB: predicated region body
PF: predicated region fallthrough
CT: control target
= control target key end

     0   :  { %s175_s0 = inlined_call_operand.vmem [shape: bf16[32,128], index: 0, kind: input, shape index: {}]   ;;  %s176_s1 = inlined_call_operand.vmem [shape: f32[1,128], index: 1, kind: input, shape index: {}]   ;;  %s177_s2 = inlined_call_operand.vmem [shape: f32[1,128], index: 2, kind: input, shape index: {}]   ;;  %s178_s3 = inlined_call_operand.vmem [shape: bf16[32,128], index: 3, kind: input, shape index: {}]   ;;  %s179_s4 = inlined_call_operand.vmem [shape: bf16[32,128], index: 4, kind: output, shape index: {}]  }
   0x1   :  { %v98_v0 = vld [vmem:[%s175_s0] sm:$0xff]   ;;  %v123_v5 = vld [vmem:[%s175_s0 + $0x8] sm:$0xff]  }
   0x2   :  { %v87_v1 = vld [vmem:[%s176_s1] ss:$0 sm:$0xff]  ;;  %v99_v2 = vunpack.c.l.bf16 %v98_v0  ;;  %v100_v3 = vunpack.c.h.bf16 %v98_v0  ;;  %v124_v6 = vld [vmem:[%s178_s3 + $0x8] sm:$0xff]   ;;  %v103_v8 = vunpack.c.l.bf16 %v123_v5  ;;  %v104_v9 = vunpack.c.h.bf16 %v123_v5 }
   0x3   :  { %v106_v4 = vld [vmem:[%s178_s3] sm:$0xff]   ;;  %v111_v16 = vunpack.c.l.bf16 %v124_v6  ;;  %v112_v17 = vunpack.c.h.bf16 %v124_v6 }
   0x4   :  { %v88_v7 = vld [vmem:[%s177_s2] ss:$0 sm:$0xff]  ;;  %v32_v10 = vmul.f32 %v99_v2, %v87_v1  ;;  %v33_v11 = vmul.f32 %v100_v3, %v87_v1  ;;  %v107_v12 = vunpack.c.l.bf16 %v106_v4  ;;  %v108_v13 = vunpack.c.h.bf16 %v106_v4 }
   0x5   :  { %v34_v14 = vmul.f32 %v103_v8, %v87_v1  ;;  %v35_v15 = vmul.f32 %v104_v9, %v87_v1 }
   0x6   :  { %v43_v18 = vadd.f32 %v88_v7, %v32_v10  ;;  %v44_v19 = vadd.f32 %v88_v7, %v33_v11 }
   0x7   :  { %v45_v20 = vadd.f32 %v88_v7, %v34_v14  ;;  %v46_v21 = vadd.f32 %v88_v7, %v35_v15 }
   0x8   :  { %v55_v22 = vadd.f32 %v107_v12, %v43_v18  ;;  %v56_v23 = vadd.f32 %v108_v13, %v44_v19 }
   0x9   :  { %v57_v24 = vadd.f32 %v111_v16, %v45_v20  ;;  %v58_v25 = vadd.f32 %v112_v17, %v46_v21 }
   0xa   :  { %v59_v26 = vmax.f32 %v55_v22, 0.0  ;;  %v60_v27 = vmax.f32 %v56_v23, 0.0 }
   0xb   :  { %v61_v28 = vmax.f32 %v57_v24, 0.0  ;;  %v62_v29 = vmax.f32 %v58_v25, 0.0 }
   0xc   :  { %v116_v30 = vpack.c.bf16 %v60_v27, %v59_v26 }
   0xd   :  { %v121_v31 = vpack.c.bf16 %v62_v29, %v61_v28 }
   0xe   :  { %117 = vst [vmem:[%s179_s4] sm:$0xff] %v116_v30  }
   0xf   :  { %125 = vst [vmem:[%s179_s4 + $0x8] sm:$0xff] %v121_v31  }

// kernel: resnet_forward.47
= control target key start
LH: loop header
LB: loop body
LE: loop exit
PB: predicated region body
PF: predicated region fallthrough
CT: control target
= control target key end

     0   :  { %s140_s0 = inlined_call_operand.vmem [shape: bf16[32,128], index: 0, kind: input, shape index: {}]   ;;  %s141_s1 = inlined_call_operand.vmem [shape: f32[1,128], index: 1, kind: input, shape index: {}]   ;;  %s142_s2 = inlined_call_operand.vmem [shape: f32[1,128], index: 2, kind: input, shape index: {}]   ;;  %s143_s3 = inlined_call_operand.vmem [shape: bf16[32,128], index: 3, kind: output, shape index: {}]  }
   0x1   :  { %v83_v0 = vld [vmem:[%s140_s0] sm:$0xff]   ;;  %v100_v4 = vld [vmem:[%s140_s0 + $0x8] sm:$0xff]  }
   0x2   :  { %v72_v1 = vld [vmem:[%s141_s1] ss:$0 sm:$0xff]  ;;  %v84_v2 = vunpack.c.l.bf16 %v83_v0  ;;  %v85_v3 = vunpack.c.h.bf16 %v83_v0  ;;  %v88_v6 = vunpack.c.l.bf16 %v100_v4  ;;  %v89_v7 = vunpack.c.h.bf16 %v100_v4 }
   0x3   :  { %v73_v5 = vld [vmem:[%s142_s2] ss:$0 sm:$0xff] }
   0x4   :  { %v29_v8 = vmul.f32 %v84_v2, %v72_v1  ;;  %v30_v9 = vmul.f32 %v85_v3, %v72_v1  ;;  %v31_v10 = vmul.f32 %v88_v6, %v72_v1  ;;  %v32_v11 = vmul.f32 %v89_v7, %v72_v1 }
   0x6   :  { %v40_v12 = vadd.f32 %v73_v5, %v29_v8  ;;  %v41_v13 = vadd.f32 %v73_v5, %v30_v9  ;;  %v42_v14 = vadd.f32 %v73_v5, %v31_v10  ;;  %v43_v15 = vadd.f32 %v73_v5, %v32_v11 }
   0x8   :  { %v44_v16 = vmax.f32 %v40_v12, 0.0  ;;  %v45_v17 = vmax.f32 %v41_v13, 0.0  ;;  %v46_v18 = vmax.f32 %v42_v14, 0.0  ;;  %v47_v19 = vmax.f32 %v43_v15, 0.0 }
   0xa   :  { %v93_v20 = vpack.c.bf16 %v45_v17, %v44_v16  ;;  %v98_v21 = vpack.c.bf16 %v47_v19, %v46_v18 }
   0xc   :  { %94 = vst [vmem:[%s143_s3] sm:$0xff] %v93_v20   ;;  %101 = vst [vmem:[%s143_s3 + $0x8] sm:$0xff] %v98_v21  }

// kernel: resnet_forward.44
= control target key start
LH: loop header
LB: loop body
LE: loop exit
PB: predicated region body
PF: predicated region fallthrough
CT: control target
= control target key end

     0   :  { %vm196_vm0 = vcmask 261120   ;;  %v343_v59 = vlaneseq  ;;  %s570_s1 = inlined_call_operand.vmem [shape: bf16[288,128], index: 1, kind: input, shape index: {}]   ;;  %s571_s0 = inlined_call_operand.vmem [shape: bf16[32,288], index: 0, kind: input, shape index: {}]   ;;  %s572_s2 = inlined_call_operand.vmem [shape: bf16[32,128], index: 2, kind: output, shape index: {0}]   ;;  %s573_s3 = inlined_call_operand.vmem [shape: f32[8,128], index: 3, kind: output, shape index: {1}]  }
   0x1   :  { %v443_v0 = vld [vmem:[%s570_s1 + $0x78] sm:$0xff]   ;;  %v445_v2 = vld [vmem:[%s570_s1 + $0x70] sm:$0xff]   ;;  %v447_v4 = vld [vmem:[%s570_s1 + $0x68] sm:$0xff]  }
   0x2   :  { %v444_v1 = vld [vmem:[%s570_s1 + $0x38] sm:$0xff]   ;;  %403 = vmatprep.subr.bf16.mxu0 %v443_v0  ;;  %v446_v3 = vld [vmem:[%s570_s1 + $0x30] sm:$0xff]   ;;  %v448_v5 = vld [vmem:[%s570_s1 + $0x28] sm:$0xff]   ;;  %v344_v0 = vshrl.u32 %v343_v59, 7 }
   0x3   :  { %404 = vmatpush3.bf16.msra.mxu0 %v444_v1  ;;  %v449_v6 = vld [vmem:[%s570_s1 + $0x60] sm:$0xff]   ;;  %v451_v8 = vld [vmem:[%s570_s1 + $0x58] sm:$0xff]   ;;  %v456_v9 = vld [vmem:[%s570_s1 + $0x88] sm:$0xff]  }
   0x4   :  { %405 = vmatprep.subr.bf16.mxu0 %v445_v2  ;;  %v450_v7 = vld [vmem:[%s570_s1 + $0x20] sm:$0xff]   ;;  %v452_v10 = vld [vmem:[%s570_s1 + $0x18] sm:$0xff]   ;;  %v453_v11 = vld [vmem:[%s570_s1 + $0x50] sm:$0xff]   ;;  %435 = vmatprep.subr.bf16.mxu1 %v456_v9  ;;  %vm346_vm1 = vcmp.eq.s32.totalorder %v344_v0, 1  ;;  %vm345_vm2 = vcmp.eq.s32.totalorder %v344_v0, 0 }
   0x5   :  { %436 = vmatpush3.bf16.msra.mxu1 %v456_v9  ;;  %v459_v12 = vld [vmem:[%s570_s1 + $0x80] sm:$0xff]   ;;  %v454_v13 = vld [vmem:[%s570_s1 + $0x10] sm:$0xff]   ;;  %v455_v14 = vld [vmem:[%s570_s1 + $0x48] sm:$0xff]  }
   0x6   :  { %437 = vmatprep.subr.bf16.mxu1 %v459_v12  ;;  %v463_v15 = vld [vmem:[%s571_s0 + $0x4] ss:$12 sps:$4 sm:$0xff]   ;;  %v464_v16 = vld [vmem:[%s571_s0 + $0x8] ss:$12 sps:$4 sm:$0xff]   ;;  %v465_v17 = vld [vmem:[%s571_s0 + $0x20] ss:$12 sps:$4 sm:$0xff]  }
   0x7   :  { %406 = vmatpush3.bf16.msra.mxu0 %v446_v3  ;;  %235 = vmatprep.mubr.bf16.mxu0 %v463_v15  ;;  %v457_v18 = vld [vmem:[%s570_s1 + $0x8] sm:$0xff]   ;;  %v458_v19 = vld [vmem:[%s570_s1 + $0x40] sm:$0xff]  }
   0x8   :  { %407 = vmatprep.subr.bf16.mxu0 %v447_v4  ;;  %439 = vmatprep.mubr.msk.bf16.mxu1 %vm196_vm0, %v464_v16  ;;  %v460_v20 = vld [vmem:[%s570_s1] sm:$0xff]   ;;  %v466_v22 = vld [vmem:[%s571_s0 + $0x1c] ss:$12 sps:$4 sm:$0xff]  }
   0x9   :  { %438 = vmatpush3.bf16.msra.mxu1 %v459_v12  ;;  %v461_v21 = vld [vmem:[%s571_s0] ss:$12 sps:$4 sm:$0xff]   ;;  %v468_v23 = vld [vmem:[%s571_s0 + $0x18] ss:$12 sps:$4 sm:$0xff]  }
   0xb   :  { %408 = vmatpush3.bf16.msra.mxu0 %v448_v5 }
   0xc   :  { %409 = vmatprep.subr.bf16.mxu0 %v449_v6  ;;  %440 = vmatmul.mubr.msk.bf16.vlgmr.msra.gmra.mxu1 %vm196_vm0, %v465_v17 }
   0xf   :  { %410 = vmatpush3.bf16.msra.mxu0 %v450_v7 }
  0x10   :  { %411 = vmatprep.subr.bf16.mxu0 %v451_v8 }
  0x13   :  { %412 = vmatpush3.bf16.msra.mxu0 %v452_v10 }
  0x14   :  { %413 = vmatprep.subr.bf16.mxu0 %v453_v11 }
  0x17   :  { %414 = vmatpush3.bf16.msra.mxu0 %v454_v13 }
  0x18   :  { %415 = vmatprep.subr.bf16.mxu0 %v455_v14 }
  0x1b   :  { %416 = vmatpush3.bf16.msra.mxu0 %v457_v18 }
  0x1c   :  { %417 = vmatprep.subr.bf16.mxu0 %v458_v19 }
  0x1f   :  { %418 = vmatpush3.bf16.msra.mxu0 %v460_v20 }
  0x22   :  { %236 = vmatmul.mubr.bf16.vlgmr.msra.gmra.mxu0 %v461_v21 }
  0x23   :  { %243 = vmatprep.mubr.bf16.mxu0 %v466_v22 }
  0x2a   :  { %244 = vmatmul.mubr.bf16.gmra.mxu0 %v468_v23 }
  0xcc   :  { %v441_v24 = vpop.f32.mrf.mxu1 }
  0xce   :  { %v286_v26 = vpop.f32.mrf.mxu1 }
  0xd0   :  { %v442_v29 = vpop.f32.mrf.mxu1 }
  0xd2   :  { %v289_v33 = vpop.f32.mrf.mxu1 }
  0xe2   :  { %v419_v25 = vpop.f32.mrf.mxu0 }
  0xe4   :  { %v420_v27 = vpop.f32.mrf.mxu0 }
  0xe5   :  { %v421_v30 = vadd.f32 %v420_v27, %v419_v25 }
  0xe6   :  { %v422_v28 = vpop.f32.mrf.mxu0 }
  0xe7   :  { %v287_v35 = vadd.f32 %v421_v30, %v286_v26 }
  0xe8   :  { %v423_v31 = vpop.f32.mrf.mxu0 }
  0xe9   :  { %v424_v32 = vadd.f32 %v423_v31, %v422_v28  ;;  %v330_v44 = vmul.f32 %v287_v35, %v287_v35 }
  0xea   :  { %v425_v34 = vpop.f32.mrf.mxu0 }
  0xeb   :  { %v290_v36 = vadd.f32 %v424_v32, %v289_v33 }
  0xec   :  { %v426_v37 = vpop.f32.mrf.mxu0 }
  0xed   :  { %v395_v38 = vpack.c.bf16 %v290_v36, %v287_v35  ;;  %v427_v39 = vadd.f32 %v426_v37, %v425_v34  ;;  %v331_v41 = vmul.f32 %v290_v36, %v290_v36  ;;  %v321_v45 = vadd.f32 %v290_v36, %v287_v35 }
  0xee   :  { %v428_v40 = vpop.f32.mrf.mxu0 }
  0xef   :  { %396 = vst [vmem:[%s572_s2] sm:$0xff] %v395_v38   ;;  %v295_v42 = vadd.f32 %v441_v24, %v427_v39  ;;  %v334_v48 = vadd.f32 %v331_v41, %v330_v44 }
  0xf0   :  { %v429_v43 = vpop.f32.mrf.mxu0 }
  0xf1   :  { %v332_v46 = vmul.f32 %v295_v42, %v295_v42  ;;  %v430_v47 = vadd.f32 %v429_v43, %v428_v40  ;;  %v322_v49 = vadd.f32 %v321_v45, %v295_v42 }
  0xf3   :  { %v298_v50 = vadd.f32 %v442_v29, %v430_v47  ;;  %v335_v51 = vadd.f32 %v334_v48, %v332_v46 }
  0xf5   :  { %v400_v52 = vpack.c.bf16 %v298_v50, %v295_v42  ;;  %v323_v53 = vadd.f32 %v322_v49, %v298_v50  ;;  %v333_v54 = vmul.f32 %v298_v50, %v298_v50 }
  0xf7   :  { %402 = vst [vmem:[%s572_s2 + $0x8] sm:$0xff] %v400_v52   ;;  %v324_v55 = vrot.slane %v323_v53, 4  ;;  %v336_v56 = vadd.f32 %v335_v51, %v333_v54 }
  0xf9   :  { %v325_v57 = vadd.f32 %v324_v55, %v323_v53  ;;  %v337_v58 = vrot.slane %v336_v56, 4 }
  0xfb   :  { %v326_v60 = vrot.slane %v325_v57, 2  ;;  %v338_v61 = vadd.f32 %v337_v58, %v336_v56 }
  0xfd   :  { %v327_v62 = vadd.f32 %v326_v60, %v325_v57  ;;  %v339_v63 = vrot.slane %v338_v61, 2 }
  0xff   :  { %v340_v1 = vadd.f32 %v339_v63, %v338_v61  ;;  %v328_v2 = vrot.slane %v327_v62, 1 }
 0x101   :  { %v341_v3 = vrot.slane %v340_v1, 1  ;;  %v329_v5 = vadd.f32 %v328_v2, %v327_v62 }
 0x103   :  { %v342_v4 = vadd.f32 %v341_v3, %v340_v1 }
 0x105   :  { %v347_v6 = vsel %vm346_vm1, %v342_v4, 0.0 }
 0x106   :  { %v348_v7 = vsel %vm345_vm2, %v329_v5, %v347_v6 }
 0x107   :  { %349 = vst [vmem:[%s573_s3] sm:$0xff] %v348_v7 }

// kernel: resnet_forward.52
= control target key start
LH: loop header
LB: loop body
LE: loop exit
PB: predicated region body
PF: predicated region fallthrough
CT: control target
= control target key end

     0   :  { %s76_s0 = inlined_call_operand.vmem [shape: bf16[8,256], index: 0, kind: input, shape index: {}]   ;;  %s77_s1 = inlined_call_operand.vmem [shape: f32[1,128], index: 1, kind: input, shape index: {}]   ;;  %s78_s2 = inlined_call_operand.vmem [shape: f32[1,128], index: 2, kind: input, shape index: {}]   ;;  %s79_s3 = inlined_call_operand.vmem [shape: bf16[8,128], index: 3, kind: output, shape index: {}]  }
   0x1   :  { %v41_v0 = vld [vmem:[%s76_s0 + $0x4] sm:$0xf]  ;;  %v42_v1 = vld [vmem:[%s77_s1] ss:$0 sm:$0xff] }
   0x2   :  { %v18_v2 = vunpack.c.l.bf16 %v41_v0  ;;  %v43_v3 = vld [vmem:[%s78_s2] ss:$0 sm:$0xff] }
   0x4   :  { %v26_v4 = vmul.f32 %v42_v1, %v18_v2 }
   0x6   :  { %v34_v5 = vadd.f32 %v43_v3, %v26_v4 }
   0x8   :  { %v35_v6 = vpack.c.bf16 %v34_v5, %v34_v5 }
   0xa   :  { %36 = vst [vmem:[%s79_s3] sm:$0xf] %v35_v6 }

// kernel: resnet_forward.51
= control target key start
LH: loop header
LB: loop body
LE: loop exit
PB: predicated region body
PF: predicated region fallthrough
CT: control target
= control target key end

     0   :  { %s73_s0 = inlined_call_operand.vmem [shape: bf16[8,256], index: 0, kind: input, shape index: {}]   ;;  %s74_s1 = inlined_call_operand.vmem [shape: f32[1,128], index: 1, kind: input, shape index: {}]   ;;  %s75_s2 = inlined_call_operand.vmem [shape: f32[1,128], index: 2, kind: input, shape index: {}]   ;;  %s76_s3 = inlined_call_operand.vmem [shape: bf16[8,128], index: 3, kind: output, shape index: {}]  }
   0x1   :  { %v14_v0 = vld [vmem:[%s73_s0] sm:$0xf] }
   0x2   :  { %v39_v1 = vld [vmem:[%s74_s1] ss:$0 sm:$0xff]  ;;  %v15_v2 = vunpack.c.l.bf16 %v14_v0 }
   0x3   :  { %v40_v3 = vld [vmem:[%s75_s2] ss:$0 sm:$0xff] }
   0x4   :  { %v23_v4 = vmul.f32 %v39_v1, %v15_v2 }
   0x6   :  { %v31_v5 = vadd.f32 %v40_v3, %v23_v4 }
   0x8   :  { %v32_v6 = vmax.f32 %v31_v5, 0.0 }
   0xa   :  { %v33_v7 = vpack.c.bf16 %v32_v6, %v32_v6 }
   0xc   :  { %34 = vst [vmem:[%s76_s3] sm:$0xf] %v33_v7 }

// kernel: resnet_forward.50
= control target key start
LH: loop header
LB: loop body
LE: loop exit
PB: predicated region body
PF: predicated region fallthrough
CT: control target
= control target key end

     0   :  { %v481_v1 = vmov 0   ;;  %vm242_vm0 = vcmask 261120   ;;  %v363_v56 = vlaneseq  ;;  %s625_s1 = inlined_call_operand.vmem [shape: bf16[288,256], index: 1, kind: input, shape index: {}]   ;;  %s626_s0 = inlined_call_operand.vmem [shape: bf16[8,288], index: 0, kind: input, shape index: {}]   ;;  %s627_s2 = inlined_call_operand.vmem [shape: bf16[8,256], index: 2, kind: output, shape index: {0}]   ;;  %s628_s3 = inlined_call_operand.vmem [shape: f32[8,256], index: 3, kind: output, shape index: {1}]  }
   0x1   :  { %v424_v0 = vld [vmem:[%s625_s1 + $0x74] ss:$8 sps:$4 sm:$0xff]   ;;  %319 = vmatprep.mubr.bf16.mxu1 %v481_v1  ;;  %v426_v2 = vld [vmem:[%s625_s1 + $0x70] ss:$8 sps:$4 sm:$0xff]   ;;  %v427_v3 = vld [vmem:[%s625_s1 + $0x64] ss:$8 sps:$4 sm:$0xff]  }
   0x2   :  { %246 = vmatprep.subr.bf16.mxu0 %v424_v0  ;;  %v429_v4 = vld [vmem:[%s625_s1 + $0x60] ss:$8 sps:$4 sm:$0xff]   ;;  %v430_v5 = vld [vmem:[%s625_s1 + $0x54] ss:$8 sps:$4 sm:$0xff]   ;;  %v432_v6 = vld [vmem:[%s625_s1 + $0x50] ss:$8 sps:$4 sm:$0xff]  }
   0x3   :  { %247 = vmatpush1.bf16.msra.mxu0 %v426_v2  ;;  %v433_v7 = vld [vmem:[%s625_s1 + $0x44] ss:$8 sps:$4 sm:$0xff]   ;;  %v435_v8 = vld [vmem:[%s625_s1 + $0x40] ss:$8 sps:$4 sm:$0xff]   ;;  %v436_v9 = vld [vmem:[%s625_s1 + $0x34] ss:$8 sps:$4 sm:$0xff]  }
   0x4   :  { %248 = vmatprep.subr.bf16.mxu0 %v427_v3  ;;  %v438_v10 = vld [vmem:[%s625_s1 + $0x30] ss:$8 sps:$4 sm:$0xff]   ;;  %v439_v11 = vld [vmem:[%s625_s1 + $0x24] ss:$8 sps:$4 sm:$0xff]   ;;  %v463_v12 = vld [vmem:[%s625_s1 + $0x114] ss:$8 sps:$4 sm:$0xff]  }
   0x5   :  { %v465_v13 = vld [vmem:[%s625_s1 + $0x110] ss:$8 sps:$4 sm:$0xff]   ;;  %v441_v14 = vld [vmem:[%s625_s1 + $0x20] ss:$8 sps:$4 sm:$0xff]   ;;  %v442_v15 = vld [vmem:[%s625_s1 + $0x14] ss:$8 sps:$4 sm:$0xff]   ;;  %299 = vmatprep.subr.bf16.mxu1 %v463_v12 }
   0x6   :  { %v469_v16 = vld [vmem:[%s625_s1 + $0x104] ss:$8 sps:$4 sm:$0xff]   ;;  %300 = vmatpush1.bf16.msra.mxu1 %v465_v13  ;;  %v471_v17 = vld [vmem:[%s625_s1 + $0x100] ss:$8 sps:$4 sm:$0xff]   ;;  %v444_v18 = vld [vmem:[%s625_s1 + $0x10] ss:$8 sps:$4 sm:$0xff]  }
   0x7   :  { %249 = vmatpush1.bf16.msra.mxu0 %v429_v4  ;;  %301 = vmatprep.subr.bf16.mxu1 %v469_v16  ;;  %v445_v19 = vld [vmem:[%s625_s1 + $0x4] ss:$8 sps:$4 sm:$0xff]   ;;  %v475_v20 = vld [vmem:[%s626_s0 + $0x8] ss:$0 sps:$4 sm:$0xff]   ;;  %v448_v24 = vld [vmem:[%s625_s1 + $0xf4] ss:$8 sps:$4 sm:$0xff]  }
   0x8   :  { %250 = vmatprep.subr.bf16.mxu0 %v430_v5  ;;  %v14_v21 = vld [vmem:[%s626_s0] sm:$0xff]  ;;  %v450_v25 = vld [vmem:[%s625_s1 + $0xf0] ss:$8 sps:$4 sm:$0xff]   ;;  %v454_v28 = vld [vmem:[%s625_s1 + $0xd4] ss:$8 sps:$4 sm:$0xff]   ;;  %v364_v2 = vshrl.u32 %v363_v56, 7 }
   0x9   :  { %v382_v22 = vcombine.high %v14_v21, %v14_v21  ;;  %v447_v23 = vld [vmem:[%s625_s1] ss:$8 sps:$4 sm:$0xff]   ;;  %v451_v26 = vld [vmem:[%s625_s1 + $0xe4] ss:$8 sps:$4 sm:$0xff]   ;;  %v456_v29 = vld [vmem:[%s625_s1 + $0xd0] ss:$8 sps:$4 sm:$0xff]   ;;  %v381_v40 = vcombine.low %v14_v21, %v14_v21 }
   0xa   :  { %302 = vmatpush1.bf16.msra.mxu1 %v471_v17  ;;  %v453_v27 = vld [vmem:[%s625_s1 + $0xe0] ss:$8 sps:$4 sm:$0xff]   ;;  %v457_v30 = vld [vmem:[%s625_s1 + $0xc4] ss:$8 sps:$4 sm:$0xff]   ;;  %v460_v32 = vld [vmem:[%s625_s1 + $0xb4] ss:$8 sps:$4 sm:$0xff]  }
   0xb   :  { %251 = vmatpush1.bf16.msra.mxu0 %v432_v6  ;;  %278 = vmatprep.mubr.bf16.mxu0 %v382_v22  ;;  %v459_v31 = vld [vmem:[%s625_s1 + $0xc0] ss:$8 sps:$4 sm:$0xff]   ;;  %v462_v33 = vld [vmem:[%s625_s1 + $0xb0] ss:$8 sps:$4 sm:$0xff]   ;;  %v466_v34 = vld [vmem:[%s625_s1 + $0xa4] ss:$8 sps:$4 sm:$0xff]  }
   0xc   :  { %252 = vmatprep.subr.bf16.mxu0 %v433_v7  ;;  %v468_v35 = vld [vmem:[%s625_s1 + $0xa0] ss:$8 sps:$4 sm:$0xff]   ;;  %v472_v36 = vld [vmem:[%s625_s1 + $0x94] ss:$8 sps:$4 sm:$0xff]   ;;  %v474_v37 = vld [vmem:[%s625_s1 + $0x90] ss:$8 sps:$4 sm:$0xff]  }
   0xd   :  { %420 = vmatmul.mubr.msk.bf16.vlgmr.msra.gmra.mxu1 %vm242_vm0, %v475_v20  ;;  %v476_v38 = vld [vmem:[%s625_s1 + $0x84] ss:$8 sps:$4 sm:$0xff]   ;;  %v478_v39 = vld [vmem:[%s625_s1 + $0x80] ss:$8 sps:$4 sm:$0xff]   ;;  %vm366_vm1 = vcmp.eq.s32.totalorder %v364_v2, 1  ;;  %vm365_vm2 = vcmp.eq.s32.totalorder %v364_v2, 0 }
   0xf   :  { %253 = vmatpush1.bf16.msra.mxu0 %v435_v8 }
  0x10   :  { %254 = vmatprep.subr.bf16.mxu0 %v436_v9 }
  0x13   :  { %255 = vmatpush1.bf16.msra.mxu0 %v438_v10 }
  0x14   :  { %256 = vmatprep.subr.bf16.mxu0 %v439_v11 }
  0x17   :  { %257 = vmatpush1.bf16.msra.mxu0 %v441_v14 }
  0x18   :  { %258 = vmatprep.subr.bf16.mxu0 %v442_v15 }
  0x1b   :  { %259 = vmatpush1.bf16.msra.mxu0 %v444_v18 }
  0x1c   :  { %260 = vmatprep.subr.bf16.mxu0 %v445_v19 }
  0x1f   :  { %261 = vmatpush1.bf16.msra.mxu0 %v447_v23 }
  0x20   :  { %262 = vmatprep.subr.bf16.mxu0 %v448_v24 }
  0x23   :  { %263 = vmatpush2.bf16.msra.mxu0 %v450_v25 }
  0x24   :  { %264 = vmatprep.subr.bf16.mxu0 %v451_v26 }
  0x27   :  { %265 = vmatpush2.bf16.msra.mxu0 %v453_v27 }
  0x28   :  { %266 = vmatprep.subr.bf16.mxu0 %v454_v28 }
  0x2b   :  { %267 = vmatpush2.bf16.msra.mxu0 %v456_v29 }
  0x2c   :  { %268 = vmatprep.subr.bf16.mxu0 %v457_v30 }
  0x2f   :  { %269 = vmatpush2.bf16.msra.mxu0 %v459_v31 }
  0x30   :  { %270 = vmatprep.subr.bf16.mxu0 %v460_v32 }
  0x33   :  { %271 = vmatpush2.bf16.msra.mxu0 %v462_v33 }
  0x34   :  { %272 = vmatprep.subr.bf16.mxu0 %v466_v34 }
  0x37   :  { %273 = vmatpush2.bf16.msra.mxu0 %v468_v35 }
  0x38   :  { %274 = vmatprep.subr.bf16.mxu0 %v472_v36 }
  0x3b   :  { %275 = vmatpush2.bf16.msra.mxu0 %v474_v37 }
  0x3c   :  { %276 = vmatprep.subr.bf16.mxu0 %v476_v38 }
  0x3f   :  { %277 = vmatpush2.bf16.msra.mxu0 %v478_v39 }
  0x42   :  { %279 = vmatmul.mubr.bf16.vlgmr.msra.gmra.mxu0 %v381_v40 }
  0xcd   :  { %v321_v41 = vpop.f32.mrf.mxu1 }
  0xcf   :  { %v323_v42 = vpop.f32.mrf.mxu1 }
  0xd1   :  { %v325_v43 = vpop.f32.mrf.mxu1 }
  0xd3   :  { %v326_v44 = vpop.f32.mrf.mxu1 }
 0x102   :  { %v280_v45 = vpop.f32.mrf.mxu0 }
 0x103   :  { %v322_v46 = vadd.f32 %v321_v41, %v280_v45 }
 0x104   :  { %v282_v47 = vpop.f32.mrf.mxu0 }
 0x105   :  { %v337_v48 = vrot.slane %v322_v46, 4  ;;  %v349_v49 = vmul.f32 %v322_v46, %v322_v46  ;;  %v324_v50 = vadd.f32 %v323_v42, %v282_v47 }
 0x106   :  { %v284_v51 = vpop.f32.mrf.mxu0 }
 0x107   :  { %v338_v52 = vadd.f32 %v337_v48, %v322_v46  ;;  %v351_v53 = vrot.slane %v349_v49, 4  ;;  %v422_v54 = vpack.c.bf16 %v324_v50, %v322_v46  ;;  %v343_v55 = vrot.slane %v324_v50, 4 }
 0x108   :  { %v350_v57 = vmul.f32 %v324_v50, %v324_v50  ;;  %v285_v58 = vpop.f32.mrf.mxu0 }
 0x109   :  { %v339_v59 = vrot.slane %v338_v52, 2  ;;  %v352_v60 = vadd.f32 %v351_v53, %v349_v49  ;;  %336 = vst [vmem:[%s627_s2] sm:$0xff] %v422_v54  ;;  %v344_v61 = vadd.f32 %v343_v55, %v324_v50 }
 0x10a   :  { %v357_v62 = vrot.slane %v350_v57, 4 }
 0x10b   :  { %v340_v63 = vadd.f32 %v339_v59, %v338_v52  ;;  %v353_v0 = vrot.slane %v352_v60, 2  ;;  %v345_v1 = vrot.slane %v344_v61, 2 }
 0x10c   :  { %v358_v3 = vadd.f32 %v357_v62, %v350_v57 }
 0x10d   :  { %v354_v4 = vadd.f32 %v353_v0, %v352_v60  ;;  %v346_v5 = vadd.f32 %v345_v1, %v344_v61  ;;  %v341_v6 = vrot.slane %v340_v63, 1 }
 0x10e   :  { %v359_v7 = vrot.slane %v358_v3, 2 }
 0x10f   :  { %v355_v8 = vrot.slane %v354_v4, 1  ;;  %v347_v11 = vrot.slane %v346_v5, 1  ;;  %v342_v12 = vadd.f32 %v341_v6, %v340_v63 }
 0x110   :  { %v360_v9 = vadd.f32 %v359_v7, %v358_v3 }
 0x111   :  { %v356_v10 = vadd.f32 %v355_v8, %v354_v4  ;;  %v348_v17 = vadd.f32 %v347_v11, %v346_v5 }
 0x112   :  { %v361_v13 = vrot.slane %v360_v9, 1 }
 0x113   :  { %v367_v14 = vsel %vm366_vm1, %v356_v10, 0.0 }
 0x114   :  { %v369_v15 = vsel %vm365_vm2, %v342_v12, %v367_v14  ;;  %v362_v16 = vadd.f32 %v361_v13, %v360_v9 }
 0x115   :  { %371 = vst [vmem:[%s628_s3] sm:$0xff] %v369_v15 }
 0x116   :  { %v368_v18 = vsel %vm366_vm1, %v362_v16, 0.0 }
 0x117   :  { %v370_v19 = vsel %vm365_vm2, %v348_v17, %v368_v18 }
 0x118   :  { %372 = vst [vmem:[%s628_s3 + $0x8] sm:$0xff] %v370_v19 }

// kernel: resnet_forward.54
= control target key start
LH: loop header
LB: loop body
LE: loop exit
PB: predicated region body
PF: predicated region fallthrough
CT: control target
= control target key end

     0   :  { %s87_s0 = inlined_call_operand.vmem [shape: bf16[8,128], index: 0, kind: input, shape index: {}]   ;;  %s88_s1 = inlined_call_operand.vmem [shape: f32[1,128], index: 1, kind: input, shape index: {}]   ;;  %s89_s2 = inlined_call_operand.vmem [shape: f32[1,128], index: 2, kind: input, shape index: {}]   ;;  %s90_s3 = inlined_call_operand.vmem [shape: bf16[8,128], index: 3, kind: input, shape index: {}]   ;;  %s91_s4 = inlined_call_operand.vmem [shape: bf16[8,128], index: 4, kind: output, shape index: {}]  }
   0x1   :  { %v17_v0 = vld [vmem:[%s87_s0] sm:$0xf] }
   0x2   :  { %v45_v1 = vld [vmem:[%s88_s1] ss:$0 sm:$0xff]  ;;  %v18_v2 = vunpack.c.l.bf16 %v17_v0 }
   0x3   :  { %v35_v3 = vld [vmem:[%s90_s3] sm:$0xf] }
   0x4   :  { %v46_v4 = vld [vmem:[%s89_s2] ss:$0 sm:$0xff]  ;;  %v26_v5 = vmul.f32 %v45_v1, %v18_v2  ;;  %v36_v6 = vunpack.c.l.bf16 %v35_v3 }
   0x6   :  { %v34_v7 = vadd.f32 %v46_v4, %v26_v5 }
   0x8   :  { %v37_v8 = vadd.f32 %v36_v6, %v34_v7 }
   0xa   :  { %v38_v9 = vmax.f32 %v37_v8, 0.0 }
   0xc   :  { %v39_v10 = vpack.c.bf16 %v38_v9, %v38_v9 }
   0xe   :  { %40 = vst [vmem:[%s91_s4] sm:$0xf] %v39_v10 }

// kernel: resnet_forward.53
= control target key start
LH: loop header
LB: loop body
LE: loop exit
PB: predicated region body
PF: predicated region fallthrough
CT: control target
= control target key end

     0   :  { %v622_v36 = vmov 0.0   ;;  %vm623_vm0 = vmmov 0   ;;  %vm322_vm1 = vcmask 523264   ;;  %s767_s1 = inlined_call_operand.vmem [shape: bf16[576,128], index: 1, kind: input, shape index: {}]   ;;  %s768_s0 = inlined_call_operand.vmem [shape: bf16[8,576], index: 0, kind: input, shape index: {}]   ;;  %s769_s2 = inlined_call_operand.vmem [shape: bf16[8,128], index: 2, kind: output, shape index: {0}]   ;;  %s770_s3 = inlined_call_operand.vmem [shape: f32[8,128], index: 3, kind: output, shape index: {1}]  }
   0x1   :  { %v581_v0 = vld [vmem:[%s767_s1 + $0x78] sm:$0xff]   ;;  %v585_v4 = vld [vmem:[%s767_s1 + $0x70] sm:$0xff]   ;;  %v589_v8 = vld [vmem:[%s767_s1 + $0x68] sm:$0xff]  }
   0x2   :  { %v582_v1 = vld [vmem:[%s767_s1 + $0xf8] sm:$0xff]   ;;  %518 = vmatprep.subr.bf16.mxu0 %v581_v0  ;;  %v586_v5 = vld [vmem:[%s767_s1 + $0xf0] sm:$0xff]   ;;  %v590_v9 = vld [vmem:[%s767_s1 + $0xe8] sm:$0xff]   ;;  %v461_v0 = vlaneseq }
   0x3   :  { %v583_v2 = vld [vmem:[%s767_s1 + $0x38] sm:$0xff]   ;;  %540 = vmatprep.subr.bf16.mxu1 %v582_v1  ;;  %v587_v6 = vld [vmem:[%s767_s1 + $0x30] sm:$0xff]   ;;  %v591_v10 = vld [vmem:[%s767_s1 + $0x28] sm:$0xff]  }
   0x4   :  { %v584_v3 = vld [vmem:[%s767_s1 + $0xb8] sm:$0xff]   ;;  %519 = vmatpush3.bf16.msra.mxu0 %v583_v2  ;;  %v588_v7 = vld [vmem:[%s767_s1 + $0xb0] sm:$0xff]   ;;  %v592_v11 = vld [vmem:[%s767_s1 + $0xa8] sm:$0xff]  }
   0x5   :  { %541 = vmatpush3.bf16.msra.mxu1 %v584_v3  ;;  %520 = vmatprep.subr.bf16.mxu0 %v585_v4  ;;  %v593_v12 = vld [vmem:[%s767_s1 + $0x60] sm:$0xff]   ;;  %v597_v16 = vld [vmem:[%s767_s1 + $0x58] sm:$0xff]   ;;  %v601_v20 = vld [vmem:[%s767_s1 + $0x50] sm:$0xff]  }
   0x6   :  { %542 = vmatprep.subr.bf16.mxu1 %v586_v5  ;;  %v594_v13 = vld [vmem:[%s767_s1 + $0xe0] sm:$0xff]   ;;  %v598_v17 = vld [vmem:[%s767_s1 + $0xd8] sm:$0xff]   ;;  %v602_v21 = vld [vmem:[%s767_s1 + $0xd0] sm:$0xff]  }
   0x7   :  { %v595_v14 = vld [vmem:[%s767_s1 + $0x20] sm:$0xff]   ;;  %v599_v18 = vld [vmem:[%s767_s1 + $0x18] sm:$0xff]   ;;  %v603_v22 = vld [vmem:[%s767_s1 + $0x10] sm:$0xff]  }
   0x8   :  { %521 = vmatpush3.bf16.msra.mxu0 %v587_v6  ;;  %v596_v15 = vld [vmem:[%s767_s1 + $0xa0] sm:$0xff]   ;;  %v600_v19 = vld [vmem:[%s767_s1 + $0x98] sm:$0xff]   ;;  %v604_v23 = vld [vmem:[%s767_s1 + $0x90] sm:$0xff]   ;;  %v462_v6 = vshrl.u32 %v461_v0, 7 }
   0x9   :  { %543 = vmatpush3.bf16.msra.mxu1 %v588_v7  ;;  %522 = vmatprep.subr.bf16.mxu0 %v589_v8  ;;  %v605_v24 = vld [vmem:[%s767_s1 + $0x48] sm:$0xff]   ;;  %v609_v28 = vld [vmem:[%s767_s1 + $0x40] sm:$0xff]   ;;  %v618_v39 = vld [vmem:[%s767_s1 + $0x118] sm:$0xff]  }
   0xa   :  { %544 = vmatprep.subr.bf16.mxu1 %v590_v9  ;;  %v606_v25 = vld [vmem:[%s767_s1 + $0xc8] sm:$0xff]   ;;  %v610_v29 = vld [vmem:[%s767_s1 + $0xc0] sm:$0xff]   ;;  %v619_v40 = vld [vmem:[%s767_s1 + $0x110] sm:$0xff]   ;;  %vm464_vm2 = vcmp.eq.s32.totalorder %v462_v6, 1  ;;  %vm463_vm3 = vcmp.eq.s32.totalorder %v462_v6, 0 }
   0xb   :  { %v607_v26 = vld [vmem:[%s767_s1 + $0x8] sm:$0xff]   ;;  %v611_v30 = vld [vmem:[%s767_s1] sm:$0xff]   ;;  %v615_v43 = vld [vmem:[%s768_s0 + $0x10] ss:$0 sps:$4 sm:$0xff]  }
   0xc   :  { %523 = vmatpush3.bf16.msra.mxu0 %v591_v10  ;;  %v608_v27 = vld [vmem:[%s767_s1 + $0x88] sm:$0xff]   ;;  %v612_v31 = vld [vmem:[%s767_s1 + $0x80] sm:$0xff]  }
   0xd   :  { %545 = vmatpush3.bf16.msra.mxu1 %v592_v11  ;;  %524 = vmatprep.subr.bf16.mxu0 %v593_v12  ;;  %v14_v32 = vld [vmem:[%s768_s0] sm:$0xff]  ;;  %v15_v35 = vld [vmem:[%s768_s0 + $0x8] sm:$0xff] }
   0xe   :  { %546 = vmatprep.subr.bf16.mxu1 %v594_v13  ;;  %v476_v33 = vcombine.low %v14_v32, %v14_v32  ;;  %v477_v34 = vcombine.high %v14_v32, %v14_v32  ;;  %v478_v37 = vcombine.low %v15_v35, %v15_v35  ;;  %v479_v38 = vcombine.high %v15_v35, %v15_v35  ;;  %v620_v41 = vld [vmem:[%s767_s1 + $0x108] sm:$0xff]   ;;  %v621_v42 = vld [vmem:[%s767_s1 + $0x100] sm:$0xff]  }
  0x10   :  { %525 = vmatpush3.bf16.msra.mxu0 %v595_v14  ;;  %358 = vmatprep.mubr.bf16.mxu0 %v477_v34 }
  0x11   :  { %547 = vmatpush3.bf16.msra.mxu1 %v596_v15  ;;  %526 = vmatprep.subr.bf16.mxu0 %v597_v16 }
  0x12   :  { %548 = vmatprep.subr.bf16.mxu1 %v598_v17  ;;  %398 = vmatprep.mubr.bf16.mxu1 %v479_v38 }
  0x14   :  { %527 = vmatpush3.bf16.msra.mxu0 %v599_v18 }
  0x15   :  { %549 = vmatpush3.bf16.msra.mxu1 %v600_v19  ;;  %528 = vmatprep.subr.bf16.mxu0 %v601_v20 }
  0x16   :  { %550 = vmatprep.subr.bf16.mxu1 %v602_v21 }
  0x18   :  { %529 = vmatpush3.bf16.msra.mxu0 %v603_v22 }
  0x19   :  { %551 = vmatpush3.bf16.msra.mxu1 %v604_v23  ;;  %530 = vmatprep.subr.bf16.mxu0 %v605_v24 }
  0x1a   :  { %552 = vmatprep.subr.bf16.mxu1 %v606_v25 }
  0x1c   :  { %531 = vmatpush3.bf16.msra.mxu0 %v607_v26 }
  0x1d   :  { %553 = vmatpush3.bf16.msra.mxu1 %v608_v27  ;;  %532 = vmatprep.subr.bf16.mxu0 %v609_v28 }
  0x1e   :  { %554 = vmatprep.subr.bf16.mxu1 %v610_v29 }
  0x20   :  { %533 = vmatpush3.bf16.msra.mxu0 %v611_v30 }
  0x21   :  { %555 = vmatpush3.bf16.msra.mxu1 %v612_v31  ;;  %567 = vmatprep.subr.bf16.mxu0 %v622_v36 }
  0x23   :  { %359 = vmatmul.mubr.bf16.vlgmr.msra.gmra.mxu0 %v476_v33 }
  0x24   :  { %399 = vmatmul.mubr.bf16.vlgmr.msra.gmra.mxu1 %v478_v37  ;;  %568 = vmatpush3.bf16.msra.mxu0 %v618_v39 }
  0x25   :  { %569 = vmatprep.subr.bf16.mxu0 %v622_v36  ;;  %575 = vmatprep.mubr.msk.bf16.mxu0 %vm623_vm0, %v622_v36 }
  0x28   :  { %570 = vmatpush3.bf16.msra.mxu0 %v619_v40 }
  0x29   :  { %571 = vmatprep.subr.bf16.mxu0 %v622_v36 }
  0x2c   :  { %572 = vmatpush3.bf16.msra.mxu0 %v620_v41 }
  0x2d   :  { %573 = vmatprep.subr.bf16.mxu0 %v622_v36 }
  0x30   :  { %574 = vmatpush3.bf16.msra.mxu0 %v621_v42 }
  0x33   :  { %576 = vmatmul.mubr.msk.bf16.vlgmr.msra.gmra.mxu0 %vm322_vm1, %v615_v43 }
  0xe3   :  { %v534_v44 = vpop.f32.mrf.mxu0 }
  0xe4   :  { %v556_v45 = vpop.f32.mrf.mxu1 }
  0xe5   :  { %v535_v46 = vpop.f32.mrf.mxu0 }
  0xe6   :  { %v557_v47 = vpop.f32.mrf.mxu1  ;;  %v536_v52 = vadd.f32 %v535_v46, %v534_v44 }
  0xe7   :  { %v537_v48 = vpop.f32.mrf.mxu0  ;;  %v558_v53 = vadd.f32 %v557_v47, %v556_v45 }
  0xe8   :  { %v559_v49 = vpop.f32.mrf.mxu1 }
  0xe9   :  { %v538_v50 = vpop.f32.mrf.mxu0  ;;  %v401_v54 = vadd.f32 %v558_v53, %v536_v52 }
  0xea   :  { %v560_v51 = vpop.f32.mrf.mxu1 }
  0xf3   :  { %v440_v55 = vpop.f32.mrf.mxu0 }
  0xf4   :  { %v441_v56 = vadd.f32 %v440_v55, %v401_v54 }
  0xf5   :  { %v577_v57 = vpop.f32.mrf.mxu0 }
  0xf6   :  { %v446_v58 = vpack.c.bf16 %v441_v56, %v441_v56  ;;  %v448_v59 = vrot.slane %v441_v56, 4  ;;  %v454_v60 = vmul.f32 %v441_v56, %v441_v56 }
  0xf7   :  { %v443_v61 = vpop.f32.mrf.mxu0 }
  0xf8   :  { %447 = vst [vmem:[%s769_s2] sm:$0xf] %v446_v58  ;;  %v449_v62 = vadd.f32 %v448_v59, %v441_v56  ;;  %v455_v63 = vrot.slane %v454_v60, 4 }
  0xf9   :  { %v578_v1 = vpop.f32.mrf.mxu0 }
  0xfa   :  { %v450_v2 = vrot.slane %v449_v62, 2  ;;  %v456_v3 = vadd.f32 %v455_v63, %v454_v60 }
  0xfc   :  { %v451_v4 = vadd.f32 %v450_v2, %v449_v62  ;;  %v457_v5 = vrot.slane %v456_v3, 2 }
  0xfe   :  { %v458_v7 = vadd.f32 %v457_v5, %v456_v3  ;;  %v452_v8 = vrot.slane %v451_v4, 1 }
 0x100   :  { %v459_v9 = vrot.slane %v458_v7, 1  ;;  %v453_v11 = vadd.f32 %v452_v8, %v451_v4 }
 0x102   :  { %v460_v10 = vadd.f32 %v459_v9, %v458_v7 }
 0x104   :  { %v465_v12 = vsel %vm464_vm2, %v460_v10, 0.0 }
 0x105   :  { %v466_v13 = vsel %vm463_vm3, %v453_v11, %v465_v12 }
 0x106   :  { %467 = vst [vmem:[%s770_s3] sm:$0xff] %v466_v13 }

// kernel: resnet_forward.55
= control target key start
LH: loop header
LB: loop body
LE: loop exit
PB: predicated region body
PF: predicated region fallthrough
CT: control target
= control target key end

     0   :  { %vm466_vm0 = vcmask 523264   ;;  %s1095_s1 = inlined_call_operand.vmem [shape: bf16[576,256], index: 1, kind: input, shape index: {}]   ;;  %s1096_s0 = inlined_call_operand.vmem [shape: bf16[8,576], index: 0, kind: input, shape index: {}]   ;;  %s1097_s2 = inlined_call_operand.vmem [shape: bf16[8,256], index: 2, kind: output, shape index: {0}]   ;;  %s1098_s3 = inlined_call_operand.vmem [shape: f32[8,256], index: 3, kind: output, shape index: {1}]  }
   0x1   :  { %v727_v0 = vld [vmem:[%s1095_s1 + $0x74] ss:$8 sps:$4 sm:$0xff]   ;;  %v731_v2 = vld [vmem:[%s1095_s1 + $0x70] ss:$8 sps:$4 sm:$0xff]   ;;  %v733_v4 = vld [vmem:[%s1095_s1 + $0x64] ss:$8 sps:$4 sm:$0xff]  }
   0x2   :  { %v729_v1 = vld [vmem:[%s1095_s1 + $0x174] ss:$8 sps:$4 sm:$0xff]   ;;  %470 = vmatprep.subr.bf16.mxu0 %v727_v0  ;;  %v732_v3 = vld [vmem:[%s1095_s1 + $0x170] ss:$8 sps:$4 sm:$0xff]   ;;  %v735_v5 = vld [vmem:[%s1095_s1 + $0x164] ss:$8 sps:$4 sm:$0xff]  }
   0x3   :  { %511 = vmatprep.subr.bf16.mxu1 %v729_v1  ;;  %471 = vmatpush1.bf16.msra.mxu0 %v731_v2  ;;  %v737_v6 = vld [vmem:[%s1095_s1 + $0x60] ss:$8 sps:$4 sm:$0xff]   ;;  %v739_v8 = vld [vmem:[%s1095_s1 + $0x54] ss:$8 sps:$4 sm:$0xff]   ;;  %v743_v10 = vld [vmem:[%s1095_s1 + $0x50] ss:$8 sps:$4 sm:$0xff]  }
   0x4   :  { %512 = vmatpush1.bf16.msra.mxu1 %v732_v3  ;;  %472 = vmatprep.subr.bf16.mxu0 %v733_v4  ;;  %v738_v7 = vld [vmem:[%s1095_s1 + $0x160] ss:$8 sps:$4 sm:$0xff]   ;;  %v741_v9 = vld [vmem:[%s1095_s1 + $0x154] ss:$8 sps:$4 sm:$0xff]   ;;  %v744_v11 = vld [vmem:[%s1095_s1 + $0x150] ss:$8 sps:$4 sm:$0xff]  }
   0x5   :  { %513 = vmatprep.subr.bf16.mxu1 %v735_v5  ;;  %v745_v12 = vld [vmem:[%s1095_s1 + $0x44] ss:$8 sps:$4 sm:$0xff]   ;;  %v749_v14 = vld [vmem:[%s1095_s1 + $0x40] ss:$8 sps:$4 sm:$0xff]   ;;  %v751_v16 = vld [vmem:[%s1095_s1 + $0x34] ss:$8 sps:$4 sm:$0xff]  }
   0x6   :  { %v747_v13 = vld [vmem:[%s1095_s1 + $0x144] ss:$8 sps:$4 sm:$0xff]   ;;  %v750_v15 = vld [vmem:[%s1095_s1 + $0x140] ss:$8 sps:$4 sm:$0xff]   ;;  %v753_v17 = vld [vmem:[%s1095_s1 + $0x134] ss:$8 sps:$4 sm:$0xff]  }
   0x7   :  { %473 = vmatpush1.bf16.msra.mxu0 %v737_v6  ;;  %v755_v18 = vld [vmem:[%s1095_s1 + $0x30] ss:$8 sps:$4 sm:$0xff]   ;;  %v757_v20 = vld [vmem:[%s1095_s1 + $0x24] ss:$8 sps:$4 sm:$0xff]   ;;  %v761_v22 = vld [vmem:[%s1095_s1 + $0x20] ss:$8 sps:$4 sm:$0xff]  }
   0x8   :  { %514 = vmatpush1.bf16.msra.mxu1 %v738_v7  ;;  %474 = vmatprep.subr.bf16.mxu0 %v739_v8  ;;  %v756_v19 = vld [vmem:[%s1095_s1 + $0x130] ss:$8 sps:$4 sm:$0xff]   ;;  %v759_v21 = vld [vmem:[%s1095_s1 + $0x124] ss:$8 sps:$4 sm:$0xff]   ;;  %v762_v23 = vld [vmem:[%s1095_s1 + $0x120] ss:$8 sps:$4 sm:$0xff]  }
   0x9   :  { %515 = vmatprep.subr.bf16.mxu1 %v741_v9  ;;  %v763_v24 = vld [vmem:[%s1095_s1 + $0x14] ss:$8 sps:$4 sm:$0xff]   ;;  %v767_v26 = vld [vmem:[%s1095_s1 + $0x10] ss:$8 sps:$4 sm:$0xff]   ;;  %v769_v28 = vld [vmem:[%s1095_s1 + $0x4] ss:$8 sps:$4 sm:$0xff]  }
   0xa   :  { %v765_v25 = vld [vmem:[%s1095_s1 + $0x114] ss:$8 sps:$4 sm:$0xff]   ;;  %v768_v27 = vld [vmem:[%s1095_s1 + $0x110] ss:$8 sps:$4 sm:$0xff]   ;;  %v771_v29 = vld [vmem:[%s1095_s1 + $0x104] ss:$8 sps:$4 sm:$0xff]  }
   0xb   :  { %475 = vmatpush1.bf16.msra.mxu0 %v743_v10  ;;  %v773_v30 = vld [vmem:[%s1095_s1] ss:$8 sps:$4 sm:$0xff]   ;;  %v775_v32 = vld [vmem:[%s1095_s1 + $0xf4] ss:$8 sps:$4 sm:$0xff]   ;;  %v779_v34 = vld [vmem:[%s1095_s1 + $0xf0] ss:$8 sps:$4 sm:$0xff]  }
   0xc   :  { %516 = vmatpush1.bf16.msra.mxu1 %v744_v11  ;;  %476 = vmatprep.subr.bf16.mxu0 %v745_v12  ;;  %v774_v31 = vld [vmem:[%s1095_s1 + $0x100] ss:$8 sps:$4 sm:$0xff]   ;;  %v777_v33 = vld [vmem:[%s1095_s1 + $0x1f4] ss:$8 sps:$4 sm:$0xff]   ;;  %v780_v35 = vld [vmem:[%s1095_s1 + $0x1f0] ss:$8 sps:$4 sm:$0xff]  }
   0xd   :  { %517 = vmatprep.subr.bf16.mxu1 %v747_v13  ;;  %v781_v36 = vld [vmem:[%s1095_s1 + $0xe4] ss:$8 sps:$4 sm:$0xff]   ;;  %v785_v38 = vld [vmem:[%s1095_s1 + $0xe0] ss:$8 sps:$4 sm:$0xff]   ;;  %v787_v40 = vld [vmem:[%s1095_s1 + $0xd4] ss:$8 sps:$4 sm:$0xff]  }
   0xe   :  { %v783_v37 = vld [vmem:[%s1095_s1 + $0x1e4] ss:$8 sps:$4 sm:$0xff]   ;;  %v786_v39 = vld [vmem:[%s1095_s1 + $0x1e0] ss:$8 sps:$4 sm:$0xff]   ;;  %v789_v41 = vld [vmem:[%s1095_s1 + $0x1d4] ss:$8 sps:$4 sm:$0xff]  }
   0xf   :  { %477 = vmatpush1.bf16.msra.mxu0 %v749_v14  ;;  %v791_v42 = vld [vmem:[%s1095_s1 + $0xd0] ss:$8 sps:$4 sm:$0xff]   ;;  %v793_v44 = vld [vmem:[%s1095_s1 + $0xc4] ss:$8 sps:$4 sm:$0xff]   ;;  %v797_v46 = vld [vmem:[%s1095_s1 + $0xc0] ss:$8 sps:$4 sm:$0xff]  }
  0x10   :  { %518 = vmatpush1.bf16.msra.mxu1 %v750_v15  ;;  %478 = vmatprep.subr.bf16.mxu0 %v751_v16  ;;  %v792_v43 = vld [vmem:[%s1095_s1 + $0x1d0] ss:$8 sps:$4 sm:$0xff]   ;;  %v795_v45 = vld [vmem:[%s1095_s1 + $0x1c4] ss:$8 sps:$4 sm:$0xff]   ;;  %v798_v48 = vld [vmem:[%s1095_s1 + $0x1c0] ss:$8 sps:$4 sm:$0xff]  }
  0x11   :  { %519 = vmatprep.subr.bf16.mxu1 %v753_v17  ;;  %v14_v47 = vld [vmem:[%s1096_s0] sm:$0xff]  ;;  %v15_v50 = vld [vmem:[%s1096_s0 + $0x8] sm:$0xff]  ;;  %v799_v51 = vld [vmem:[%s1095_s1 + $0xb4] ss:$8 sps:$4 sm:$0xff]   ;;  %v840_v10 = vmov 0  }
  0x12   :  { %v647_v49 = vcombine.high %v14_v47, %v14_v47  ;;  %v649_v52 = vcombine.high %v15_v50, %v15_v50  ;;  %v801_v53 = vld [vmem:[%s1095_s1 + $0x1b4] ss:$8 sps:$4 sm:$0xff]   ;;  %v803_v54 = vld [vmem:[%s1095_s1 + $0xb0] ss:$8 sps:$4 sm:$0xff]   ;;  %v805_v56 = vld [vmem:[%s1095_s1 + $0xa4] ss:$8 sps:$4 sm:$0xff]   ;;  %v646_v5 = vcombine.low %v14_v47, %v14_v47  ;;  %v648_v6 = vcombine.low %v15_v50, %v15_v50 }
  0x13   :  { %479 = vmatpush1.bf16.msra.mxu0 %v755_v18  ;;  %v804_v55 = vld [vmem:[%s1095_s1 + $0x1b0] ss:$8 sps:$4 sm:$0xff]   ;;  %v807_v57 = vld [vmem:[%s1095_s1 + $0x1a4] ss:$8 sps:$4 sm:$0xff]   ;;  %v809_v58 = vld [vmem:[%s1095_s1 + $0xa0] ss:$8 sps:$4 sm:$0xff]  }
  0x14   :  { %520 = vmatpush1.bf16.msra.mxu1 %v756_v19  ;;  %480 = vmatprep.subr.bf16.mxu0 %v757_v20  ;;  %v810_v59 = vld [vmem:[%s1095_s1 + $0x1a0] ss:$8 sps:$4 sm:$0xff]   ;;  %v811_v60 = vld [vmem:[%s1095_s1 + $0x94] ss:$8 sps:$4 sm:$0xff]   ;;  %v815_v62 = vld [vmem:[%s1095_s1 + $0x90] ss:$8 sps:$4 sm:$0xff]  }
  0x15   :  { %521 = vmatprep.subr.bf16.mxu1 %v759_v21  ;;  %502 = vmatprep.mubr.bf16.mxu0 %v647_v49  ;;  %v813_v61 = vld [vmem:[%s1095_s1 + $0x194] ss:$8 sps:$4 sm:$0xff]   ;;  %v816_v63 = vld [vmem:[%s1095_s1 + $0x190] ss:$8 sps:$4 sm:$0xff]   ;;  %v817_v0 = vld [vmem:[%s1095_s1 + $0x84] ss:$8 sps:$4 sm:$0xff]  }
  0x16   :  { %543 = vmatprep.mubr.bf16.mxu1 %v649_v52  ;;  %v819_v1 = vld [vmem:[%s1095_s1 + $0x184] ss:$8 sps:$4 sm:$0xff]   ;;  %v821_v2 = vld [vmem:[%s1095_s1 + $0x80] ss:$8 sps:$4 sm:$0xff]   ;;  %v830_v4 = vld [vmem:[%s1095_s1 + $0x234] ss:$8 sps:$4 sm:$0xff]  }
  0x17   :  { %481 = vmatpush1.bf16.msra.mxu0 %v761_v22  ;;  %v822_v3 = vld [vmem:[%s1095_s1 + $0x180] ss:$8 sps:$4 sm:$0xff]   ;;  %v828_v7 = vld [vmem:[%s1095_s1 + $0x230] ss:$8 sps:$4 sm:$0xff]   ;;  %v833_v8 = vld [vmem:[%s1095_s1 + $0x224] ss:$8 sps:$4 sm:$0xff]  }
  0x18   :  { %522 = vmatpush1.bf16.msra.mxu1 %v762_v23  ;;  %482 = vmatprep.subr.bf16.mxu0 %v763_v24  ;;  %v831_v9 = vld [vmem:[%s1095_s1 + $0x220] ss:$8 sps:$4 sm:$0xff]   ;;  %v836_v11 = vld [vmem:[%s1095_s1 + $0x214] ss:$8 sps:$4 sm:$0xff]   ;;  %v834_v12 = vld [vmem:[%s1095_s1 + $0x210] ss:$8 sps:$4 sm:$0xff]  }
  0x19   :  { %523 = vmatprep.subr.bf16.mxu1 %v765_v25  ;;  %v839_v13 = vld [vmem:[%s1095_s1 + $0x204] ss:$8 sps:$4 sm:$0xff]   ;;  %v837_v14 = vld [vmem:[%s1095_s1 + $0x200] ss:$8 sps:$4 sm:$0xff]   ;;  %v825_v15 = vld [vmem:[%s1096_s0 + $0x10] ss:$0 sps:$4 sm:$0xff]  }
  0x1b   :  { %483 = vmatpush1.bf16.msra.mxu0 %v767_v26 }
  0x1c   :  { %524 = vmatpush1.bf16.msra.mxu1 %v768_v27  ;;  %484 = vmatprep.subr.bf16.mxu0 %v769_v28 }
  0x1d   :  { %525 = vmatprep.subr.bf16.mxu1 %v771_v29 }
  0x1f   :  { %485 = vmatpush1.bf16.msra.mxu0 %v773_v30 }
  0x20   :  { %526 = vmatpush1.bf16.msra.mxu1 %v774_v31  ;;  %486 = vmatprep.subr.bf16.mxu0 %v775_v32 }
  0x21   :  { %527 = vmatprep.subr.bf16.mxu1 %v777_v33 }
  0x23   :  { %487 = vmatpush2.bf16.msra.mxu0 %v779_v34 }
  0x24   :  { %528 = vmatpush2.bf16.msra.mxu1 %v780_v35  ;;  %488 = vmatprep.subr.bf16.mxu0 %v781_v36 }
  0x25   :  { %529 = vmatprep.subr.bf16.mxu1 %v783_v37  ;;  %v628_v37 = vlaneseq }
  0x27   :  { %489 = vmatpush2.bf16.msra.mxu0 %v785_v38  ;;  %v629_v47 = vshrl.u32 %v628_v37, 7 }
  0x28   :  { %530 = vmatpush2.bf16.msra.mxu1 %v786_v39  ;;  %490 = vmatprep.subr.bf16.mxu0 %v787_v40 }
  0x29   :  { %531 = vmatprep.subr.bf16.mxu1 %v789_v41  ;;  %vm631_vm1 = vcmp.eq.s32.totalorder %v629_v47, 1  ;;  %vm630_vm2 = vcmp.eq.s32.totalorder %v629_v47, 0 }
  0x2b   :  { %491 = vmatpush2.bf16.msra.mxu0 %v791_v42 }
  0x2c   :  { %532 = vmatpush2.bf16.msra.mxu1 %v792_v43  ;;  %492 = vmatprep.subr.bf16.mxu0 %v793_v44 }
  0x2d   :  { %533 = vmatprep.subr.bf16.mxu1 %v795_v45 }
  0x2f   :  { %493 = vmatpush2.bf16.msra.mxu0 %v797_v46 }
  0x30   :  { %534 = vmatpush2.bf16.msra.mxu1 %v798_v48  ;;  %494 = vmatprep.subr.bf16.mxu0 %v799_v51 }
  0x31   :  { %535 = vmatprep.subr.bf16.mxu1 %v801_v53 }
  0x33   :  { %495 = vmatpush2.bf16.msra.mxu0 %v803_v54 }
  0x34   :  { %536 = vmatpush2.bf16.msra.mxu1 %v804_v55  ;;  %496 = vmatprep.subr.bf16.mxu0 %v805_v56 }
  0x35   :  { %537 = vmatprep.subr.bf16.mxu1 %v807_v57 }
  0x37   :  { %497 = vmatpush2.bf16.msra.mxu0 %v809_v58 }
  0x38   :  { %538 = vmatpush2.bf16.msra.mxu1 %v810_v59  ;;  %498 = vmatprep.subr.bf16.mxu0 %v811_v60 }
  0x39   :  { %539 = vmatprep.subr.bf16.mxu1 %v813_v61 }
  0x3b   :  { %499 = vmatpush2.bf16.msra.mxu0 %v815_v62 }
  0x3c   :  { %540 = vmatpush2.bf16.msra.mxu1 %v816_v63  ;;  %500 = vmatprep.subr.bf16.mxu0 %v817_v0 }
  0x3d   :  { %541 = vmatprep.subr.bf16.mxu1 %v819_v1 }
  0x3f   :  { %501 = vmatpush2.bf16.msra.mxu0 %v821_v2 }
  0x40   :  { %542 = vmatpush2.bf16.msra.mxu1 %v822_v3  ;;  %560 = vmatprep.subr.bf16.mxu0 %v830_v4 }
  0x42   :  { %503 = vmatmul.mubr.bf16.vlgmr.msra.gmra.mxu0 %v646_v5 }
  0x43   :  { %544 = vmatmul.mubr.bf16.vlgmr.msra.gmra.mxu1 %v648_v6  ;;  %561 = vmatpush1.bf16.msra.mxu0 %v828_v7 }
  0x44   :  { %584 = vmatprep.mubr.bf16.mxu0 %v840_v10  ;;  %562 = vmatprep.subr.bf16.mxu0 %v833_v8 }
  0x47   :  { %563 = vmatpush1.bf16.msra.mxu0 %v831_v9 }
  0x48   :  { %564 = vmatprep.subr.bf16.mxu0 %v836_v11 }
  0x4b   :  { %565 = vmatpush1.bf16.msra.mxu0 %v834_v12 }
  0x4c   :  { %566 = vmatprep.subr.bf16.mxu0 %v839_v13 }
  0x4f   :  { %567 = vmatpush1.bf16.msra.mxu0 %v837_v14 }
  0x52   :  { %723 = vmatmul.mubr.msk.bf16.vlgmr.msra.gmra.mxu0 %vm466_vm0, %v825_v15 }
 0x102   :  { %v504_v16 = vpop.f32.mrf.mxu0 }
 0x103   :  { %v545_v17 = vpop.f32.mrf.mxu1 }
 0x104   :  { %v506_v18 = vpop.f32.mrf.mxu0  ;;  %v546_v24 = vadd.f32 %v545_v17, %v504_v16 }
 0x105   :  { %v547_v19 = vpop.f32.mrf.mxu1 }
 0x106   :  { %v508_v20 = vpop.f32.mrf.mxu0  ;;  %v548_v26 = vadd.f32 %v547_v19, %v506_v18 }
 0x107   :  { %v549_v21 = vpop.f32.mrf.mxu1 }
 0x108   :  { %v509_v22 = vpop.f32.mrf.mxu0 }
 0x109   :  { %v550_v23 = vpop.f32.mrf.mxu1 }
 0x112   :  { %v586_v25 = vpop.f32.mrf.mxu0 }
 0x113   :  { %v587_v27 = vadd.f32 %v586_v25, %v546_v24 }
 0x114   :  { %v588_v28 = vpop.f32.mrf.mxu0 }
 0x115   :  { %v602_v29 = vrot.slane %v587_v27, 4  ;;  %v614_v30 = vmul.f32 %v587_v27, %v587_v27  ;;  %v589_v31 = vadd.f32 %v588_v28, %v548_v26 }
 0x116   :  { %v590_v32 = vpop.f32.mrf.mxu0 }
 0x117   :  { %v603_v33 = vadd.f32 %v602_v29, %v587_v27  ;;  %v616_v34 = vrot.slane %v614_v30, 4  ;;  %v725_v35 = vpack.c.bf16 %v589_v31, %v587_v27  ;;  %v608_v36 = vrot.slane %v589_v31, 4 }
 0x118   :  { %v615_v38 = vmul.f32 %v589_v31, %v589_v31  ;;  %v591_v39 = vpop.f32.mrf.mxu0 }
 0x119   :  { %v604_v40 = vrot.slane %v603_v33, 2  ;;  %v617_v41 = vadd.f32 %v616_v34, %v614_v30  ;;  %601 = vst [vmem:[%s1097_s2] sm:$0xff] %v725_v35  ;;  %v609_v42 = vadd.f32 %v608_v36, %v589_v31 }
 0x11a   :  { %v622_v43 = vrot.slane %v615_v38, 4 }
 0x11b   :  { %v605_v44 = vadd.f32 %v604_v40, %v603_v33  ;;  %v618_v45 = vrot.slane %v617_v41, 2  ;;  %v610_v46 = vrot.slane %v609_v42, 2 }
 0x11c   :  { %v623_v48 = vadd.f32 %v622_v43, %v615_v38 }
 0x11d   :  { %v619_v49 = vadd.f32 %v618_v45, %v617_v41  ;;  %v611_v50 = vadd.f32 %v610_v46, %v609_v42  ;;  %v606_v51 = vrot.slane %v605_v44, 1 }
 0x11e   :  { %v624_v52 = vrot.slane %v623_v48, 2 }
 0x11f   :  { %v620_v53 = vrot.slane %v619_v49, 1  ;;  %v612_v56 = vrot.slane %v611_v50, 1  ;;  %v607_v57 = vadd.f32 %v606_v51, %v605_v44 }
 0x120   :  { %v625_v54 = vadd.f32 %v624_v52, %v623_v48 }
 0x121   :  { %v621_v55 = vadd.f32 %v620_v53, %v619_v49  ;;  %v613_v62 = vadd.f32 %v612_v56, %v611_v50 }
 0x122   :  { %v626_v58 = vrot.slane %v625_v54, 1 }
 0x123   :  { %v632_v59 = vsel %vm631_vm1, %v621_v55, 0.0 }
 0x124   :  { %v634_v60 = vsel %vm630_vm2, %v607_v57, %v632_v59  ;;  %v627_v61 = vadd.f32 %v626_v58, %v625_v54 }
 0x125   :  { %636 = vst [vmem:[%s1098_s3] sm:$0xff] %v634_v60 }
 0x126   :  { %v633_v63 = vsel %vm631_vm1, %v627_v61, 0.0 }
 0x127   :  { %v635_v0 = vsel %vm630_vm2, %v613_v62, %v633_v63 }
 0x128   :  { %637 = vst [vmem:[%s1098_s3 + $0x8] sm:$0xff] %v635_v0 }

// kernel: resnet_forward.66
= control target key start
LH: loop header
LB: loop body
LE: loop exit
PB: predicated region body
PF: predicated region fallthrough
CT: control target
= control target key end

     0   :  { %s73_s0 = inlined_call_operand.vmem [shape: bf16[8,128], index: 0, kind: input, shape index: {}]   ;;  %s74_s1 = inlined_call_operand.vmem [shape: f32[1,128], index: 1, kind: input, shape index: {}]   ;;  %s75_s2 = inlined_call_operand.vmem [shape: f32[1,128], index: 2, kind: input, shape index: {}]   ;;  %s76_s3 = inlined_call_operand.vmem [shape: bf16[8,128], index: 3, kind: output, shape index: {}]  }
   0x1   :  { %v14_v0 = vld [vmem:[%s73_s0] sm:$0xf] }
   0x2   :  { %v39_v1 = vld [vmem:[%s74_s1] ss:$0 sm:$0xff]  ;;  %v15_v2 = vunpack.c.l.bf16 %v14_v0 }
   0x3   :  { %v40_v3 = vld [vmem:[%s75_s2] ss:$0 sm:$0xff] }
   0x4   :  { %v23_v4 = vmul.f32 %v39_v1, %v15_v2 }
   0x6   :  { %v31_v5 = vadd.f32 %v40_v3, %v23_v4 }
   0x8   :  { %v32_v6 = vmax.f32 %v31_v5, 0.0 }
   0xa   :  { %v33_v7 = vpack.c.bf16 %v32_v6, %v32_v6 }
   0xc   :  { %34 = vst [vmem:[%s76_s3] sm:$0xf] %v33_v7 }

// kernel: resnet_forward.63
= control target key start
LH: loop header
LB: loop body
LE: loop exit
PB: predicated region body
PF: predicated region fallthrough
CT: control target
= control target key end

     0   :  { %vm1139_vm0 = vmmov 0   ;;  %s1397_s1 = inlined_call_operand.vmem [shape: bf16[1152,128], index: 1, kind: input, shape index: {}]   ;;  %s1398_s0 = inlined_call_operand.vmem [shape: bf16[8,1152], index: 0, kind: input, shape index: {}]   ;;  %s1399_s2 = inlined_call_operand.vmem [shape: bf16[8,128], index: 2, kind: output, shape index: {0}]   ;;  %s1400_s3 = inlined_call_operand.vmem [shape: f32[8,128], index: 3, kind: output, shape index: {1}]  }
   0x1   :  { %v1057_v0 = vld [vmem:[%s1397_s1 + $0x78] sm:$0xff]   ;;  %v1061_v4 = vld [vmem:[%s1397_s1 + $0x70] sm:$0xff]   ;;  %v1065_v8 = vld [vmem:[%s1397_s1 + $0x68] sm:$0xff]  }
   0x2   :  { %v1058_v1 = vld [vmem:[%s1397_s1 + $0xf8] sm:$0xff]   ;;  %938 = vmatprep.subr.bf16.mxu0 %v1057_v0  ;;  %v1062_v5 = vld [vmem:[%s1397_s1 + $0xf0] sm:$0xff]   ;;  %v1066_v9 = vld [vmem:[%s1397_s1 + $0xe8] sm:$0xff]  }
   0x3   :  { %v1059_v2 = vld [vmem:[%s1397_s1 + $0x38] sm:$0xff]   ;;  %960 = vmatprep.subr.bf16.mxu1 %v1058_v1  ;;  %v1063_v6 = vld [vmem:[%s1397_s1 + $0x30] sm:$0xff]   ;;  %v1067_v10 = vld [vmem:[%s1397_s1 + $0x28] sm:$0xff]  }
   0x4   :  { %v1060_v3 = vld [vmem:[%s1397_s1 + $0xb8] sm:$0xff]   ;;  %939 = vmatpush3.bf16.msra.mxu0 %v1059_v2  ;;  %v1064_v7 = vld [vmem:[%s1397_s1 + $0xb0] sm:$0xff]   ;;  %v1068_v11 = vld [vmem:[%s1397_s1 + $0xa8] sm:$0xff]  }
   0x5   :  { %961 = vmatpush3.bf16.msra.mxu1 %v1060_v3  ;;  %940 = vmatprep.subr.bf16.mxu0 %v1061_v4  ;;  %v1069_v12 = vld [vmem:[%s1397_s1 + $0x60] sm:$0xff]   ;;  %v1073_v16 = vld [vmem:[%s1397_s1 + $0x58] sm:$0xff]   ;;  %v1077_v20 = vld [vmem:[%s1397_s1 + $0x50] sm:$0xff]  }
   0x6   :  { %962 = vmatprep.subr.bf16.mxu1 %v1062_v5  ;;  %v1070_v13 = vld [vmem:[%s1397_s1 + $0xe0] sm:$0xff]   ;;  %v1074_v17 = vld [vmem:[%s1397_s1 + $0xd8] sm:$0xff]   ;;  %v1078_v21 = vld [vmem:[%s1397_s1 + $0xd0] sm:$0xff]  }
   0x7   :  { %v1071_v14 = vld [vmem:[%s1397_s1 + $0x20] sm:$0xff]   ;;  %v1075_v18 = vld [vmem:[%s1397_s1 + $0x18] sm:$0xff]   ;;  %v1079_v22 = vld [vmem:[%s1397_s1 + $0x10] sm:$0xff]  }
   0x8   :  { %941 = vmatpush3.bf16.msra.mxu0 %v1063_v6  ;;  %v1072_v15 = vld [vmem:[%s1397_s1 + $0xa0] sm:$0xff]   ;;  %v1076_v19 = vld [vmem:[%s1397_s1 + $0x98] sm:$0xff]   ;;  %v1080_v23 = vld [vmem:[%s1397_s1 + $0x90] sm:$0xff]  }
   0x9   :  { %963 = vmatpush3.bf16.msra.mxu1 %v1064_v7  ;;  %942 = vmatprep.subr.bf16.mxu0 %v1065_v8  ;;  %v1081_v24 = vld [vmem:[%s1397_s1 + $0x48] sm:$0xff]   ;;  %v1085_v28 = vld [vmem:[%s1397_s1 + $0x40] sm:$0xff]   ;;  %v1093_v38 = vld [vmem:[%s1397_s1 + $0x178] sm:$0xff]  }
   0xa   :  { %964 = vmatprep.subr.bf16.mxu1 %v1066_v9  ;;  %v1082_v25 = vld [vmem:[%s1397_s1 + $0xc8] sm:$0xff]   ;;  %v1086_v29 = vld [vmem:[%s1397_s1 + $0xc0] sm:$0xff]   ;;  %v1094_v39 = vld [vmem:[%s1397_s1 + $0x138] sm:$0xff]  }
   0xb   :  { %v1083_v26 = vld [vmem:[%s1397_s1 + $0x8] sm:$0xff]   ;;  %v1087_v30 = vld [vmem:[%s1397_s1] sm:$0xff]   ;;  %v1095_v40 = vld [vmem:[%s1397_s1 + $0x1f8] sm:$0xff]  }
   0xc   :  { %943 = vmatpush3.bf16.msra.mxu0 %v1067_v10  ;;  %v1084_v27 = vld [vmem:[%s1397_s1 + $0x88] sm:$0xff]   ;;  %v1088_v31 = vld [vmem:[%s1397_s1 + $0x80] sm:$0xff]   ;;  %v1096_v41 = vld [vmem:[%s1397_s1 + $0x1b8] sm:$0xff]  }
   0xd   :  { %965 = vmatpush3.bf16.msra.mxu1 %v1068_v11  ;;  %944 = vmatprep.subr.bf16.mxu0 %v1069_v12  ;;  %v14_v32 = vld [vmem:[%s1398_s0] sm:$0xff]  ;;  %v15_v33 = vld [vmem:[%s1398_s0 + $0x8] sm:$0xff]  ;;  %v1097_v42 = vld [vmem:[%s1397_s1 + $0x170] sm:$0xff]  }
   0xe   :  { %966 = vmatprep.subr.bf16.mxu1 %v1070_v13  ;;  %v857_v34 = vcombine.low %v14_v32, %v14_v32  ;;  %v858_v35 = vcombine.high %v14_v32, %v14_v32  ;;  %v859_v36 = vcombine.low %v15_v33, %v15_v33  ;;  %v860_v37 = vcombine.high %v15_v33, %v15_v33  ;;  %v1098_v43 = vld [vmem:[%s1397_s1 + $0x130] sm:$0xff]   ;;  %v1101_v46 = vld [vmem:[%s1397_s1 + $0x168] sm:$0xff]   ;;  %v1105_v50 = vld [vmem:[%s1397_s1 + $0x160] sm:$0xff]  }
   0xf   :  { %v1099_v44 = vld [vmem:[%s1397_s1 + $0x1f0] sm:$0xff]   ;;  %v1102_v47 = vld [vmem:[%s1397_s1 + $0x128] sm:$0xff]   ;;  %v1106_v51 = vld [vmem:[%s1397_s1 + $0x120] sm:$0xff]   ;;  %v1138_v13 = vmov 0.0  }
  0x10   :  { %945 = vmatpush3.bf16.msra.mxu0 %v1071_v14  ;;  %659 = vmatprep.mubr.bf16.mxu0 %v858_v35  ;;  %v1100_v45 = vld [vmem:[%s1397_s1 + $0x1b0] sm:$0xff]   ;;  %v1103_v48 = vld [vmem:[%s1397_s1 + $0x1e8] sm:$0xff]   ;;  %v1107_v52 = vld [vmem:[%s1397_s1 + $0x1e0] sm:$0xff]  }
  0x11   :  { %967 = vmatpush3.bf16.msra.mxu1 %v1072_v15  ;;  %946 = vmatprep.subr.bf16.mxu0 %v1073_v16  ;;  %v1104_v49 = vld [vmem:[%s1397_s1 + $0x1a8] sm:$0xff]   ;;  %v1108_v53 = vld [vmem:[%s1397_s1 + $0x1a0] sm:$0xff]   ;;  %v1109_v54 = vld [vmem:[%s1397_s1 + $0x158] sm:$0xff]  }
  0x12   :  { %968 = vmatprep.subr.bf16.mxu1 %v1074_v17  ;;  %699 = vmatprep.mubr.bf16.mxu1 %v860_v37  ;;  %v1110_v55 = vld [vmem:[%s1397_s1 + $0x118] sm:$0xff]   ;;  %v1113_v58 = vld [vmem:[%s1397_s1 + $0x150] sm:$0xff]   ;;  %v1117_v62 = vld [vmem:[%s1397_s1 + $0x148] sm:$0xff]  }
  0x13   :  { %v1111_v56 = vld [vmem:[%s1397_s1 + $0x1d8] sm:$0xff]   ;;  %v1114_v59 = vld [vmem:[%s1397_s1 + $0x110] sm:$0xff]   ;;  %v1118_v63 = vld [vmem:[%s1397_s1 + $0x108] sm:$0xff]  }
  0x14   :  { %947 = vmatpush3.bf16.msra.mxu0 %v1075_v18  ;;  %v1112_v57 = vld [vmem:[%s1397_s1 + $0x198] sm:$0xff]   ;;  %v1115_v60 = vld [vmem:[%s1397_s1 + $0x1d0] sm:$0xff]   ;;  %v1119_v0 = vld [vmem:[%s1397_s1 + $0x1c8] sm:$0xff]  }
  0x15   :  { %969 = vmatpush3.bf16.msra.mxu1 %v1076_v19  ;;  %948 = vmatprep.subr.bf16.mxu0 %v1077_v20  ;;  %v1116_v61 = vld [vmem:[%s1397_s1 + $0x190] sm:$0xff]   ;;  %v1120_v1 = vld [vmem:[%s1397_s1 + $0x188] sm:$0xff]   ;;  %v1121_v2 = vld [vmem:[%s1397_s1 + $0x140] sm:$0xff]  }
  0x16   :  { %970 = vmatprep.subr.bf16.mxu1 %v1078_v21  ;;  %v1122_v3 = vld [vmem:[%s1397_s1 + $0x100] sm:$0xff]   ;;  %v16_v5 = vld [vmem:[%s1398_s0 + $0x10] sm:$0xff]  ;;  %v17_v9 = vld [vmem:[%s1398_s0 + $0x18] sm:$0xff] }
  0x17   :  { %v1123_v4 = vld [vmem:[%s1397_s1 + $0x1c0] sm:$0xff]   ;;  %v862_v6 = vcombine.high %v16_v5, %v16_v5  ;;  %v861_v8 = vcombine.low %v16_v5, %v16_v5  ;;  %v863_v10 = vcombine.low %v17_v9, %v17_v9  ;;  %v864_v11 = vcombine.high %v17_v9, %v17_v9  ;;  %v1129_v12 = vld [vmem:[%s1397_s1 + $0x238] sm:$0xff]   ;;  %v1130_v14 = vld [vmem:[%s1397_s1 + $0x230] sm:$0xff]  }
  0x18   :  { %949 = vmatpush3.bf16.msra.mxu0 %v1079_v22  ;;  %v1126_v7 = vld [vmem:[%s1397_s1 + $0x180] sm:$0xff]   ;;  %v1131_v15 = vld [vmem:[%s1397_s1 + $0x228] sm:$0xff]   ;;  %v1133_v17 = vld [vmem:[%s1397_s1 + $0x218] sm:$0xff]  }
  0x19   :  { %971 = vmatpush3.bf16.msra.mxu1 %v1080_v23  ;;  %950 = vmatprep.subr.bf16.mxu0 %v1081_v24  ;;  %v1132_v16 = vld [vmem:[%s1397_s1 + $0x220] sm:$0xff]   ;;  %v1134_v18 = vld [vmem:[%s1397_s1 + $0x210] sm:$0xff]   ;;  %v1135_v19 = vld [vmem:[%s1397_s1 + $0x208] sm:$0xff]  }
  0x1a   :  { %972 = vmatprep.subr.bf16.mxu1 %v1082_v25  ;;  %v1136_v20 = vld [vmem:[%s1397_s1 + $0x200] sm:$0xff]  }
  0x1b   :  { %v1137_v21 = vld [vmem:[%s1398_s0 + $0x20] ss:$0 sps:$4 sm:$0xff]  }
  0x1c   :  { %951 = vmatpush3.bf16.msra.mxu0 %v1083_v26 }
  0x1d   :  { %973 = vmatpush3.bf16.msra.mxu1 %v1084_v27  ;;  %952 = vmatprep.subr.bf16.mxu0 %v1085_v28 }
  0x1e   :  { %974 = vmatprep.subr.bf16.mxu1 %v1086_v29 }
  0x20   :  { %953 = vmatpush3.bf16.msra.mxu0 %v1087_v30 }
  0x21   :  { %975 = vmatpush3.bf16.msra.mxu1 %v1088_v31  ;;  %982 = vmatprep.subr.bf16.mxu0 %v1093_v38 }
  0x22   :  { %1004 = vmatprep.subr.bf16.mxu1 %v1095_v40 }
  0x23   :  { %660 = vmatmul.mubr.bf16.vlgmr.msra.gmra.mxu0 %v857_v34 }
  0x24   :  { %700 = vmatmul.mubr.bf16.vlgmr.msra.gmra.mxu1 %v859_v36  ;;  %983 = vmatpush3.bf16.msra.mxu0 %v1094_v39 }
  0x25   :  { %1005 = vmatpush3.bf16.msra.mxu1 %v1096_v41  ;;  %984 = vmatprep.subr.bf16.mxu0 %v1097_v42 }
  0x26   :  { %1006 = vmatprep.subr.bf16.mxu1 %v1099_v44  ;;  %739 = vmatprep.mubr.bf16.mxu0 %v862_v6 }
  0x27   :  { %779 = vmatprep.mubr.bf16.mxu1 %v864_v11 }
  0x28   :  { %985 = vmatpush3.bf16.msra.mxu0 %v1098_v43 }
  0x29   :  { %1007 = vmatpush3.bf16.msra.mxu1 %v1100_v45  ;;  %986 = vmatprep.subr.bf16.mxu0 %v1101_v46 }
  0x2a   :  { %1008 = vmatprep.subr.bf16.mxu1 %v1103_v48 }
  0x2c   :  { %987 = vmatpush3.bf16.msra.mxu0 %v1102_v47 }
  0x2d   :  { %1009 = vmatpush3.bf16.msra.mxu1 %v1104_v49  ;;  %988 = vmatprep.subr.bf16.mxu0 %v1105_v50 }
  0x2e   :  { %1010 = vmatprep.subr.bf16.mxu1 %v1107_v52 }
  0x30   :  { %989 = vmatpush3.bf16.msra.mxu0 %v1106_v51 }
  0x31   :  { %1011 = vmatpush3.bf16.msra.mxu1 %v1108_v53  ;;  %990 = vmatprep.subr.bf16.mxu0 %v1109_v54  ;;  %v842_v54 = vlaneseq }
  0x32   :  { %1012 = vmatprep.subr.bf16.mxu1 %v1111_v56 }
  0x34   :  { %991 = vmatpush3.bf16.msra.mxu0 %v1110_v55 }
  0x35   :  { %1013 = vmatpush3.bf16.msra.mxu1 %v1112_v57  ;;  %992 = vmatprep.subr.bf16.mxu0 %v1113_v58 }
  0x36   :  { %1014 = vmatprep.subr.bf16.mxu1 %v1115_v60  ;;  %v843_v60 = vshrl.u32 %v842_v54, 7 }
  0x38   :  { %993 = vmatpush3.bf16.msra.mxu0 %v1114_v59  ;;  %vm845_vm1 = vcmp.eq.s32.totalorder %v843_v60, 1  ;;  %vm844_vm2 = vcmp.eq.s32.totalorder %v843_v60, 0 }
  0x39   :  { %1015 = vmatpush3.bf16.msra.mxu1 %v1116_v61  ;;  %994 = vmatprep.subr.bf16.mxu0 %v1117_v62 }
  0x3a   :  { %1016 = vmatprep.subr.bf16.mxu1 %v1119_v0 }
  0x3c   :  { %995 = vmatpush3.bf16.msra.mxu0 %v1118_v63 }
  0x3d   :  { %1017 = vmatpush3.bf16.msra.mxu1 %v1120_v1  ;;  %996 = vmatprep.subr.bf16.mxu0 %v1121_v2 }
  0x3e   :  { %1018 = vmatprep.subr.bf16.mxu1 %v1123_v4 }
  0x40   :  { %997 = vmatpush3.bf16.msra.mxu0 %v1122_v3 }
  0x41   :  { %1019 = vmatpush3.bf16.msra.mxu1 %v1126_v7  ;;  %1035 = vmatprep.subr.bf16.mxu0 %v1138_v13 }
  0x43   :  { %740 = vmatmul.mubr.bf16.vlgmr.msra.gmra.mxu0 %v861_v8 }
  0x44   :  { %1036 = vmatpush3.bf16.msra.mxu0 %v1129_v12  ;;  %780 = vmatmul.mubr.bf16.vlgmr.msra.gmra.mxu1 %v863_v10 }
  0x45   :  { %1037 = vmatprep.subr.bf16.mxu0 %v1138_v13  ;;  %1051 = vmatprep.mubr.msk.bf16.mxu0 %vm1139_vm0, %v1138_v13 }
  0x48   :  { %1038 = vmatpush3.bf16.msra.mxu0 %v1130_v14 }
  0x49   :  { %1039 = vmatprep.subr.bf16.mxu0 %v1138_v13 }
  0x4c   :  { %1040 = vmatpush3.bf16.msra.mxu0 %v1131_v15 }
  0x4d   :  { %1041 = vmatprep.subr.bf16.mxu0 %v1138_v13 }
  0x50   :  { %1042 = vmatpush3.bf16.msra.mxu0 %v1132_v16 }
  0x51   :  { %1043 = vmatprep.subr.bf16.mxu0 %v1138_v13 }
  0x54   :  { %1044 = vmatpush3.bf16.msra.mxu0 %v1133_v17 }
  0x55   :  { %1045 = vmatprep.subr.bf16.mxu0 %v1138_v13 }
  0x58   :  { %1046 = vmatpush3.bf16.msra.mxu0 %v1134_v18 }
  0x59   :  { %1047 = vmatprep.subr.bf16.mxu0 %v1138_v13 }
  0x5c   :  { %1048 = vmatpush3.bf16.msra.mxu0 %v1135_v19 }
  0x5d   :  { %1049 = vmatprep.subr.bf16.mxu0 %v1138_v13 }
  0x60   :  { %1050 = vmatpush3.bf16.msra.mxu0 %v1136_v20 }
  0x63   :  { %1052 = vmatmul.mubr.bf16.vlgmr.msra.gmra.mxu0 %v1137_v21 }
  0xe3   :  { %v954_v22 = vpop.f32.mrf.mxu0 }
  0xe4   :  { %v976_v23 = vpop.f32.mrf.mxu1 }
  0xe5   :  { %v955_v24 = vpop.f32.mrf.mxu0 }
  0xe6   :  { %v977_v25 = vpop.f32.mrf.mxu1  ;;  %v956_v38 = vadd.f32 %v955_v24, %v954_v22 }
  0xe7   :  { %v957_v26 = vpop.f32.mrf.mxu0  ;;  %v978_v39 = vadd.f32 %v977_v25, %v976_v23 }
  0xe8   :  { %v979_v27 = vpop.f32.mrf.mxu1 }
  0xe9   :  { %v958_v28 = vpop.f32.mrf.mxu0  ;;  %v702_v41 = vadd.f32 %v978_v39, %v956_v38 }
  0xea   :  { %v980_v29 = vpop.f32.mrf.mxu1 }
 0x103   :  { %v998_v30 = vpop.f32.mrf.mxu0 }
 0x104   :  { %v1020_v31 = vpop.f32.mrf.mxu1 }
 0x105   :  { %v999_v32 = vpop.f32.mrf.mxu0 }
 0x106   :  { %v1021_v33 = vpop.f32.mrf.mxu1  ;;  %v1000_v40 = vadd.f32 %v999_v32, %v998_v30 }
 0x107   :  { %v1001_v34 = vpop.f32.mrf.mxu0  ;;  %v1022_v43 = vadd.f32 %v1021_v33, %v1020_v31 }
 0x108   :  { %v1023_v35 = vpop.f32.mrf.mxu1  ;;  %v742_v42 = vadd.f32 %v1000_v40, %v702_v41 }
 0x109   :  { %v1002_v36 = vpop.f32.mrf.mxu0 }
 0x10a   :  { %v1024_v37 = vpop.f32.mrf.mxu1  ;;  %v782_v44 = vadd.f32 %v1022_v43, %v742_v42 }
 0x123   :  { %v821_v45 = vpop.f32.mrf.mxu0 }
 0x124   :  { %v822_v46 = vadd.f32 %v821_v45, %v782_v44 }
 0x125   :  { %v1053_v47 = vpop.f32.mrf.mxu0 }
 0x126   :  { %v827_v48 = vpack.c.bf16 %v822_v46, %v822_v46  ;;  %v829_v49 = vrot.slane %v822_v46, 4  ;;  %v835_v50 = vmul.f32 %v822_v46, %v822_v46 }
 0x127   :  { %v824_v51 = vpop.f32.mrf.mxu0 }
 0x128   :  { %828 = vst [vmem:[%s1399_s2] sm:$0xf] %v827_v48  ;;  %v830_v52 = vadd.f32 %v829_v49, %v822_v46  ;;  %v836_v53 = vrot.slane %v835_v50, 4 }
 0x129   :  { %v1054_v55 = vpop.f32.mrf.mxu0 }
 0x12a   :  { %v831_v56 = vrot.slane %v830_v52, 2  ;;  %v837_v57 = vadd.f32 %v836_v53, %v835_v50 }
 0x12c   :  { %v832_v58 = vadd.f32 %v831_v56, %v830_v52  ;;  %v838_v59 = vrot.slane %v837_v57, 2 }
 0x12e   :  { %v839_v61 = vadd.f32 %v838_v59, %v837_v57  ;;  %v833_v62 = vrot.slane %v832_v58, 1 }
 0x130   :  { %v840_v63 = vrot.slane %v839_v61, 1  ;;  %v834_v1 = vadd.f32 %v833_v62, %v832_v58 }
 0x132   :  { %v841_v0 = vadd.f32 %v840_v63, %v839_v61 }
 0x134   :  { %v846_v2 = vsel %vm845_vm1, %v841_v0, 0.0 }
 0x135   :  { %v847_v3 = vsel %vm844_vm2, %v834_v1, %v846_v2 }
 0x136   :  { %848 = vst [vmem:[%s1400_s3] sm:$0xff] %v847_v3 }

// kernel: resnet_forward.69
= control target key start
LH: loop header
LB: loop body
LE: loop exit
PB: predicated region body
PF: predicated region fallthrough
CT: control target
= control target key end

     0   :  { %v196_v0 = vmov 0.0   ;;  %vm197_vm0 = vmmov 0   ;;  %v45_v9 = vlaneseq  ;;  %vm53_vm1 = vcmask 1041409   ;;  %s278_s1 = inlined_call_operand.vmem [shape: f32[128,128], index: 1, kind: input, shape index: {}]   ;;  %s279_s0 = inlined_call_operand.vmem [shape: bf16[2,1,128], index: 0, kind: input, shape index: {}]   ;;  %s280_s2 = inlined_call_operand.vmem [shape: f32[1,128], index: 2, kind: input, shape index: {}]   ;;  %s281_s3 = inlined_call_operand.vmem [shape: f32[2,128], index: 3, kind: output, shape index: {}]  }
   0x1   :  { %155 = vmatprep.subr.mxu0 %v196_v0  ;;  %v35_v1 = vld [vmem:[%s278_s1 + $0x78] sm:$0xff]  ;;  %v34_v2 = vld [vmem:[%s278_s1 + $0x70] sm:$0xff]  ;;  %187 = vmatprep.mubr.msk.f32.mxu0 %vm197_vm0, %v196_v0  ;;  %v33_v3 = vld [vmem:[%s278_s1 + $0x68] sm:$0xff] }
   0x2   :  { %156 = vmatpush3.msra.mxu0 %v35_v1  ;;  %v32_v4 = vld [vmem:[%s278_s1 + $0x60] sm:$0xff]  ;;  %v31_v5 = vld [vmem:[%s278_s1 + $0x58] sm:$0xff]  ;;  %v30_v6 = vld [vmem:[%s278_s1 + $0x50] sm:$0xff]  ;;  %v46_v12 = vshrl.u32 %v45_v9, 7 }
   0x3   :  { %157 = vmatprep.subr.mxu0 %v196_v0  ;;  %v29_v7 = vld [vmem:[%s278_s1 + $0x48] sm:$0xff]  ;;  %v28_v8 = vld [vmem:[%s278_s1 + $0x40] sm:$0xff]  ;;  %v27_v10 = vld [vmem:[%s278_s1 + $0x38] sm:$0xff] }
   0x4   :  { %158 = vmatpush3.msra.mxu0 %v34_v2  ;;  %v26_v11 = vld [vmem:[%s278_s1 + $0x30] sm:$0xff]  ;;  %v25_v13 = vld [vmem:[%s278_s1 + $0x28] sm:$0xff]  ;;  %v14_v14 = vld [vmem:[%s279_s0] sm:$0x1]  ;;  %v47_v19 = vsub.s32 0, %v46_v12 }
   0x5   :  { %159 = vmatprep.subr.mxu0 %v196_v0  ;;  %v15_v15 = vld [vmem:[%s279_s0 + $0x1] sm:$0x1]  ;;  %v16_v17 = vunpack.c.l.bf16 %v14_v14  ;;  %v23_v20 = vld [vmem:[%s278_s1 + $0x18] sm:$0xff]  ;;  %v22_v21 = vld [vmem:[%s278_s1 + $0x10] sm:$0xff] }
   0x6   :  { %160 = vmatpush3.msra.mxu0 %v33_v3  ;;  %v24_v16 = vld [vmem:[%s278_s1 + $0x20] sm:$0xff]  ;;  %v17_v18 = vunpack.c.l.bf16 %v15_v15  ;;  %v21_v24 = vld [vmem:[%s278_s1 + $0x8] sm:$0xff] }
   0x7   :  { %161 = vmatprep.subr.mxu0 %v196_v0  ;;  %v48_v22 = vrot.slane %v16_v17, %v47_v19  ;;  %v20_v25 = vld [vmem:[%s278_s1] sm:$0xff] }
   0x8   :  { %162 = vmatpush3.msra.mxu0 %v32_v4  ;;  %v52_v23 = vrot.slane %v17_v18, %v47_v19  ;;  %v137_v27 = vld [vmem:[%s280_s2] ss:$0 sm:$0xff] }
   0x9   :  { %163 = vmatprep.subr.mxu0 %v196_v0 }
   0xa   :  { %164 = vmatpush3.msra.mxu0 %v31_v5  ;;  %v54_v26 = vsel %vm53_vm1, %v52_v23, %v48_v22 }
   0xb   :  { %165 = vmatprep.subr.mxu0 %v196_v0 }
   0xc   :  { %166 = vmatpush3.msra.mxu0 %v30_v6 }
   0xd   :  { %167 = vmatprep.subr.mxu0 %v196_v0 }
   0xe   :  { %168 = vmatpush3.msra.mxu0 %v29_v7 }
   0xf   :  { %169 = vmatprep.subr.mxu0 %v196_v0 }
  0x10   :  { %170 = vmatpush3.msra.mxu0 %v28_v8 }
  0x11   :  { %171 = vmatprep.subr.mxu0 %v196_v0 }
  0x12   :  { %172 = vmatpush3.msra.mxu0 %v27_v10 }
  0x13   :  { %173 = vmatprep.subr.mxu0 %v196_v0 }
  0x14   :  { %174 = vmatpush3.msra.mxu0 %v26_v11 }
  0x15   :  { %175 = vmatprep.subr.mxu0 %v196_v0 }
  0x16   :  { %176 = vmatpush3.msra.mxu0 %v25_v13 }
  0x17   :  { %177 = vmatprep.subr.mxu0 %v196_v0 }
  0x18   :  { %178 = vmatpush3.msra.mxu0 %v24_v16 }
  0x19   :  { %179 = vmatprep.subr.mxu0 %v196_v0 }
  0x1a   :  { %180 = vmatpush3.msra.mxu0 %v23_v20 }
  0x1b   :  { %181 = vmatprep.subr.mxu0 %v196_v0 }
  0x1c   :  { %182 = vmatpush3.msra.mxu0 %v22_v21 }
  0x1d   :  { %183 = vmatprep.subr.mxu0 %v196_v0 }
  0x1e   :  { %184 = vmatpush3.msra.mxu0 %v21_v24 }
  0x1f   :  { %185 = vmatprep.subr.mxu0 %v196_v0 }
  0x20   :  { %186 = vmatpush3.msra.mxu0 %v20_v25 }
  0x21   :  { %188 = vmatmul.mubr.f32.vlgmr.msra.gmra.mxu0 %v54_v26 }
  0xe1   :  { %v122_v28 = vpop.f32.mrf.mxu0 }
  0xe2   :  { %v123_v29 = vadd.f32 %v137_v27, %v122_v28 }
  0xe3   :  { %v189_v30 = vpop.f32.mrf.mxu0 }
  0xe4   :  { %v126_v31 = vsub.f32 0.0, %v123_v29 }
  0xe6   :  { %v127_v32 = vmul.f32 1.442695, %v126_v31 }
  0xe8   :  { %192 = vpow2.f32 %v127_v32 }
  0xf5   :  { %v193_v33 = vpop.eup %192 }
  0xf6   :  { %v129_v34 = vadd.f32 1.0, %v193_v33 }
  0xf8   :  { %194 = vrcp.f32 %v129_v34 }
 0x105   :  { %v195_v35 = vpop.eup %194 }
 0x106   :  { %132 = vst [vmem:[%s281_s3] sm:$0x3] %v195_v35 }

</bundles_post_ra>
